<compile_context>
chip_gen: v7x
topology: tpu7x:2x2x1
jax: 0.10.0
libtpu: 0.0.40
codegen_flags: <defaults>
</compile_context>

<pallas_src>
import math

import numpy as np
import jax
import jax.numpy as jnp
from jax.experimental import pallas as pl
from jax.experimental.pallas import tpu as pltpu

NHEAD = 4
D_MODEL = 32
DIM_FF = 64
FM_LEN = 32
LP_LEN = 16
CLASS_NUM = 75
CLS_PAD = 128          # classifier / packed-param lane width (full vreg lane)
LN_EPS = 1e-5
IMG_H, IMG_W = 32, 256

# (Cin, H, W, Cout) of the four stride-2 / pad-1 3x3 convs in
# LP32x256_C32x32_FM2x16: (3,32,256)->(8,16,128)->(16,8,64)->(32,4,32)->(32,2,16)
_CONV_DIMS = ((3, 32, 256, 8), (8, 16, 128, 16), (16, 8, 64, 32), (32, 4, 32, 32))


# ----------------------------------------------------------------------------
# Packed head-parameter layout: one (rows, 128) f32 slab, static row offsets.
# ----------------------------------------------------------------------------
_HEAD_LAYOUT = (
    ("pos", FM_LEN, D_MODEL), ("qemb", LP_LEN, D_MODEL),
    ("e_wqkv", D_MODEL, 3 * D_MODEL), ("e_bqkv", 1, 3 * D_MODEL),
    ("e_wo", D_MODEL, D_MODEL), ("e_bo", 1, D_MODEL),
    ("e_ln1g", 1, D_MODEL), ("e_ln1b", 1, D_MODEL),
    ("e_w1", D_MODEL, DIM_FF), ("e_b1", 1, DIM_FF),
    ("e_w2", DIM_FF, D_MODEL), ("e_b2", 1, D_MODEL),
    ("e_ln2g", 1, D_MODEL), ("e_ln2b", 1, D_MODEL),
    ("d_wqkv", D_MODEL, 3 * D_MODEL), ("d_bqkv", 1, 3 * D_MODEL),
    ("d_wo1", D_MODEL, D_MODEL), ("d_bo1", 1, D_MODEL),
    ("d_ln1g", 1, D_MODEL), ("d_ln1b", 1, D_MODEL),
    ("d_wq", D_MODEL, D_MODEL), ("d_bq", 1, D_MODEL),
    ("d_wkv", D_MODEL, 2 * D_MODEL), ("d_bkv", 1, 2 * D_MODEL),
    ("d_wo2", D_MODEL, D_MODEL), ("d_bo2", 1, D_MODEL),
    ("d_ln2g", 1, D_MODEL), ("d_ln2b", 1, D_MODEL),
    ("d_w1", D_MODEL, DIM_FF), ("d_b1", 1, DIM_FF),
    ("d_w2", DIM_FF, D_MODEL), ("d_b2", 1, D_MODEL),
    ("d_ln3g", 1, D_MODEL), ("d_ln3b", 1, D_MODEL),
    ("cls_w", D_MODEL, CLS_PAD), ("cls_b", 1, CLS_PAD),
)


def _head_offsets():
    offs, row = {}, 0
    for name, r, c in _HEAD_LAYOUT:
        offs[name] = (row, r, c)
        row += r
    return offs, ((row + 7) // 8) * 8          # pad rows to a sublane multiple


_HEAD_OFFSETS, _HEAD_ROWS = _head_offsets()


# ----------------------------------------------------------------------------
# The single fused kernel: backbone + neck + transformer head + classifier.
# ----------------------------------------------------------------------------
def _fused_kernel(img_ref, s1, m1, s2, m2, s3, m3, s4, m4, cb_ref, hp_ref,
                  out_ref):
    f32 = jnp.float32
    dh = D_MODEL // NHEAD
    scale = 1.0 / math.sqrt(dh)

    # --- packed-parameter access (static slices, free) ----------------------
    def hp(name):
        off, r, c = _HEAD_OFFSETS[name]
        return hp_ref[pl.ds(off, r), pl.ds(0, c)]

    # --- conv layer: X_out^T = relu(sum_dx S_dx @ X^T @ M_dx + b) -----------
    def conv(xT, s_ref, m_ref, layer):
        u = [jnp.dot(s_ref[dx], xT, preferred_element_type=f32)
             for dx in range(3)]
        u = jnp.concatenate(u, axis=1)                     # (Wo, 3*Cin*H)
        y = jnp.dot(u, m_ref[...], preferred_element_type=f32)
        y = y + cb_ref[pl.ds(layer, 1), pl.ds(0, m_ref.shape[1])]
        return jnp.maximum(y, 0.0)

    # --- transformer building blocks -----------------------------------------
    def layer_norm(x, g, b):
        xm = x - jnp.mean(x, axis=-1, keepdims=True)
        var = jnp.mean(xm * xm, axis=-1, keepdims=True)
        return xm * jax.lax.rsqrt(var + LN_EPS) * g + b

    def attention(q, k, v, wo, bo):
        # All heads in one batched contraction; one (D,D) output projection.
        qh = jnp.stack([q[:, h * dh:(h + 1) * dh] for h in range(NHEAD)], 0)
        kh = jnp.stack([k[:, h * dh:(h + 1) * dh] for h in range(NHEAD)], 0)
        vh = jnp.stack([v[:, h * dh:(h + 1) * dh] for h in range(NHEAD)], 0)
        s = jnp.einsum("hqd,hkd->hqk", qh, kh,
                       preferred_element_type=f32) * scale
        s = s - jnp.max(s, axis=-1, keepdims=True)
        p = jnp.exp(s)
        p = p / jnp.sum(p, axis=-1, keepdims=True)
        o = jnp.einsum("hqk,hkd->hqd", p, vh, preferred_element_type=f32)
        o = jnp.concatenate([o[h] for h in range(NHEAD)], axis=-1)   # (Lq, D)
        return jnp.dot(o, wo, preferred_element_type=f32) + bo

    def self_attn(x, wqkv, bqkv, wo, bo):
        qkv = jnp.dot(x, wqkv, preferred_element_type=f32) + bqkv    # (L, 3D)
        return attention(qkv[:, :D_MODEL], qkv[:, D_MODEL:2 * D_MODEL],
                         qkv[:, 2 * D_MODEL:], wo, bo)

    def ffn(x, w1, b1, w2, b2):
        h = jnp.maximum(jnp.dot(x, w1, preferred_element_type=f32) + b1, 0.0)
        return jnp.dot(h, w2, preferred_element_type=f32) + b2

    # ========================= backbone (one image) ==========================
    xT = img_ref[0]                                  # (256, 96)  = X0^T
    xT = conv(xT, s1, m1, 0)                         # (128, 128)
    xT = conv(xT, s2, m2, 1)                         # (64, 128)
    xT = conv(xT, s3, m3, 2)                         # (32, 128)
    xT = conv(xT, s4, m4, 3)                         # (16, 64)  cols = (h, c)

    # ========================= neck "flate" ==================================
    # tokens t = h*16 + w, features = channels  ->  mem (FM_LEN=32, D=32)
    mem = jnp.concatenate([xT[:, :D_MODEL], xT[:, D_MODEL:2 * D_MODEL]], axis=0)

    # ========================= encoder layer =================================
    mem = mem + hp("pos")
    mem = layer_norm(mem + self_attn(mem, hp("e_wqkv"), hp("e_bqkv"),
                                     hp("e_wo"), hp("e_bo")),
                     hp("e_ln1g"), hp("e_ln1b"))
    mem = layer_norm(mem + ffn(mem, hp("e_w1"), hp("e_b1"),
                               hp("e_w2"), hp("e_b2")),
                     hp("e_ln2g"), hp("e_ln2b"))

    # ========================= decoder (16 learned queries) ==================
    q = hp("qemb")                                   # (16, 32)
    q = layer_norm(q + self_attn(q, hp("d_wqkv"), hp("d_bqkv"),
                                 hp("d_wo1"), hp("d_bo1")),
                   hp("d_ln1g"), hp("d_ln1b"))
    qq = jnp.dot(q, hp("d_wq"), preferred_element_type=f32) + hp("d_bq")
    kv = jnp.dot(mem, hp("d_wkv"), preferred_element_type=f32) + hp("d_bkv")
    ca = attention(qq, kv[:, :D_MODEL], kv[:, D_MODEL:],
                   hp("d_wo2"), hp("d_bo2"))
    q = layer_norm(q + ca, hp("d_ln2g"), hp("d_ln2b"))
    q = layer_norm(q + ffn(q, hp("d_w1"), hp("d_b1"), hp("d_w2"), hp("d_b2")),
                   hp("d_ln3g"), hp("d_ln3b"))

    # ========================= CTC classifier ================================
    # Padded lanes 75..127 are zero weights -> logit 0; sliced off outside,
    # BEFORE any softmax/log-softmax, so they never contaminate probabilities.
    logits = jnp.dot(q, hp("cls_w"), preferred_element_type=f32) + hp("cls_b")
    out_ref[0] = logits                              # (16, 128)


def _cost_estimate(B, args):
    macs = 0
    for cin, h, w, cout in _CONV_DIMS:
        ho, wo, cinh = h // 2, w // 2, cin * h
        macs += 3 * wo * w * cinh + wo * 3 * cinh * cout * ho
    dh = D_MODEL // NHEAD
    macs += FM_LEN * D_MODEL * (4 * D_MODEL + 2 * DIM_FF + 2 * D_MODEL)
    macs += LP_LEN * D_MODEL * (4 * D_MODEL + 4 * D_MODEL + 2 * DIM_FF + CLS_PAD)
    macs += NHEAD * dh * (FM_LEN * FM_LEN + LP_LEN * LP_LEN + 2 * LP_LEN * FM_LEN)
    trans = NHEAD * (FM_LEN * FM_LEN + LP_LEN * LP_LEN + LP_LEN * FM_LEN)
    bytes_acc = 4 * (sum(int(a.size) for a in args) + B * LP_LEN * CLS_PAD)
    return pl.CostEstimate(flops=2 * B * macs, transcendentals=B * trans,
                           bytes_accessed=int(bytes_acc))


# ----------------------------------------------------------------------------
# Full model forward: one XLA relayout of the raw input + ONE pallas_call.
# ----------------------------------------------------------------------------
def forward(img, P):
    B = img.shape[0]
    # NCHW -> per-image transposed slab X0^T[w, ci*H + h] (the only XLA op).
    imgT = jnp.transpose(img, (0, 3, 1, 2)).reshape(B, IMG_W, 3 * IMG_H)

    weights = (P["s1"], P["m1"], P["s2"], P["m2"], P["s3"], P["m3"],
               P["s4"], P["m4"], P["cbias"], P["head"])

    def rep_spec(a):
        return pl.BlockSpec(a.shape, lambda b, _nd=a.ndim: (0,) * _nd)

    out = pl.pallas_call(
        _fused_kernel,
        out_shape=jax.ShapeDtypeStruct((B, LP_LEN, CLS_PAD), jnp.float32),
        grid_spec=pltpu.PrefetchScalarGridSpec(
            num_scalar_prefetch=0,
            grid=(B,),
            in_specs=[pl.BlockSpec((1, IMG_W, 3 * IMG_H), lambda b: (b, 0, 0))]
                     + [rep_spec(a) for a in weights],
            out_specs=pl.BlockSpec((1, LP_LEN, CLS_PAD), lambda b: (b, 0, 0))),
        compiler_params=pltpu.CompilerParams(dimension_semantics=("parallel",)),
        cost_estimate=_cost_estimate(B, (imgT,) + weights),
    )(imgT, *weights)
    return out[:, :, :CLASS_NUM]                     # (B, 16, 75)


# ----------------------------------------------------------------------------
# Deterministic synthetic parameters (PyTorch-like layout).
# ----------------------------------------------------------------------------
def make_params(key):
    keys = list(jax.random.split(key, 64))
    it = iter(keys)

    def nrm(shape, fan_in):
        return jax.random.normal(next(it), shape, jnp.float32) / math.sqrt(fan_in)

    def mha_params(d):
        return {"wq": nrm((d, d), d), "bq": jnp.zeros((d,), jnp.float32),
                "wk": nrm((d, d), d), "bk": jnp.zeros((d,), jnp.float32),
                "wv": nrm((d, d), d), "bv": jnp.zeros((d,), jnp.float32),
                "wo": nrm((d, d), d), "bo": jnp.zeros((d,), jnp.float32)}

    def ffn_params(d, dff):
        return {"w1": nrm((d, dff), d), "b1": jnp.zeros((dff,), jnp.float32),
                "w2": nrm((dff, d), dff), "b2": jnp.zeros((d,), jnp.float32)}

    ones = lambda n: jnp.ones((n,), jnp.float32)
    zeros = lambda n: jnp.zeros((n,), jnp.float32)

    P = {"pos_fm": nrm((FM_LEN, D_MODEL), D_MODEL),
         "query_emb": nrm((LP_LEN, D_MODEL), D_MODEL),
         "enc_sa": mha_params(D_MODEL), "enc_ff": ffn_params(D_MODEL, DIM_FF),
         "enc_ln1_g": ones(D_MODEL), "enc_ln1_b": zeros(D_MODEL),
         "enc_ln2_g": ones(D_MODEL), "enc_ln2_b": zeros(D_MODEL),
         "dec_sa": mha_params(D_MODEL), "dec_ca": mha_params(D_MODEL),
         "dec_ff": ffn_params(D_MODEL, DIM_FF),
         "dec_ln1_g": ones(D_MODEL), "dec_ln1_b": zeros(D_MODEL),
         "dec_ln2_g": ones(D_MODEL), "dec_ln2_b": zeros(D_MODEL),
         "dec_ln3_g": ones(D_MODEL), "dec_ln3_b": zeros(D_MODEL),
         "cls_w": nrm((D_MODEL, CLASS_NUM), D_MODEL), "cls_b": zeros(CLASS_NUM)}
    for idx, (cin, _, _, cout) in enumerate(_CONV_DIMS):
        P[f"c{idx+1}_w"] = nrm((3, 3, cin, cout), 9 * cin)     # HWIO
        P[f"c{idx+1}_b"] = zeros(cout)
    return P


def _conv_mats(w_hwio, b, cin, h, w, cout, token_cols):
    """Fold one stride-2 / pad-1 3x3 conv into (S_dx, M, bias-row) matrices for
    the transposed-orientation in-kernel evaluation.  Zero padding is encoded
    by simply omitting out-of-range taps."""
    ho, wo = h // 2, w // 2
    wnp = np.asarray(w_hwio, np.float32)               # (3, 3, cin, cout)
    bnp = np.asarray(b, np.float32)

    s = np.zeros((3, wo, w), np.float32)                # column-tap selection
    for dx in range(3):
        for j in range(wo):
            c = 2 * j + dx - 1
            if 0 <= c < w:
                s[dx, j, c] = 1.0

    ncols = cout * ho
    m = np.zeros((3, cin, h, ncols), np.float32)        # row taps x weights
    brow = np.zeros((CLS_PAD,), np.float32)
    for i in range(ho):
        for co in range(cout):
            col = i * cout + co if token_cols else co * ho + i
            brow[col] = bnp[co]
            for dy in range(3):
                r = 2 * i + dy - 1
                if 0 <= r < h:
                    for dx in range(3):
                        m[dx, :, r, col] = wnp[dy, dx, :, co]
    return s, m.reshape(3 * cin * h, ncols), brow


def pack_params(P):
    """One-time repack of PyTorch-style params into the fused-kernel layout."""
    Pk = {}

    # --- backbone: fold convs into (S, M) matmul form -----------------------
    cbias = np.zeros((4, CLS_PAD), np.float32)
    for idx, (cin, h, w, cout) in enumerate(_CONV_DIMS):
        s, m, brow = _conv_mats(P[f"c{idx+1}_w"], P[f"c{idx+1}_b"],
                                cin, h, w, cout, token_cols=(idx == 3))
        Pk[f"s{idx+1}"] = jnp.asarray(s)
        Pk[f"m{idx+1}"] = jnp.asarray(m)
        cbias[idx] = brow
    Pk["cbias"] = jnp.asarray(cbias)

    # --- head: pack everything into one (rows, 128) slab (single DMA) -------
    def cat(*xs, axis=0):
        return np.concatenate([np.asarray(x, np.float32) for x in xs], axis)

    e, d, c = P["enc_sa"], P["dec_sa"], P["dec_ca"]
    ef, df = P["enc_ff"], P["dec_ff"]
    vals = {
        "pos": P["pos_fm"], "qemb": P["query_emb"],
        "e_wqkv": cat(e["wq"], e["wk"], e["wv"], axis=1),
        "e_bqkv": cat(e["bq"], e["bk"], e["bv"]),
        "e_wo": e["wo"], "e_bo": e["bo"],
        "e_ln1g": P["enc_ln1_g"], "e_ln1b": P["enc_ln1_b"],
        "e_w1": ef["w1"], "e_b1": ef["b1"], "e_w2": ef["w2"], "e_b2": ef["b2"],
        "e_ln2g": P["enc_ln2_g"], "e_ln2b": P["enc_ln2_b"],
        "d_wqkv": cat(d["wq"], d["wk"], d["wv"], axis=1),
        "d_bqkv": cat(d["bq"], d["bk"], d["bv"]),
        "d_wo1": d["wo"], "d_bo1": d["bo"],
        "d_ln1g": P["dec_ln1_g"], "d_ln1b": P["dec_ln1_b"],
        "d_wq": c["wq"], "d_bq": c["bq"],
        "d_wkv": cat(c["wk"], c["wv"], axis=1),
        "d_bkv": cat(c["bk"], c["bv"]),
        "d_wo2": c["wo"], "d_bo2": c["bo"],
        "d_ln2g": P["dec_ln2_g"], "d_ln2b": P["dec_ln2_b"],
        "d_w1": df["w1"], "d_b1": df["b1"], "d_w2": df["w2"], "d_b2": df["b2"],
        "d_ln3g": P["dec_ln3_g"], "d_ln3b": P["dec_ln3_b"],
        "cls_w": np.pad(np.asarray(P["cls_w"], np.float32),
                        ((0, 0), (0, CLS_PAD - CLASS_NUM))),
        "cls_b": np.pad(np.asarray(P["cls_b"], np.float32),
                        ((0, CLS_PAD - CLASS_NUM),)),
    }
    slab = np.zeros((_HEAD_ROWS, CLS_PAD), np.float32)
    for name, r, cc in _HEAD_LAYOUT:
        off = _HEAD_OFFSETS[name][0]
        slab[off:off + r, :cc] = np.asarray(vals[name], np.float32).reshape(r, cc)
    Pk["head"] = jnp.asarray(slab)
    return Pk


if __name__ == "__main__":
    key = jax.random.PRNGKey(0)
    pkey, xkey = jax.random.split(key)
    params = pack_params(make_params(pkey))
    # NCHW input, as the PyTorch module expects: 32x256 license-plate image.
    img = jax.random.normal(xkey, (2, 3, IMG_H, IMG_W), jnp.float32)

    out = jax.jit(forward)(img, params)
    out = jax.block_until_ready(out)
    assert out.shape == (2, LP_LEN, CLASS_NUM), out.shape
    assert bool(jnp.all(jnp.isfinite(out)))
    print("KERNEL_OK")
</pallas_src>

<mosaic_0001>
module attributes {stable_mosaic.version = 11 : i64} {
  func.func @_fused_kernel(%arg0: i32, %arg1: memref<1x256x96xf32, #tpu.memory_space<vmem>>, %arg2: memref<3x128x256xf32, #tpu.memory_space<vmem>>, %arg3: memref<288x128xf32, #tpu.memory_space<vmem>>, %arg4: memref<3x64x128xf32, #tpu.memory_space<vmem>>, %arg5: memref<384x128xf32, #tpu.memory_space<vmem>>, %arg6: memref<3x32x64xf32, #tpu.memory_space<vmem>>, %arg7: memref<384x128xf32, #tpu.memory_space<vmem>>, %arg8: memref<3x16x32xf32, #tpu.memory_space<vmem>>, %arg9: memref<384x64xf32, #tpu.memory_space<vmem>>, %arg10: memref<4x128xf32, #tpu.memory_space<vmem>>, %arg11: memref<520x128xf32, #tpu.memory_space<vmem>>, %arg12: memref<1x16x128xf32, #tpu.memory_space<vmem>>) attributes {dimension_semantics = [#tpu.dimension_semantics<parallel>], iteration_bounds = array<i64: 2>, scalar_prefetch = 0 : i64, scratch_operands = 0 : i64, tpu.core_type = #tpu.core_type<tc>, window_params = [{transform_indices = @transform_0, window_bounds = array<i64: 1, 256, 96>}, {pipeline_mode = #tpu.pipeline_mode<synchronous>, transform_indices = @transform_1, window_bounds = array<i64: 3, 128, 256>}, {pipeline_mode = #tpu.pipeline_mode<synchronous>, transform_indices = @transform_2, window_bounds = array<i64: 288, 128>}, {pipeline_mode = #tpu.pipeline_mode<synchronous>, transform_indices = @transform_3, window_bounds = array<i64: 3, 64, 128>}, {pipeline_mode = #tpu.pipeline_mode<synchronous>, transform_indices = @transform_4, window_bounds = array<i64: 384, 128>}, {pipeline_mode = #tpu.pipeline_mode<synchronous>, transform_indices = @transform_5, window_bounds = array<i64: 3, 32, 64>}, {pipeline_mode = #tpu.pipeline_mode<synchronous>, transform_indices = @transform_6, window_bounds = array<i64: 384, 128>}, {pipeline_mode = #tpu.pipeline_mode<synchronous>, transform_indices = @transform_7, window_bounds = array<i64: 3, 16, 32>}, {pipeline_mode = #tpu.pipeline_mode<synchronous>, transform_indices = @transform_8, window_bounds = array<i64: 384, 64>}, {pipeline_mode = #tpu.pipeline_mode<synchronous>, transform_indices = @transform_9, window_bounds = array<i64: 4, 128>}, {pipeline_mode = #tpu.pipeline_mode<synchronous>, transform_indices = @transform_10, window_bounds = array<i64: 520, 128>}, {transform_indices = @transform_11, window_bounds = array<i64: 1, 16, 128>}]} {
    %c0 = arith.constant 0 : index
    %c0_0 = arith.constant 0 : index
    %c0_1 = arith.constant 0 : index
    %0 = vector.load %arg1[%c0, %c0_0, %c0_1] : memref<1x256x96xf32, #tpu.memory_space<vmem>>, vector<1x256x96xf32>
    %1 = vector.shape_cast %0 : vector<1x256x96xf32> to vector<256x96xf32>
    %c0_2 = arith.constant 0 : index
    %c0_3 = arith.constant 0 : index
    %c0_4 = arith.constant 0 : index
    %2 = vector.load %arg2[%c0_2, %c0_3, %c0_4] : memref<3x128x256xf32, #tpu.memory_space<vmem>>, vector<1x128x256xf32>
    %3 = vector.shape_cast %2 : vector<1x128x256xf32> to vector<128x256xf32>
    %cst = arith.constant dense<0.000000e+00> : vector<128x96xf32>
    %4 = tpu.matmul %3, %1, %cst {dimension_numbers = #tpu.dot_dimension_numbers<[1], [0], [0], [1], [0, 0, 1, 1], [], []>} : vector<128x256xf32>, vector<256x96xf32>, vector<128x96xf32> -> vector<128x96xf32>
    %c1 = arith.constant 1 : index
    %c0_5 = arith.constant 0 : index
    %c0_6 = arith.constant 0 : index
    %5 = vector.load %arg2[%c1, %c0_5, %c0_6] : memref<3x128x256xf32, #tpu.memory_space<vmem>>, vector<1x128x256xf32>
    %6 = vector.shape_cast %5 : vector<1x128x256xf32> to vector<128x256xf32>
    %cst_7 = arith.constant dense<0.000000e+00> : vector<128x96xf32>
    %7 = tpu.matmul %6, %1, %cst_7 {dimension_numbers = #tpu.dot_dimension_numbers<[1], [0], [0], [1], [0, 0, 1, 1], [], []>} : vector<128x256xf32>, vector<256x96xf32>, vector<128x96xf32> -> vector<128x96xf32>
    %c2 = arith.constant 2 : index
    %c0_8 = arith.constant 0 : index
    %c0_9 = arith.constant 0 : index
    %8 = vector.load %arg2[%c2, %c0_8, %c0_9] : memref<3x128x256xf32, #tpu.memory_space<vmem>>, vector<1x128x256xf32>
    %9 = vector.shape_cast %8 : vector<1x128x256xf32> to vector<128x256xf32>
    %cst_10 = arith.constant dense<0.000000e+00> : vector<128x96xf32>
    %10 = tpu.matmul %9, %1, %cst_10 {dimension_numbers = #tpu.dot_dimension_numbers<[1], [0], [0], [1], [0, 0, 1, 1], [], []>} : vector<128x256xf32>, vector<256x96xf32>, vector<128x96xf32> -> vector<128x96xf32>
    %11 = tpu.concatenate %4, %7, %10 in 1 : vector<128x96xf32>, vector<128x96xf32>, vector<128x96xf32> -> vector<128x288xf32>
    %c0_11 = arith.constant 0 : index
    %c0_12 = arith.constant 0 : index
    %12 = vector.load %arg3[%c0_11, %c0_12] : memref<288x128xf32, #tpu.memory_space<vmem>>, vector<288x128xf32>
    %cst_13 = arith.constant dense<0.000000e+00> : vector<128x128xf32>
    %13 = tpu.matmul %11, %12, %cst_13 {dimension_numbers = #tpu.dot_dimension_numbers<[1], [0], [0], [1], [0, 0, 1, 1], [], []>} : vector<128x288xf32>, vector<288x128xf32>, vector<128x128xf32> -> vector<128x128xf32>
    %c0_14 = arith.constant 0 : index
    %c0_15 = arith.constant 0 : index
    %14 = vector.load %arg10[%c0_14, %c0_15] : memref<4x128xf32, #tpu.memory_space<vmem>>, vector<1x128xf32>
    %15 = vector.broadcast %14 : vector<1x128xf32> to vector<128x128xf32>
    %16 = arith.addf %13, %15 : vector<128x128xf32>
    %cst_16 = arith.constant 0.000000e+00 : f32
    %17 = vector.broadcast %cst_16 : f32 to vector<128x128xf32>
    %18 = arith.maximumf %16, %17 : vector<128x128xf32>
    %c0_17 = arith.constant 0 : index
    %c0_18 = arith.constant 0 : index
    %c0_19 = arith.constant 0 : index
    %19 = vector.load %arg4[%c0_17, %c0_18, %c0_19] : memref<3x64x128xf32, #tpu.memory_space<vmem>>, vector<1x64x128xf32>
    %20 = vector.shape_cast %19 : vector<1x64x128xf32> to vector<64x128xf32>
    %cst_20 = arith.constant dense<0.000000e+00> : vector<64x128xf32>
    %21 = tpu.matmul %20, %18, %cst_20 {dimension_numbers = #tpu.dot_dimension_numbers<[1], [0], [0], [1], [0, 0, 1, 1], [], []>} : vector<64x128xf32>, vector<128x128xf32>, vector<64x128xf32> -> vector<64x128xf32>
    %c1_21 = arith.constant 1 : index
    %c0_22 = arith.constant 0 : index
    %c0_23 = arith.constant 0 : index
    %22 = vector.load %arg4[%c1_21, %c0_22, %c0_23] : memref<3x64x128xf32, #tpu.memory_space<vmem>>, vector<1x64x128xf32>
    %23 = vector.shape_cast %22 : vector<1x64x128xf32> to vector<64x128xf32>
    %cst_24 = arith.constant dense<0.000000e+00> : vector<64x128xf32>
    %24 = tpu.matmul %23, %18, %cst_24 {dimension_numbers = #tpu.dot_dimension_numbers<[1], [0], [0], [1], [0, 0, 1, 1], [], []>} : vector<64x128xf32>, vector<128x128xf32>, vector<64x128xf32> -> vector<64x128xf32>
    %c2_25 = arith.constant 2 : index
    %c0_26 = arith.constant 0 : index
    %c0_27 = arith.constant 0 : index
    %25 = vector.load %arg4[%c2_25, %c0_26, %c0_27] : memref<3x64x128xf32, #tpu.memory_space<vmem>>, vector<1x64x128xf32>
    %26 = vector.shape_cast %25 : vector<1x64x128xf32> to vector<64x128xf32>
    %cst_28 = arith.constant dense<0.000000e+00> : vector<64x128xf32>
    %27 = tpu.matmul %26, %18, %cst_28 {dimension_numbers = #tpu.dot_dimension_numbers<[1], [0], [0], [1], [0, 0, 1, 1], [], []>} : vector<64x128xf32>, vector<128x128xf32>, vector<64x128xf32> -> vector<64x128xf32>
    %28 = tpu.concatenate %21, %24, %27 in 1 : vector<64x128xf32>, vector<64x128xf32>, vector<64x128xf32> -> vector<64x384xf32>
    %c0_29 = arith.constant 0 : index
    %c0_30 = arith.constant 0 : index
    %29 = vector.load %arg5[%c0_29, %c0_30] : memref<384x128xf32, #tpu.memory_space<vmem>>, vector<384x128xf32>
    %cst_31 = arith.constant dense<0.000000e+00> : vector<64x128xf32>
    %30 = tpu.matmul %28, %29, %cst_31 {dimension_numbers = #tpu.dot_dimension_numbers<[1], [0], [0], [1], [0, 0, 1, 1], [], []>} : vector<64x384xf32>, vector<384x128xf32>, vector<64x128xf32> -> vector<64x128xf32>
    %c1_32 = arith.constant 1 : index
    %c0_33 = arith.constant 0 : index
    %31 = vector.load %arg10[%c1_32, %c0_33] : memref<4x128xf32, #tpu.memory_space<vmem>>, vector<1x128xf32>
    %32 = vector.broadcast %31 : vector<1x128xf32> to vector<64x128xf32>
    %33 = arith.addf %30, %32 : vector<64x128xf32>
    %cst_34 = arith.constant 0.000000e+00 : f32
    %34 = vector.broadcast %cst_34 : f32 to vector<64x128xf32>
    %35 = arith.maximumf %33, %34 : vector<64x128xf32>
    %c0_35 = arith.constant 0 : index
    %c0_36 = arith.constant 0 : index
    %c0_37 = arith.constant 0 : index
    %36 = vector.load %arg6[%c0_35, %c0_36, %c0_37] : memref<3x32x64xf32, #tpu.memory_space<vmem>>, vector<1x32x64xf32>
    %37 = vector.shape_cast %36 : vector<1x32x64xf32> to vector<32x64xf32>
    %cst_38 = arith.constant dense<0.000000e+00> : vector<32x128xf32>
    %38 = tpu.matmul %37, %35, %cst_38 {dimension_numbers = #tpu.dot_dimension_numbers<[1], [0], [0], [1], [0, 0, 1, 1], [], []>} : vector<32x64xf32>, vector<64x128xf32>, vector<32x128xf32> -> vector<32x128xf32>
    %c1_39 = arith.constant 1 : index
    %c0_40 = arith.constant 0 : index
    %c0_41 = arith.constant 0 : index
    %39 = vector.load %arg6[%c1_39, %c0_40, %c0_41] : memref<3x32x64xf32, #tpu.memory_space<vmem>>, vector<1x32x64xf32>
    %40 = vector.shape_cast %39 : vector<1x32x64xf32> to vector<32x64xf32>
    %cst_42 = arith.constant dense<0.000000e+00> : vector<32x128xf32>
    %41 = tpu.matmul %40, %35, %cst_42 {dimension_numbers = #tpu.dot_dimension_numbers<[1], [0], [0], [1], [0, 0, 1, 1], [], []>} : vector<32x64xf32>, vector<64x128xf32>, vector<32x128xf32> -> vector<32x128xf32>
    %c2_43 = arith.constant 2 : index
    %c0_44 = arith.constant 0 : index
    %c0_45 = arith.constant 0 : index
    %42 = vector.load %arg6[%c2_43, %c0_44, %c0_45] : memref<3x32x64xf32, #tpu.memory_space<vmem>>, vector<1x32x64xf32>
    %43 = vector.shape_cast %42 : vector<1x32x64xf32> to vector<32x64xf32>
    %cst_46 = arith.constant dense<0.000000e+00> : vector<32x128xf32>
    %44 = tpu.matmul %43, %35, %cst_46 {dimension_numbers = #tpu.dot_dimension_numbers<[1], [0], [0], [1], [0, 0, 1, 1], [], []>} : vector<32x64xf32>, vector<64x128xf32>, vector<32x128xf32> -> vector<32x128xf32>
    %45 = tpu.concatenate %38, %41, %44 in 1 : vector<32x128xf32>, vector<32x128xf32>, vector<32x128xf32> -> vector<32x384xf32>
    %c0_47 = arith.constant 0 : index
    %c0_48 = arith.constant 0 : index
    %46 = vector.load %arg7[%c0_47, %c0_48] : memref<384x128xf32, #tpu.memory_space<vmem>>, vector<384x128xf32>
    %cst_49 = arith.constant dense<0.000000e+00> : vector<32x128xf32>
    %47 = tpu.matmul %45, %46, %cst_49 {dimension_numbers = #tpu.dot_dimension_numbers<[1], [0], [0], [1], [0, 0, 1, 1], [], []>} : vector<32x384xf32>, vector<384x128xf32>, vector<32x128xf32> -> vector<32x128xf32>
    %c2_50 = arith.constant 2 : index
    %c0_51 = arith.constant 0 : index
    %48 = vector.load %arg10[%c2_50, %c0_51] : memref<4x128xf32, #tpu.memory_space<vmem>>, vector<1x128xf32>
    %49 = vector.broadcast %48 : vector<1x128xf32> to vector<32x128xf32>
    %50 = arith.addf %47, %49 : vector<32x128xf32>
    %cst_52 = arith.constant 0.000000e+00 : f32
    %51 = vector.broadcast %cst_52 : f32 to vector<32x128xf32>
    %52 = arith.maximumf %50, %51 : vector<32x128xf32>
    %c0_53 = arith.constant 0 : index
    %c0_54 = arith.constant 0 : index
    %c0_55 = arith.constant 0 : index
    %53 = vector.load %arg8[%c0_53, %c0_54, %c0_55] : memref<3x16x32xf32, #tpu.memory_space<vmem>>, vector<1x16x32xf32>
    %54 = vector.shape_cast %53 : vector<1x16x32xf32> to vector<16x32xf32>
    %cst_56 = arith.constant dense<0.000000e+00> : vector<16x128xf32>
    %55 = tpu.matmul %54, %52, %cst_56 {dimension_numbers = #tpu.dot_dimension_numbers<[1], [0], [0], [1], [0, 0, 1, 1], [], []>} : vector<16x32xf32>, vector<32x128xf32>, vector<16x128xf32> -> vector<16x128xf32>
    %c1_57 = arith.constant 1 : index
    %c0_58 = arith.constant 0 : index
    %c0_59 = arith.constant 0 : index
    %56 = vector.load %arg8[%c1_57, %c0_58, %c0_59] : memref<3x16x32xf32, #tpu.memory_space<vmem>>, vector<1x16x32xf32>
    %57 = vector.shape_cast %56 : vector<1x16x32xf32> to vector<16x32xf32>
    %cst_60 = arith.constant dense<0.000000e+00> : vector<16x128xf32>
    %58 = tpu.matmul %57, %52, %cst_60 {dimension_numbers = #tpu.dot_dimension_numbers<[1], [0], [0], [1], [0, 0, 1, 1], [], []>} : vector<16x32xf32>, vector<32x128xf32>, vector<16x128xf32> -> vector<16x128xf32>
    %c2_61 = arith.constant 2 : index
    %c0_62 = arith.constant 0 : index
    %c0_63 = arith.constant 0 : index
    %59 = vector.load %arg8[%c2_61, %c0_62, %c0_63] : memref<3x16x32xf32, #tpu.memory_space<vmem>>, vector<1x16x32xf32>
    %60 = vector.shape_cast %59 : vector<1x16x32xf32> to vector<16x32xf32>
    %cst_64 = arith.constant dense<0.000000e+00> : vector<16x128xf32>
    %61 = tpu.matmul %60, %52, %cst_64 {dimension_numbers = #tpu.dot_dimension_numbers<[1], [0], [0], [1], [0, 0, 1, 1], [], []>} : vector<16x32xf32>, vector<32x128xf32>, vector<16x128xf32> -> vector<16x128xf32>
    %62 = tpu.concatenate %55, %58, %61 in 1 : vector<16x128xf32>, vector<16x128xf32>, vector<16x128xf32> -> vector<16x384xf32>
    %c0_65 = arith.constant 0 : index
    %c0_66 = arith.constant 0 : index
    %63 = vector.load %arg9[%c0_65, %c0_66] : memref<384x64xf32, #tpu.memory_space<vmem>>, vector<384x64xf32>
    %cst_67 = arith.constant dense<0.000000e+00> : vector<16x64xf32>
    %64 = tpu.matmul %62, %63, %cst_67 {dimension_numbers = #tpu.dot_dimension_numbers<[1], [0], [0], [1], [0, 0, 1, 1], [], []>} : vector<16x384xf32>, vector<384x64xf32>, vector<16x64xf32> -> vector<16x64xf32>
    %c3 = arith.constant 3 : index
    %c0_68 = arith.constant 0 : index
    %65 = vector.load %arg10[%c3, %c0_68] : memref<4x128xf32, #tpu.memory_space<vmem>>, vector<1x64xf32>
    %66 = vector.broadcast %65 : vector<1x64xf32> to vector<16x64xf32>
    %67 = arith.addf %64, %66 : vector<16x64xf32>
    %cst_69 = arith.constant 0.000000e+00 : f32
    %68 = vector.broadcast %cst_69 : f32 to vector<16x64xf32>
    %69 = arith.maximumf %67, %68 : vector<16x64xf32>
    %70 = vector.extract_strided_slice %69 {offsets = [0, 0], sizes = [16, 32], strides = [1, 1]} : vector<16x64xf32> to vector<16x32xf32>
    %71 = vector.extract_strided_slice %69 {offsets = [0, 32], sizes = [16, 32], strides = [1, 1]} : vector<16x64xf32> to vector<16x32xf32>
    %72 = tpu.concatenate %70, %71 in 0 : vector<16x32xf32>, vector<16x32xf32> -> vector<32x32xf32>
    %c0_70 = arith.constant 0 : index
    %c0_71 = arith.constant 0 : index
    %73 = vector.load %arg11[%c0_70, %c0_71] : memref<520x128xf32, #tpu.memory_space<vmem>>, vector<32x32xf32>
    %74 = arith.addf %72, %73 : vector<32x32xf32>
    %c48 = arith.constant 48 : index
    %c0_72 = arith.constant 0 : index
    %75 = vector.load %arg11[%c48, %c0_72] : memref<520x128xf32, #tpu.memory_space<vmem>>, vector<32x96xf32>
    %c80 = arith.constant 80 : index
    %c0_73 = arith.constant 0 : index
    %76 = vector.load %arg11[%c80, %c0_73] : memref<520x128xf32, #tpu.memory_space<vmem>>, vector<1x96xf32>
    %c81 = arith.constant 81 : index
    %c0_74 = arith.constant 0 : index
    %77 = vector.load %arg11[%c81, %c0_74] : memref<520x128xf32, #tpu.memory_space<vmem>>, vector<32x32xf32>
    %c113 = arith.constant 113 : index
    %c0_75 = arith.constant 0 : index
    %78 = vector.load %arg11[%c113, %c0_75] : memref<520x128xf32, #tpu.memory_space<vmem>>, vector<1x32xf32>
    %cst_76 = arith.constant dense<0.000000e+00> : vector<32x96xf32>
    %79 = tpu.matmul %74, %75, %cst_76 {dimension_numbers = #tpu.dot_dimension_numbers<[1], [0], [0], [1], [0, 0, 1, 1], [], []>} : vector<32x32xf32>, vector<32x96xf32>, vector<32x96xf32> -> vector<32x96xf32>
    %80 = vector.broadcast %76 : vector<1x96xf32> to vector<32x96xf32>
    %81 = arith.addf %79, %80 : vector<32x96xf32>
    %82 = vector.extract_strided_slice %81 {offsets = [0, 0], sizes = [32, 32], strides = [1, 1]} : vector<32x96xf32> to vector<32x32xf32>
    %83 = vector.extract_strided_slice %81 {offsets = [0, 32], sizes = [32, 32], strides = [1, 1]} : vector<32x96xf32> to vector<32x32xf32>
    %84 = vector.extract_strided_slice %81 {offsets = [0, 64], sizes = [32, 32], strides = [1, 1]} : vector<32x96xf32> to vector<32x32xf32>
    %85 = vector.extract_strided_slice %82 {offsets = [0, 0], sizes = [32, 8], strides = [1, 1]} : vector<32x32xf32> to vector<32x8xf32>
    %86 = vector.extract_strided_slice %82 {offsets = [0, 8], sizes = [32, 8], strides = [1, 1]} : vector<32x32xf32> to vector<32x8xf32>
    %87 = vector.extract_strided_slice %82 {offsets = [0, 16], sizes = [32, 8], strides = [1, 1]} : vector<32x32xf32> to vector<32x8xf32>
    %88 = vector.extract_strided_slice %82 {offsets = [0, 24], sizes = [32, 8], strides = [1, 1]} : vector<32x32xf32> to vector<32x8xf32>
    %89 = vector.shape_cast %85 : vector<32x8xf32> to vector<1x32x8xf32>
    %90 = vector.shape_cast %86 : vector<32x8xf32> to vector<1x32x8xf32>
    %91 = vector.shape_cast %87 : vector<32x8xf32> to vector<1x32x8xf32>
    %92 = vector.shape_cast %88 : vector<32x8xf32> to vector<1x32x8xf32>
    %93 = tpu.concatenate %89, %90, %91, %92 in 0 : vector<1x32x8xf32>, vector<1x32x8xf32>, vector<1x32x8xf32>, vector<1x32x8xf32> -> vector<4x32x8xf32>
    %94 = vector.extract_strided_slice %83 {offsets = [0, 0], sizes = [32, 8], strides = [1, 1]} : vector<32x32xf32> to vector<32x8xf32>
    %95 = vector.extract_strided_slice %83 {offsets = [0, 8], sizes = [32, 8], strides = [1, 1]} : vector<32x32xf32> to vector<32x8xf32>
    %96 = vector.extract_strided_slice %83 {offsets = [0, 16], sizes = [32, 8], strides = [1, 1]} : vector<32x32xf32> to vector<32x8xf32>
    %97 = vector.extract_strided_slice %83 {offsets = [0, 24], sizes = [32, 8], strides = [1, 1]} : vector<32x32xf32> to vector<32x8xf32>
    %98 = vector.shape_cast %94 : vector<32x8xf32> to vector<1x32x8xf32>
    %99 = vector.shape_cast %95 : vector<32x8xf32> to vector<1x32x8xf32>
    %100 = vector.shape_cast %96 : vector<32x8xf32> to vector<1x32x8xf32>
    %101 = vector.shape_cast %97 : vector<32x8xf32> to vector<1x32x8xf32>
    %102 = tpu.concatenate %98, %99, %100, %101 in 0 : vector<1x32x8xf32>, vector<1x32x8xf32>, vector<1x32x8xf32>, vector<1x32x8xf32> -> vector<4x32x8xf32>
    %103 = vector.extract_strided_slice %84 {offsets = [0, 0], sizes = [32, 8], strides = [1, 1]} : vector<32x32xf32> to vector<32x8xf32>
    %104 = vector.extract_strided_slice %84 {offsets = [0, 8], sizes = [32, 8], strides = [1, 1]} : vector<32x32xf32> to vector<32x8xf32>
    %105 = vector.extract_strided_slice %84 {offsets = [0, 16], sizes = [32, 8], strides = [1, 1]} : vector<32x32xf32> to vector<32x8xf32>
    %106 = vector.extract_strided_slice %84 {offsets = [0, 24], sizes = [32, 8], strides = [1, 1]} : vector<32x32xf32> to vector<32x8xf32>
    %107 = vector.shape_cast %103 : vector<32x8xf32> to vector<1x32x8xf32>
    %108 = vector.shape_cast %104 : vector<32x8xf32> to vector<1x32x8xf32>
    %109 = vector.shape_cast %105 : vector<32x8xf32> to vector<1x32x8xf32>
    %110 = vector.shape_cast %106 : vector<32x8xf32> to vector<1x32x8xf32>
    %111 = tpu.concatenate %107, %108, %109, %110 in 0 : vector<1x32x8xf32>, vector<1x32x8xf32>, vector<1x32x8xf32>, vector<1x32x8xf32> -> vector<4x32x8xf32>
    "tpu.trace_start"() <{level = 10 : i32, message = "hqd,hkd->hqk"}> : () -> ()
    %cst_77 = arith.constant dense<0.000000e+00> : vector<4x32x32xf32>
    %112 = tpu.matmul %93, %102, %cst_77 {dimension_numbers = #tpu.dot_dimension_numbers<[2], [2], [1], [1], [0, 0, 0, 1, 1, 1], [0], [0]>} : vector<4x32x8xf32>, vector<4x32x8xf32>, vector<4x32x32xf32> -> vector<4x32x32xf32>
    "tpu.trace_stop"() : () -> ()
    %cst_78 = arith.constant 0.353553385 : f32
    %113 = vector.broadcast %cst_78 : f32 to vector<4x32x32xf32>
    %114 = arith.mulf %112, %113 : vector<4x32x32xf32>
    %cst_79 = arith.constant dense<0xFF800000> : vector<4x32xf32>
    %115 = vector.multi_reduction <maximumf>, %114, %cst_79 [2] : vector<4x32x32xf32> to vector<4x32xf32>
    %116 = vector.shape_cast %115 : vector<4x32xf32> to vector<4x32x1xf32>
    %117 = vector.broadcast %116 : vector<4x32x1xf32> to vector<4x32x32xf32>
    %118 = arith.subf %114, %117 : vector<4x32x32xf32>
    %119 = math.exp %118 : vector<4x32x32xf32>
    %cst_80 = arith.constant dense<0.000000e+00> : vector<4x32xf32>
    %120 = vector.multi_reduction <add>, %119, %cst_80 [2] : vector<4x32x32xf32> to vector<4x32xf32>
    %121 = vector.shape_cast %120 : vector<4x32xf32> to vector<4x32x1xf32>
    %122 = vector.broadcast %121 : vector<4x32x1xf32> to vector<4x32x32xf32>
    %123 = arith.divf %119, %122 : vector<4x32x32xf32>
    "tpu.trace_start"() <{level = 10 : i32, message = "hqk,hkd->hqd"}> : () -> ()
    %cst_81 = arith.constant dense<0.000000e+00> : vector<4x32x8xf32>
    %124 = tpu.matmul %123, %111, %cst_81 {dimension_numbers = #tpu.dot_dimension_numbers<[2], [1], [1], [2], [0, 0, 0, 1, 1, 2], [0], [0]>} : vector<4x32x32xf32>, vector<4x32x8xf32>, vector<4x32x8xf32> -> vector<4x32x8xf32>
    "tpu.trace_stop"() : () -> ()
    %125 = vector.extract_strided_slice %124 {offsets = [0, 0, 0], sizes = [1, 32, 8], strides = [1, 1, 1]} : vector<4x32x8xf32> to vector<1x32x8xf32>
    %126 = vector.shape_cast %125 : vector<1x32x8xf32> to vector<32x8xf32>
    %127 = vector.extract_strided_slice %124 {offsets = [1, 0, 0], sizes = [1, 32, 8], strides = [1, 1, 1]} : vector<4x32x8xf32> to vector<1x32x8xf32>
    %128 = vector.shape_cast %127 : vector<1x32x8xf32> to vector<32x8xf32>
    %129 = vector.extract_strided_slice %124 {offsets = [2, 0, 0], sizes = [1, 32, 8], strides = [1, 1, 1]} : vector<4x32x8xf32> to vector<1x32x8xf32>
    %130 = vector.shape_cast %129 : vector<1x32x8xf32> to vector<32x8xf32>
    %131 = vector.extract_strided_slice %124 {offsets = [3, 0, 0], sizes = [1, 32, 8], strides = [1, 1, 1]} : vector<4x32x8xf32> to vector<1x32x8xf32>
    %132 = vector.shape_cast %131 : vector<1x32x8xf32> to vector<32x8xf32>
    %133 = tpu.concatenate %126, %128, %130, %132 in 1 : vector<32x8xf32>, vector<32x8xf32>, vector<32x8xf32>, vector<32x8xf32> -> vector<32x32xf32>
    %cst_82 = arith.constant dense<0.000000e+00> : vector<32x32xf32>
    %134 = tpu.matmul %133, %77, %cst_82 {dimension_numbers = #tpu.dot_dimension_numbers<[1], [0], [0], [1], [0, 0, 1, 1], [], []>} : vector<32x32xf32>, vector<32x32xf32>, vector<32x32xf32> -> vector<32x32xf32>
    %135 = vector.broadcast %78 : vector<1x32xf32> to vector<32x32xf32>
    %136 = arith.addf %134, %135 : vector<32x32xf32>
    %137 = arith.addf %74, %136 : vector<32x32xf32>
    %c114 = arith.constant 114 : index
    %c0_83 = arith.constant 0 : index
    %138 = vector.load %arg11[%c114, %c0_83] : memref<520x128xf32, #tpu.memory_space<vmem>>, vector<1x32xf32>
    %c115 = arith.constant 115 : index
    %c0_84 = arith.constant 0 : index
    %139 = vector.load %arg11[%c115, %c0_84] : memref<520x128xf32, #tpu.memory_space<vmem>>, vector<1x32xf32>
    %cst_85 = arith.constant dense<0.000000e+00> : vector<32xf32>
    %140 = vector.multi_reduction <add>, %137, %cst_85 [1] : vector<32x32xf32> to vector<32xf32>
    %141 = vector.shape_cast %140 : vector<32xf32> to vector<32x1xf32>
    %cst_86 = arith.constant 3.200000e+01 : f32
    %142 = vector.broadcast %cst_86 : f32 to vector<32x1xf32>
    %143 = arith.divf %141, %142 : vector<32x1xf32>
    %144 = vector.broadcast %143 : vector<32x1xf32> to vector<32x32xf32>
    %145 = arith.subf %137, %144 : vector<32x32xf32>
    %146 = arith.mulf %145, %145 : vector<32x32xf32>
    %cst_87 = arith.constant dense<0.000000e+00> : vector<32xf32>
    %147 = vector.multi_reduction <add>, %146, %cst_87 [1] : vector<32x32xf32> to vector<32xf32>
    %148 = vector.shape_cast %147 : vector<32xf32> to vector<32x1xf32>
    %cst_88 = arith.constant 3.200000e+01 : f32
    %149 = vector.broadcast %cst_88 : f32 to vector<32x1xf32>
    %150 = arith.divf %148, %149 : vector<32x1xf32>
    %cst_89 = arith.constant 9.99999974E-6 : f32
    %151 = vector.broadcast %cst_89 : f32 to vector<32x1xf32>
    %152 = arith.addf %150, %151 : vector<32x1xf32>
    %153 = math.rsqrt %152 : vector<32x1xf32>
    %154 = vector.broadcast %153 : vector<32x1xf32> to vector<32x32xf32>
    %155 = arith.mulf %145, %154 : vector<32x32xf32>
    %156 = vector.broadcast %138 : vector<1x32xf32> to vector<32x32xf32>
    %157 = arith.mulf %155, %156 : vector<32x32xf32>
    %158 = vector.broadcast %139 : vector<1x32xf32> to vector<32x32xf32>
    %159 = arith.addf %157, %158 : vector<32x32xf32>
    %c116 = arith.constant 116 : index
    %c0_90 = arith.constant 0 : index
    %160 = vector.load %arg11[%c116, %c0_90] : memref<520x128xf32, #tpu.memory_space<vmem>>, vector<32x64xf32>
    %c148 = arith.constant 148 : index
    %c0_91 = arith.constant 0 : index
    %161 = vector.load %arg11[%c148, %c0_91] : memref<520x128xf32, #tpu.memory_space<vmem>>, vector<1x64xf32>
    %c149 = arith.constant 149 : index
    %c0_92 = arith.constant 0 : index
    %162 = vector.load %arg11[%c149, %c0_92] : memref<520x128xf32, #tpu.memory_space<vmem>>, vector<64x32xf32>
    %c213 = arith.constant 213 : index
    %c0_93 = arith.constant 0 : index
    %163 = vector.load %arg11[%c213, %c0_93] : memref<520x128xf32, #tpu.memory_space<vmem>>, vector<1x32xf32>
    %cst_94 = arith.constant dense<0.000000e+00> : vector<32x64xf32>
    %164 = tpu.matmul %159, %160, %cst_94 {dimension_numbers = #tpu.dot_dimension_numbers<[1], [0], [0], [1], [0, 0, 1, 1], [], []>} : vector<32x32xf32>, vector<32x64xf32>, vector<32x64xf32> -> vector<32x64xf32>
    %165 = vector.broadcast %161 : vector<1x64xf32> to vector<32x64xf32>
    %166 = arith.addf %164, %165 : vector<32x64xf32>
    %cst_95 = arith.constant 0.000000e+00 : f32
    %167 = vector.broadcast %cst_95 : f32 to vector<32x64xf32>
    %168 = arith.maximumf %166, %167 : vector<32x64xf32>
    %cst_96 = arith.constant dense<0.000000e+00> : vector<32x32xf32>
    %169 = tpu.matmul %168, %162, %cst_96 {dimension_numbers = #tpu.dot_dimension_numbers<[1], [0], [0], [1], [0, 0, 1, 1], [], []>} : vector<32x64xf32>, vector<64x32xf32>, vector<32x32xf32> -> vector<32x32xf32>
    %170 = vector.broadcast %163 : vector<1x32xf32> to vector<32x32xf32>
    %171 = arith.addf %169, %170 : vector<32x32xf32>
    %172 = arith.addf %159, %171 : vector<32x32xf32>
    %c214 = arith.constant 214 : index
    %c0_97 = arith.constant 0 : index
    %173 = vector.load %arg11[%c214, %c0_97] : memref<520x128xf32, #tpu.memory_space<vmem>>, vector<1x32xf32>
    %c215 = arith.constant 215 : index
    %c0_98 = arith.constant 0 : index
    %174 = vector.load %arg11[%c215, %c0_98] : memref<520x128xf32, #tpu.memory_space<vmem>>, vector<1x32xf32>
    %cst_99 = arith.constant dense<0.000000e+00> : vector<32xf32>
    %175 = vector.multi_reduction <add>, %172, %cst_99 [1] : vector<32x32xf32> to vector<32xf32>
    %176 = vector.shape_cast %175 : vector<32xf32> to vector<32x1xf32>
    %cst_100 = arith.constant 3.200000e+01 : f32
    %177 = vector.broadcast %cst_100 : f32 to vector<32x1xf32>
    %178 = arith.divf %176, %177 : vector<32x1xf32>
    %179 = vector.broadcast %178 : vector<32x1xf32> to vector<32x32xf32>
    %180 = arith.subf %172, %179 : vector<32x32xf32>
    %181 = arith.mulf %180, %180 : vector<32x32xf32>
    %cst_101 = arith.constant dense<0.000000e+00> : vector<32xf32>
    %182 = vector.multi_reduction <add>, %181, %cst_101 [1] : vector<32x32xf32> to vector<32xf32>
    %183 = vector.shape_cast %182 : vector<32xf32> to vector<32x1xf32>
    %cst_102 = arith.constant 3.200000e+01 : f32
    %184 = vector.broadcast %cst_102 : f32 to vector<32x1xf32>
    %185 = arith.divf %183, %184 : vector<32x1xf32>
    %cst_103 = arith.constant 9.99999974E-6 : f32
    %186 = vector.broadcast %cst_103 : f32 to vector<32x1xf32>
    %187 = arith.addf %185, %186 : vector<32x1xf32>
    %188 = math.rsqrt %187 : vector<32x1xf32>
    %189 = vector.broadcast %188 : vector<32x1xf32> to vector<32x32xf32>
    %190 = arith.mulf %180, %189 : vector<32x32xf32>
    %191 = vector.broadcast %173 : vector<1x32xf32> to vector<32x32xf32>
    %192 = arith.mulf %190, %191 : vector<32x32xf32>
    %193 = vector.broadcast %174 : vector<1x32xf32> to vector<32x32xf32>
    %194 = arith.addf %192, %193 : vector<32x32xf32>
    %c32 = arith.constant 32 : index
    %c0_104 = arith.constant 0 : index
    %195 = vector.load %arg11[%c32, %c0_104] : memref<520x128xf32, #tpu.memory_space<vmem>>, vector<16x32xf32>
    %c216 = arith.constant 216 : index
    %c0_105 = arith.constant 0 : index
    %196 = vector.load %arg11[%c216, %c0_105] : memref<520x128xf32, #tpu.memory_space<vmem>>, vector<32x96xf32>
    %c248 = arith.constant 248 : index
    %c0_106 = arith.constant 0 : index
    %197 = vector.load %arg11[%c248, %c0_106] : memref<520x128xf32, #tpu.memory_space<vmem>>, vector<1x96xf32>
    %c249 = arith.constant 249 : index
    %c0_107 = arith.constant 0 : index
    %198 = vector.load %arg11[%c249, %c0_107] : memref<520x128xf32, #tpu.memory_space<vmem>>, vector<32x32xf32>
    %c281 = arith.constant 281 : index
    %c0_108 = arith.constant 0 : index
    %199 = vector.load %arg11[%c281, %c0_108] : memref<520x128xf32, #tpu.memory_space<vmem>>, vector<1x32xf32>
    %cst_109 = arith.constant dense<0.000000e+00> : vector<16x96xf32>
    %200 = tpu.matmul %195, %196, %cst_109 {dimension_numbers = #tpu.dot_dimension_numbers<[1], [0], [0], [1], [0, 0, 1, 1], [], []>} : vector<16x32xf32>, vector<32x96xf32>, vector<16x96xf32> -> vector<16x96xf32>
    %201 = vector.broadcast %197 : vector<1x96xf32> to vector<16x96xf32>
    %202 = arith.addf %200, %201 : vector<16x96xf32>
    %203 = vector.extract_strided_slice %202 {offsets = [0, 0], sizes = [16, 32], strides = [1, 1]} : vector<16x96xf32> to vector<16x32xf32>
    %204 = vector.extract_strided_slice %202 {offsets = [0, 32], sizes = [16, 32], strides = [1, 1]} : vector<16x96xf32> to vector<16x32xf32>
    %205 = vector.extract_strided_slice %202 {offsets = [0, 64], sizes = [16, 32], strides = [1, 1]} : vector<16x96xf32> to vector<16x32xf32>
    %206 = vector.extract_strided_slice %203 {offsets = [0, 0], sizes = [16, 8], strides = [1, 1]} : vector<16x32xf32> to vector<16x8xf32>
    %207 = vector.extract_strided_slice %203 {offsets = [0, 8], sizes = [16, 8], strides = [1, 1]} : vector<16x32xf32> to vector<16x8xf32>
    %208 = vector.extract_strided_slice %203 {offsets = [0, 16], sizes = [16, 8], strides = [1, 1]} : vector<16x32xf32> to vector<16x8xf32>
    %209 = vector.extract_strided_slice %203 {offsets = [0, 24], sizes = [16, 8], strides = [1, 1]} : vector<16x32xf32> to vector<16x8xf32>
    %210 = vector.shape_cast %206 : vector<16x8xf32> to vector<1x16x8xf32>
    %211 = vector.shape_cast %207 : vector<16x8xf32> to vector<1x16x8xf32>
    %212 = vector.shape_cast %208 : vector<16x8xf32> to vector<1x16x8xf32>
    %213 = vector.shape_cast %209 : vector<16x8xf32> to vector<1x16x8xf32>
    %214 = tpu.concatenate %210, %211, %212, %213 in 0 : vector<1x16x8xf32>, vector<1x16x8xf32>, vector<1x16x8xf32>, vector<1x16x8xf32> -> vector<4x16x8xf32>
    %215 = vector.extract_strided_slice %204 {offsets = [0, 0], sizes = [16, 8], strides = [1, 1]} : vector<16x32xf32> to vector<16x8xf32>
    %216 = vector.extract_strided_slice %204 {offsets = [0, 8], sizes = [16, 8], strides = [1, 1]} : vector<16x32xf32> to vector<16x8xf32>
    %217 = vector.extract_strided_slice %204 {offsets = [0, 16], sizes = [16, 8], strides = [1, 1]} : vector<16x32xf32> to vector<16x8xf32>
    %218 = vector.extract_strided_slice %204 {offsets = [0, 24], sizes = [16, 8], strides = [1, 1]} : vector<16x32xf32> to vector<16x8xf32>
    %219 = vector.shape_cast %215 : vector<16x8xf32> to vector<1x16x8xf32>
    %220 = vector.shape_cast %216 : vector<16x8xf32> to vector<1x16x8xf32>
    %221 = vector.shape_cast %217 : vector<16x8xf32> to vector<1x16x8xf32>
    %222 = vector.shape_cast %218 : vector<16x8xf32> to vector<1x16x8xf32>
    %223 = tpu.concatenate %219, %220, %221, %222 in 0 : vector<1x16x8xf32>, vector<1x16x8xf32>, vector<1x16x8xf32>, vector<1x16x8xf32> -> vector<4x16x8xf32>
    %224 = vector.extract_strided_slice %205 {offsets = [0, 0], sizes = [16, 8], strides = [1, 1]} : vector<16x32xf32> to vector<16x8xf32>
    %225 = vector.extract_strided_slice %205 {offsets = [0, 8], sizes = [16, 8], strides = [1, 1]} : vector<16x32xf32> to vector<16x8xf32>
    %226 = vector.extract_strided_slice %205 {offsets = [0, 16], sizes = [16, 8], strides = [1, 1]} : vector<16x32xf32> to vector<16x8xf32>
    %227 = vector.extract_strided_slice %205 {offsets = [0, 24], sizes = [16, 8], strides = [1, 1]} : vector<16x32xf32> to vector<16x8xf32>
    %228 = vector.shape_cast %224 : vector<16x8xf32> to vector<1x16x8xf32>
    %229 = vector.shape_cast %225 : vector<16x8xf32> to vector<1x16x8xf32>
    %230 = vector.shape_cast %226 : vector<16x8xf32> to vector<1x16x8xf32>
    %231 = vector.shape_cast %227 : vector<16x8xf32> to vector<1x16x8xf32>
    %232 = tpu.concatenate %228, %229, %230, %231 in 0 : vector<1x16x8xf32>, vector<1x16x8xf32>, vector<1x16x8xf32>, vector<1x16x8xf32> -> vector<4x16x8xf32>
    "tpu.trace_start"() <{level = 10 : i32, message = "hqd,hkd->hqk"}> : () -> ()
    %cst_110 = arith.constant dense<0.000000e+00> : vector<4x16x16xf32>
    %233 = tpu.matmul %214, %223, %cst_110 {dimension_numbers = #tpu.dot_dimension_numbers<[2], [2], [1], [1], [0, 0, 0, 1, 1, 1], [0], [0]>} : vector<4x16x8xf32>, vector<4x16x8xf32>, vector<4x16x16xf32> -> vector<4x16x16xf32>
    "tpu.trace_stop"() : () -> ()
    %cst_111 = arith.constant 0.353553385 : f32
    %234 = vector.broadcast %cst_111 : f32 to vector<4x16x16xf32>
    %235 = arith.mulf %233, %234 : vector<4x16x16xf32>
    %cst_112 = arith.constant dense<0xFF800000> : vector<4x16xf32>
    %236 = vector.multi_reduction <maximumf>, %235, %cst_112 [2] : vector<4x16x16xf32> to vector<4x16xf32>
    %237 = vector.shape_cast %236 : vector<4x16xf32> to vector<4x16x1xf32>
    %238 = vector.broadcast %237 : vector<4x16x1xf32> to vector<4x16x16xf32>
    %239 = arith.subf %235, %238 : vector<4x16x16xf32>
    %240 = math.exp %239 : vector<4x16x16xf32>
    %cst_113 = arith.constant dense<0.000000e+00> : vector<4x16xf32>
    %241 = vector.multi_reduction <add>, %240, %cst_113 [2] : vector<4x16x16xf32> to vector<4x16xf32>
    %242 = vector.shape_cast %241 : vector<4x16xf32> to vector<4x16x1xf32>
    %243 = vector.broadcast %242 : vector<4x16x1xf32> to vector<4x16x16xf32>
    %244 = arith.divf %240, %243 : vector<4x16x16xf32>
    "tpu.trace_start"() <{level = 10 : i32, message = "hqk,hkd->hqd"}> : () -> ()
    %cst_114 = arith.constant dense<0.000000e+00> : vector<4x16x8xf32>
    %245 = tpu.matmul %244, %232, %cst_114 {dimension_numbers = #tpu.dot_dimension_numbers<[2], [1], [1], [2], [0, 0, 0, 1, 1, 2], [0], [0]>} : vector<4x16x16xf32>, vector<4x16x8xf32>, vector<4x16x8xf32> -> vector<4x16x8xf32>
    "tpu.trace_stop"() : () -> ()
    %246 = vector.extract_strided_slice %245 {offsets = [0, 0, 0], sizes = [1, 16, 8], strides = [1, 1, 1]} : vector<4x16x8xf32> to vector<1x16x8xf32>
    %247 = vector.shape_cast %246 : vector<1x16x8xf32> to vector<16x8xf32>
    %248 = vector.extract_strided_slice %245 {offsets = [1, 0, 0], sizes = [1, 16, 8], strides = [1, 1, 1]} : vector<4x16x8xf32> to vector<1x16x8xf32>
    %249 = vector.shape_cast %248 : vector<1x16x8xf32> to vector<16x8xf32>
    %250 = vector.extract_strided_slice %245 {offsets = [2, 0, 0], sizes = [1, 16, 8], strides = [1, 1, 1]} : vector<4x16x8xf32> to vector<1x16x8xf32>
    %251 = vector.shape_cast %250 : vector<1x16x8xf32> to vector<16x8xf32>
    %252 = vector.extract_strided_slice %245 {offsets = [3, 0, 0], sizes = [1, 16, 8], strides = [1, 1, 1]} : vector<4x16x8xf32> to vector<1x16x8xf32>
    %253 = vector.shape_cast %252 : vector<1x16x8xf32> to vector<16x8xf32>
    %254 = tpu.concatenate %247, %249, %251, %253 in 1 : vector<16x8xf32>, vector<16x8xf32>, vector<16x8xf32>, vector<16x8xf32> -> vector<16x32xf32>
    %cst_115 = arith.constant dense<0.000000e+00> : vector<16x32xf32>
    %255 = tpu.matmul %254, %198, %cst_115 {dimension_numbers = #tpu.dot_dimension_numbers<[1], [0], [0], [1], [0, 0, 1, 1], [], []>} : vector<16x32xf32>, vector<32x32xf32>, vector<16x32xf32> -> vector<16x32xf32>
    %256 = vector.broadcast %199 : vector<1x32xf32> to vector<16x32xf32>
    %257 = arith.addf %255, %256 : vector<16x32xf32>
    %258 = arith.addf %195, %257 : vector<16x32xf32>
    %c282 = arith.constant 282 : index
    %c0_116 = arith.constant 0 : index
    %259 = vector.load %arg11[%c282, %c0_116] : memref<520x128xf32, #tpu.memory_space<vmem>>, vector<1x32xf32>
    %c283 = arith.constant 283 : index
    %c0_117 = arith.constant 0 : index
    %260 = vector.load %arg11[%c283, %c0_117] : memref<520x128xf32, #tpu.memory_space<vmem>>, vector<1x32xf32>
    %cst_118 = arith.constant dense<0.000000e+00> : vector<16xf32>
    %261 = vector.multi_reduction <add>, %258, %cst_118 [1] : vector<16x32xf32> to vector<16xf32>
    %262 = vector.shape_cast %261 : vector<16xf32> to vector<16x1xf32>
    %cst_119 = arith.constant 3.200000e+01 : f32
    %263 = vector.broadcast %cst_119 : f32 to vector<16x1xf32>
    %264 = arith.divf %262, %263 : vector<16x1xf32>
    %265 = vector.broadcast %264 : vector<16x1xf32> to vector<16x32xf32>
    %266 = arith.subf %258, %265 : vector<16x32xf32>
    %267 = arith.mulf %266, %266 : vector<16x32xf32>
    %cst_120 = arith.constant dense<0.000000e+00> : vector<16xf32>
    %268 = vector.multi_reduction <add>, %267, %cst_120 [1] : vector<16x32xf32> to vector<16xf32>
    %269 = vector.shape_cast %268 : vector<16xf32> to vector<16x1xf32>
    %cst_121 = arith.constant 3.200000e+01 : f32
    %270 = vector.broadcast %cst_121 : f32 to vector<16x1xf32>
    %271 = arith.divf %269, %270 : vector<16x1xf32>
    %cst_122 = arith.constant 9.99999974E-6 : f32
    %272 = vector.broadcast %cst_122 : f32 to vector<16x1xf32>
    %273 = arith.addf %271, %272 : vector<16x1xf32>
    %274 = math.rsqrt %273 : vector<16x1xf32>
    %275 = vector.broadcast %274 : vector<16x1xf32> to vector<16x32xf32>
    %276 = arith.mulf %266, %275 : vector<16x32xf32>
    %277 = vector.broadcast %259 : vector<1x32xf32> to vector<16x32xf32>
    %278 = arith.mulf %276, %277 : vector<16x32xf32>
    %279 = vector.broadcast %260 : vector<1x32xf32> to vector<16x32xf32>
    %280 = arith.addf %278, %279 : vector<16x32xf32>
    %c284 = arith.constant 284 : index
    %c0_123 = arith.constant 0 : index
    %281 = vector.load %arg11[%c284, %c0_123] : memref<520x128xf32, #tpu.memory_space<vmem>>, vector<32x32xf32>
    %cst_124 = arith.constant dense<0.000000e+00> : vector<16x32xf32>
    %282 = tpu.matmul %280, %281, %cst_124 {dimension_numbers = #tpu.dot_dimension_numbers<[1], [0], [0], [1], [0, 0, 1, 1], [], []>} : vector<16x32xf32>, vector<32x32xf32>, vector<16x32xf32> -> vector<16x32xf32>
    %c316 = arith.constant 316 : index
    %c0_125 = arith.constant 0 : index
    %283 = vector.load %arg11[%c316, %c0_125] : memref<520x128xf32, #tpu.memory_space<vmem>>, vector<1x32xf32>
    %284 = vector.broadcast %283 : vector<1x32xf32> to vector<16x32xf32>
    %285 = arith.addf %282, %284 : vector<16x32xf32>
    %c317 = arith.constant 317 : index
    %c0_126 = arith.constant 0 : index
    %286 = vector.load %arg11[%c317, %c0_126] : memref<520x128xf32, #tpu.memory_space<vmem>>, vector<32x64xf32>
    %cst_127 = arith.constant dense<0.000000e+00> : vector<32x64xf32>
    %287 = tpu.matmul %194, %286, %cst_127 {dimension_numbers = #tpu.dot_dimension_numbers<[1], [0], [0], [1], [0, 0, 1, 1], [], []>} : vector<32x32xf32>, vector<32x64xf32>, vector<32x64xf32> -> vector<32x64xf32>
    %c349 = arith.constant 349 : index
    %c0_128 = arith.constant 0 : index
    %288 = vector.load %arg11[%c349, %c0_128] : memref<520x128xf32, #tpu.memory_space<vmem>>, vector<1x64xf32>
    %289 = vector.broadcast %288 : vector<1x64xf32> to vector<32x64xf32>
    %290 = arith.addf %287, %289 : vector<32x64xf32>
    %291 = vector.extract_strided_slice %290 {offsets = [0, 0], sizes = [32, 32], strides = [1, 1]} : vector<32x64xf32> to vector<32x32xf32>
    %292 = vector.extract_strided_slice %290 {offsets = [0, 32], sizes = [32, 32], strides = [1, 1]} : vector<32x64xf32> to vector<32x32xf32>
    %c350 = arith.constant 350 : index
    %c0_129 = arith.constant 0 : index
    %293 = vector.load %arg11[%c350, %c0_129] : memref<520x128xf32, #tpu.memory_space<vmem>>, vector<32x32xf32>
    %c382 = arith.constant 382 : index
    %c0_130 = arith.constant 0 : index
    %294 = vector.load %arg11[%c382, %c0_130] : memref<520x128xf32, #tpu.memory_space<vmem>>, vector<1x32xf32>
    %295 = vector.extract_strided_slice %285 {offsets = [0, 0], sizes = [16, 8], strides = [1, 1]} : vector<16x32xf32> to vector<16x8xf32>
    %296 = vector.extract_strided_slice %285 {offsets = [0, 8], sizes = [16, 8], strides = [1, 1]} : vector<16x32xf32> to vector<16x8xf32>
    %297 = vector.extract_strided_slice %285 {offsets = [0, 16], sizes = [16, 8], strides = [1, 1]} : vector<16x32xf32> to vector<16x8xf32>
    %298 = vector.extract_strided_slice %285 {offsets = [0, 24], sizes = [16, 8], strides = [1, 1]} : vector<16x32xf32> to vector<16x8xf32>
    %299 = vector.shape_cast %295 : vector<16x8xf32> to vector<1x16x8xf32>
    %300 = vector.shape_cast %296 : vector<16x8xf32> to vector<1x16x8xf32>
    %301 = vector.shape_cast %297 : vector<16x8xf32> to vector<1x16x8xf32>
    %302 = vector.shape_cast %298 : vector<16x8xf32> to vector<1x16x8xf32>
    %303 = tpu.concatenate %299, %300, %301, %302 in 0 : vector<1x16x8xf32>, vector<1x16x8xf32>, vector<1x16x8xf32>, vector<1x16x8xf32> -> vector<4x16x8xf32>
    %304 = vector.extract_strided_slice %291 {offsets = [0, 0], sizes = [32, 8], strides = [1, 1]} : vector<32x32xf32> to vector<32x8xf32>
    %305 = vector.extract_strided_slice %291 {offsets = [0, 8], sizes = [32, 8], strides = [1, 1]} : vector<32x32xf32> to vector<32x8xf32>
    %306 = vector.extract_strided_slice %291 {offsets = [0, 16], sizes = [32, 8], strides = [1, 1]} : vector<32x32xf32> to vector<32x8xf32>
    %307 = vector.extract_strided_slice %291 {offsets = [0, 24], sizes = [32, 8], strides = [1, 1]} : vector<32x32xf32> to vector<32x8xf32>
    %308 = vector.shape_cast %304 : vector<32x8xf32> to vector<1x32x8xf32>
    %309 = vector.shape_cast %305 : vector<32x8xf32> to vector<1x32x8xf32>
    %310 = vector.shape_cast %306 : vector<32x8xf32> to vector<1x32x8xf32>
    %311 = vector.shape_cast %307 : vector<32x8xf32> to vector<1x32x8xf32>
    %312 = tpu.concatenate %308, %309, %310, %311 in 0 : vector<1x32x8xf32>, vector<1x32x8xf32>, vector<1x32x8xf32>, vector<1x32x8xf32> -> vector<4x32x8xf32>
    %313 = vector.extract_strided_slice %292 {offsets = [0, 0], sizes = [32, 8], strides = [1, 1]} : vector<32x32xf32> to vector<32x8xf32>
    %314 = vector.extract_strided_slice %292 {offsets = [0, 8], sizes = [32, 8], strides = [1, 1]} : vector<32x32xf32> to vector<32x8xf32>
    %315 = vector.extract_strided_slice %292 {offsets = [0, 16], sizes = [32, 8], strides = [1, 1]} : vector<32x32xf32> to vector<32x8xf32>
    %316 = vector.extract_strided_slice %292 {offsets = [0, 24], sizes = [32, 8], strides = [1, 1]} : vector<32x32xf32> to vector<32x8xf32>
    %317 = vector.shape_cast %313 : vector<32x8xf32> to vector<1x32x8xf32>
    %318 = vector.shape_cast %314 : vector<32x8xf32> to vector<1x32x8xf32>
    %319 = vector.shape_cast %315 : vector<32x8xf32> to vector<1x32x8xf32>
    %320 = vector.shape_cast %316 : vector<32x8xf32> to vector<1x32x8xf32>
    %321 = tpu.concatenate %317, %318, %319, %320 in 0 : vector<1x32x8xf32>, vector<1x32x8xf32>, vector<1x32x8xf32>, vector<1x32x8xf32> -> vector<4x32x8xf32>
    "tpu.trace_start"() <{level = 10 : i32, message = "hqd,hkd->hqk"}> : () -> ()
    %cst_131 = arith.constant dense<0.000000e+00> : vector<4x16x32xf32>
    %322 = tpu.matmul %303, %312, %cst_131 {dimension_numbers = #tpu.dot_dimension_numbers<[2], [2], [1], [1], [0, 0, 0, 1, 1, 1], [0], [0]>} : vector<4x16x8xf32>, vector<4x32x8xf32>, vector<4x16x32xf32> -> vector<4x16x32xf32>
    "tpu.trace_stop"() : () -> ()
    %cst_132 = arith.constant 0.353553385 : f32
    %323 = vector.broadcast %cst_132 : f32 to vector<4x16x32xf32>
    %324 = arith.mulf %322, %323 : vector<4x16x32xf32>
    %cst_133 = arith.constant dense<0xFF800000> : vector<4x16xf32>
    %325 = vector.multi_reduction <maximumf>, %324, %cst_133 [2] : vector<4x16x32xf32> to vector<4x16xf32>
    %326 = vector.shape_cast %325 : vector<4x16xf32> to vector<4x16x1xf32>
    %327 = vector.broadcast %326 : vector<4x16x1xf32> to vector<4x16x32xf32>
    %328 = arith.subf %324, %327 : vector<4x16x32xf32>
    %329 = math.exp %328 : vector<4x16x32xf32>
    %cst_134 = arith.constant dense<0.000000e+00> : vector<4x16xf32>
    %330 = vector.multi_reduction <add>, %329, %cst_134 [2] : vector<4x16x32xf32> to vector<4x16xf32>
    %331 = vector.shape_cast %330 : vector<4x16xf32> to vector<4x16x1xf32>
    %332 = vector.broadcast %331 : vector<4x16x1xf32> to vector<4x16x32xf32>
    %333 = arith.divf %329, %332 : vector<4x16x32xf32>
    "tpu.trace_start"() <{level = 10 : i32, message = "hqk,hkd->hqd"}> : () -> ()
    %cst_135 = arith.constant dense<0.000000e+00> : vector<4x16x8xf32>
    %334 = tpu.matmul %333, %321, %cst_135 {dimension_numbers = #tpu.dot_dimension_numbers<[2], [1], [1], [2], [0, 0, 0, 1, 1, 2], [0], [0]>} : vector<4x16x32xf32>, vector<4x32x8xf32>, vector<4x16x8xf32> -> vector<4x16x8xf32>
    "tpu.trace_stop"() : () -> ()
    %335 = vector.extract_strided_slice %334 {offsets = [0, 0, 0], sizes = [1, 16, 8], strides = [1, 1, 1]} : vector<4x16x8xf32> to vector<1x16x8xf32>
    %336 = vector.shape_cast %335 : vector<1x16x8xf32> to vector<16x8xf32>
    %337 = vector.extract_strided_slice %334 {offsets = [1, 0, 0], sizes = [1, 16, 8], strides = [1, 1, 1]} : vector<4x16x8xf32> to vector<1x16x8xf32>
    %338 = vector.shape_cast %337 : vector<1x16x8xf32> to vector<16x8xf32>
    %339 = vector.extract_strided_slice %334 {offsets = [2, 0, 0], sizes = [1, 16, 8], strides = [1, 1, 1]} : vector<4x16x8xf32> to vector<1x16x8xf32>
    %340 = vector.shape_cast %339 : vector<1x16x8xf32> to vector<16x8xf32>
    %341 = vector.extract_strided_slice %334 {offsets = [3, 0, 0], sizes = [1, 16, 8], strides = [1, 1, 1]} : vector<4x16x8xf32> to vector<1x16x8xf32>
    %342 = vector.shape_cast %341 : vector<1x16x8xf32> to vector<16x8xf32>
    %343 = tpu.concatenate %336, %338, %340, %342 in 1 : vector<16x8xf32>, vector<16x8xf32>, vector<16x8xf32>, vector<16x8xf32> -> vector<16x32xf32>
    %cst_136 = arith.constant dense<0.000000e+00> : vector<16x32xf32>
    %344 = tpu.matmul %343, %293, %cst_136 {dimension_numbers = #tpu.dot_dimension_numbers<[1], [0], [0], [1], [0, 0, 1, 1], [], []>} : vector<16x32xf32>, vector<32x32xf32>, vector<16x32xf32> -> vector<16x32xf32>
    %345 = vector.broadcast %294 : vector<1x32xf32> to vector<16x32xf32>
    %346 = arith.addf %344, %345 : vector<16x32xf32>
    %347 = arith.addf %280, %346 : vector<16x32xf32>
    %c383 = arith.constant 383 : index
    %c0_137 = arith.constant 0 : index
    %348 = vector.load %arg11[%c383, %c0_137] : memref<520x128xf32, #tpu.memory_space<vmem>>, vector<1x32xf32>
    %c384 = arith.constant 384 : index
    %c0_138 = arith.constant 0 : index
    %349 = vector.load %arg11[%c384, %c0_138] : memref<520x128xf32, #tpu.memory_space<vmem>>, vector<1x32xf32>
    %cst_139 = arith.constant dense<0.000000e+00> : vector<16xf32>
    %350 = vector.multi_reduction <add>, %347, %cst_139 [1] : vector<16x32xf32> to vector<16xf32>
    %351 = vector.shape_cast %350 : vector<16xf32> to vector<16x1xf32>
    %cst_140 = arith.constant 3.200000e+01 : f32
    %352 = vector.broadcast %cst_140 : f32 to vector<16x1xf32>
    %353 = arith.divf %351, %352 : vector<16x1xf32>
    %354 = vector.broadcast %353 : vector<16x1xf32> to vector<16x32xf32>
    %355 = arith.subf %347, %354 : vector<16x32xf32>
    %356 = arith.mulf %355, %355 : vector<16x32xf32>
    %cst_141 = arith.constant dense<0.000000e+00> : vector<16xf32>
    %357 = vector.multi_reduction <add>, %356, %cst_141 [1] : vector<16x32xf32> to vector<16xf32>
    %358 = vector.shape_cast %357 : vector<16xf32> to vector<16x1xf32>
    %cst_142 = arith.constant 3.200000e+01 : f32
    %359 = vector.broadcast %cst_142 : f32 to vector<16x1xf32>
    %360 = arith.divf %358, %359 : vector<16x1xf32>
    %cst_143 = arith.constant 9.99999974E-6 : f32
    %361 = vector.broadcast %cst_143 : f32 to vector<16x1xf32>
    %362 = arith.addf %360, %361 : vector<16x1xf32>
    %363 = math.rsqrt %362 : vector<16x1xf32>
    %364 = vector.broadcast %363 : vector<16x1xf32> to vector<16x32xf32>
    %365 = arith.mulf %355, %364 : vector<16x32xf32>
    %366 = vector.broadcast %348 : vector<1x32xf32> to vector<16x32xf32>
    %367 = arith.mulf %365, %366 : vector<16x32xf32>
    %368 = vector.broadcast %349 : vector<1x32xf32> to vector<16x32xf32>
    %369 = arith.addf %367, %368 : vector<16x32xf32>
    %c385 = arith.constant 385 : index
    %c0_144 = arith.constant 0 : index
    %370 = vector.load %arg11[%c385, %c0_144] : memref<520x128xf32, #tpu.memory_space<vmem>>, vector<32x64xf32>
    %c417 = arith.constant 417 : index
    %c0_145 = arith.constant 0 : index
    %371 = vector.load %arg11[%c417, %c0_145] : memref<520x128xf32, #tpu.memory_space<vmem>>, vector<1x64xf32>
    %c418 = arith.constant 418 : index
    %c0_146 = arith.constant 0 : index
    %372 = vector.load %arg11[%c418, %c0_146] : memref<520x128xf32, #tpu.memory_space<vmem>>, vector<64x32xf32>
    %c482 = arith.constant 482 : index
    %c0_147 = arith.constant 0 : index
    %373 = vector.load %arg11[%c482, %c0_147] : memref<520x128xf32, #tpu.memory_space<vmem>>, vector<1x32xf32>
    %cst_148 = arith.constant dense<0.000000e+00> : vector<16x64xf32>
    %374 = tpu.matmul %369, %370, %cst_148 {dimension_numbers = #tpu.dot_dimension_numbers<[1], [0], [0], [1], [0, 0, 1, 1], [], []>} : vector<16x32xf32>, vector<32x64xf32>, vector<16x64xf32> -> vector<16x64xf32>
    %375 = vector.broadcast %371 : vector<1x64xf32> to vector<16x64xf32>
    %376 = arith.addf %374, %375 : vector<16x64xf32>
    %cst_149 = arith.constant 0.000000e+00 : f32
    %377 = vector.broadcast %cst_149 : f32 to vector<16x64xf32>
    %378 = arith.maximumf %376, %377 : vector<16x64xf32>
    %cst_150 = arith.constant dense<0.000000e+00> : vector<16x32xf32>
    %379 = tpu.matmul %378, %372, %cst_150 {dimension_numbers = #tpu.dot_dimension_numbers<[1], [0], [0], [1], [0, 0, 1, 1], [], []>} : vector<16x64xf32>, vector<64x32xf32>, vector<16x32xf32> -> vector<16x32xf32>
    %380 = vector.broadcast %373 : vector<1x32xf32> to vector<16x32xf32>
    %381 = arith.addf %379, %380 : vector<16x32xf32>
    %382 = arith.addf %369, %381 : vector<16x32xf32>
    %c483 = arith.constant 483 : index
    %c0_151 = arith.constant 0 : index
    %383 = vector.load %arg11[%c483, %c0_151] : memref<520x128xf32, #tpu.memory_space<vmem>>, vector<1x32xf32>
    %c484 = arith.constant 484 : index
    %c0_152 = arith.constant 0 : index
    %384 = vector.load %arg11[%c484, %c0_152] : memref<520x128xf32, #tpu.memory_space<vmem>>, vector<1x32xf32>
    %cst_153 = arith.constant dense<0.000000e+00> : vector<16xf32>
    %385 = vector.multi_reduction <add>, %382, %cst_153 [1] : vector<16x32xf32> to vector<16xf32>
    %386 = vector.shape_cast %385 : vector<16xf32> to vector<16x1xf32>
    %cst_154 = arith.constant 3.200000e+01 : f32
    %387 = vector.broadcast %cst_154 : f32 to vector<16x1xf32>
    %388 = arith.divf %386, %387 : vector<16x1xf32>
    %389 = vector.broadcast %388 : vector<16x1xf32> to vector<16x32xf32>
    %390 = arith.subf %382, %389 : vector<16x32xf32>
    %391 = arith.mulf %390, %390 : vector<16x32xf32>
    %cst_155 = arith.constant dense<0.000000e+00> : vector<16xf32>
    %392 = vector.multi_reduction <add>, %391, %cst_155 [1] : vector<16x32xf32> to vector<16xf32>
    %393 = vector.shape_cast %392 : vector<16xf32> to vector<16x1xf32>
    %cst_156 = arith.constant 3.200000e+01 : f32
    %394 = vector.broadcast %cst_156 : f32 to vector<16x1xf32>
    %395 = arith.divf %393, %394 : vector<16x1xf32>
    %cst_157 = arith.constant 9.99999974E-6 : f32
    %396 = vector.broadcast %cst_157 : f32 to vector<16x1xf32>
    %397 = arith.addf %395, %396 : vector<16x1xf32>
    %398 = math.rsqrt %397 : vector<16x1xf32>
    %399 = vector.broadcast %398 : vector<16x1xf32> to vector<16x32xf32>
    %400 = arith.mulf %390, %399 : vector<16x32xf32>
    %401 = vector.broadcast %383 : vector<1x32xf32> to vector<16x32xf32>
    %402 = arith.mulf %400, %401 : vector<16x32xf32>
    %403 = vector.broadcast %384 : vector<1x32xf32> to vector<16x32xf32>
    %404 = arith.addf %402, %403 : vector<16x32xf32>
    %c485 = arith.constant 485 : index
    %c0_158 = arith.constant 0 : index
    %405 = vector.load %arg11[%c485, %c0_158] : memref<520x128xf32, #tpu.memory_space<vmem>>, vector<32x128xf32>
    %cst_159 = arith.constant dense<0.000000e+00> : vector<16x128xf32>
    %406 = tpu.matmul %404, %405, %cst_159 {dimension_numbers = #tpu.dot_dimension_numbers<[1], [0], [0], [1], [0, 0, 1, 1], [], []>} : vector<16x32xf32>, vector<32x128xf32>, vector<16x128xf32> -> vector<16x128xf32>
    %c517 = arith.constant 517 : index
    %c0_160 = arith.constant 0 : index
    %407 = vector.load %arg11[%c517, %c0_160] : memref<520x128xf32, #tpu.memory_space<vmem>>, vector<1x128xf32>
    %408 = vector.broadcast %407 : vector<1x128xf32> to vector<16x128xf32>
    %409 = arith.addf %406, %408 : vector<16x128xf32>
    %c0_161 = arith.constant 0 : index
    %c0_162 = arith.constant 0 : index
    %c0_163 = arith.constant 0 : index
    %410 = vector.load %arg12[%c0_161, %c0_162, %c0_163] : memref<1x16x128xf32, #tpu.memory_space<vmem>>, vector<1x16x128xf32>
    %411 = vector.shape_cast %410 : vector<1x16x128xf32> to vector<16x128xf32>
    %412 = vector.shape_cast %409 : vector<16x128xf32> to vector<1x16x128xf32>
    tpu.vector_store %arg12[%c0_161, %c0_162, %c0_163], %412 {strides = array<i32>} : memref<1x16x128xf32, #tpu.memory_space<vmem>>, vector<1x16x128xf32>,
    return
  }
  func.func @transform_0(%arg0: i32) -> (i32, i32, i32) {
    %c0_i32 = arith.constant 0 : i32
    %c0_i32_0 = arith.constant 0 : i32
    %c0_i32_1 = arith.constant 0 : i32
    return %arg0, %c0_i32, %c0_i32_0 : i32, i32, i32
  }
  func.func @transform_1(%arg0: i32) -> (i32, i32, i32) {
    %c0_i32 = arith.constant 0 : i32
    %c0_i32_0 = arith.constant 0 : i32
    %c0_i32_1 = arith.constant 0 : i32
    %c0_i32_2 = arith.constant 0 : i32
    return %c0_i32, %c0_i32_0, %c0_i32_1 : i32, i32, i32
  }
  func.func @transform_2(%arg0: i32) -> (i32, i32) {
    %c0_i32 = arith.constant 0 : i32
    %c0_i32_0 = arith.constant 0 : i32
    %c0_i32_1 = arith.constant 0 : i32
    return %c0_i32, %c0_i32_0 : i32, i32
  }
  func.func @transform_3(%arg0: i32) -> (i32, i32, i32) {
    %c0_i32 = arith.constant 0 : i32
    %c0_i32_0 = arith.constant 0 : i32
    %c0_i32_1 = arith.constant 0 : i32
    %c0_i32_2 = arith.constant 0 : i32
    return %c0_i32, %c0_i32_0, %c0_i32_1 : i32, i32, i32
  }
  func.func @transform_4(%arg0: i32) -> (i32, i32) {
    %c0_i32 = arith.constant 0 : i32
    %c0_i32_0 = arith.constant 0 : i32
    %c0_i32_1 = arith.constant 0 : i32
    return %c0_i32, %c0_i32_0 : i32, i32
  }
  func.func @transform_5(%arg0: i32) -> (i32, i32, i32) {
    %c0_i32 = arith.constant 0 : i32
    %c0_i32_0 = arith.constant 0 : i32
    %c0_i32_1 = arith.constant 0 : i32
    %c0_i32_2 = arith.constant 0 : i32
    return %c0_i32, %c0_i32_0, %c0_i32_1 : i32, i32, i32
  }
  func.func @transform_6(%arg0: i32) -> (i32, i32) {
    %c0_i32 = arith.constant 0 : i32
    %c0_i32_0 = arith.constant 0 : i32
    %c0_i32_1 = arith.constant 0 : i32
    return %c0_i32, %c0_i32_0 : i32, i32
  }
  func.func @transform_7(%arg0: i32) -> (i32, i32, i32) {
    %c0_i32 = arith.constant 0 : i32
    %c0_i32_0 = arith.constant 0 : i32
    %c0_i32_1 = arith.constant 0 : i32
    %c0_i32_2 = arith.constant 0 : i32
    return %c0_i32, %c0_i32_0, %c0_i32_1 : i32, i32, i32
  }
  func.func @transform_8(%arg0: i32) -> (i32, i32) {
    %c0_i32 = arith.constant 0 : i32
    %c0_i32_0 = arith.constant 0 : i32
    %c0_i32_1 = arith.constant 0 : i32
    return %c0_i32, %c0_i32_0 : i32, i32
  }
  func.func @transform_9(%arg0: i32) -> (i32, i32) {
    %c0_i32 = arith.constant 0 : i32
    %c0_i32_0 = arith.constant 0 : i32
    %c0_i32_1 = arith.constant 0 : i32
    return %c0_i32, %c0_i32_0 : i32, i32
  }
  func.func @transform_10(%arg0: i32) -> (i32, i32) {
    %c0_i32 = arith.constant 0 : i32
    %c0_i32_0 = arith.constant 0 : i32
    %c0_i32_1 = arith.constant 0 : i32
    return %c0_i32, %c0_i32_0 : i32, i32
  }
  func.func @transform_11(%arg0: i32) -> (i32, i32, i32) {
    %c0_i32 = arith.constant 0 : i32
    %c0_i32_0 = arith.constant 0 : i32
    %c0_i32_1 = arith.constant 0 : i32
    return %arg0, %c0_i32, %c0_i32_0 : i32, i32, i32
  }
}

</mosaic_0001>

<bundles_post_ra>
// kernel: forward.1
= control target key start
LH: loop header
LB: loop body
LE: loop exit
PB: predicated region body
PF: predicated region fallthrough
CT: control target
= control target key end

     0   :  { %s13420_s0 = inlined_call_operand.vmem [shape: f32[2,256,96], index: 0, kind: input, shape index: {}]   ;;  %s13421_s1 = inlined_call_operand.vmem [shape: f32[3,128,256], index: 1, kind: input, shape index: {}]   ;;  %s13422_s2 = inlined_call_operand.hbm [shape: f32[288,128], index: 2, kind: input, shape index: {}]   ;;  %s13423_s3 = inlined_call_operand.vmem [shape: f32[3,64,128], index: 3, kind: input, shape index: {}]   ;;  %s13424_s4 = inlined_call_operand.hbm [shape: f32[384,128], index: 4, kind: input, shape index: {}]   ;;  %s13425_s5 = inlined_call_operand.hbm [shape: f32[3,32,64], index: 5, kind: input, shape index: {}]   ;;  %s13426_s6 = inlined_call_operand.hbm [shape: f32[384,128], index: 6, kind: input, shape index: {}]   ;;  %s13427_s7 = inlined_call_operand.hbm [shape: f32[3,16,32], index: 7, kind: input, shape index: {}]   ;;  %s13428_s8 = inlined_call_operand.vmem [shape: f32[384,64], index: 8, kind: input, shape index: {}]   ;;  %s13429_s9 = inlined_call_operand.vmem [shape: f32[4,128], index: 9, kind: input, shape index: {}]   ;;  %s13430_s10 = inlined_call_operand.vmem [shape: f32[520,128], index: 10, kind: input, shape index: {}]   ;;  %s13431_s11 = inlined_call_operand.hbm [shape: f32[2,16,128], index: 11, kind: output, shape index: {}]  }
   0x1   :  { %13442 = sst [smem:[#allocation22_spill]] %s13424_s4 }
   0x2   :  { %13443 = sst [smem:[#allocation23_spill]] %s13431_s11 }
   0x3   :  { %16 = vsyncpa [#allocation3], 0 }
   0x4   :  { %17 = vsyncpa [#allocation6], 0 }
   0x5   :  { %18 = vsyncpa [#allocation9], 0 }
   0x6   :  { %19 = vsyncpa [#allocation4], 0 }
   0x7   :  { %21 = vsyncpa [#allocation4 + $0x1], 0  ;;  %s11188_s17 = smov 0   ;;  %s11190_s18 = smov 0  }
   0x8   :  { %s11192_s19 = smov 0   ;;  %s11194_s20 = smov 0  }
   0x9 LB: > { %13444 = sst [smem:[#allocation16_spill]] %s11097_s17  ;;  %s11209_s21 = sadd.s32 4294967295, %s11109_s20   ;;  %s11109_s20 = sphi %s11194_s20, %s13471_s20   ;;  %s11105_s19 = sphi %s11192_s19, %s13473_s19   ;;  %s11101_s18 = sphi %s11190_s18, %s13475_s18   ;;  %s11097_s17 = sphi %s11188_s17, %s13474_s17  }
   0xa   : > { %13445 = sst [smem:[#allocation17_spill]] %s11105_s19  ;;  %s7639_s22 = sadd.s32 4294967294, %s11109_s20  }
   0xb   : > { %13446 = sst [smem:[#allocation18_spill]] %s11109_s20  ;;  %s11213_s23 = sadd.s32 1, %s11109_s20  }
   0xc   : > { %13447 = sst [smem:[#allocation19_spill]] %s11213_s23  ;;  %s270_s24 = sadd.s32 1, %s11105_s19 }
   0xd   : > { %s267_s25 = ssub.s32 %s11109_s20, %s11213_s23  ;;  %p280_p0 = scmp.ne.s32.totalorder %s11105_s19, %s11101_s18 }
   0xe   : > { %p268_p1 = scmp.eq.s32.totalorder %s267_s25, 0  ;;  %p281_p2 = scmp.eq.s32.totalorder %s11209_s21, 1 }
   0xf   : > { %p286_p3 = scmp.ne.s32.totalorder %s11101_s18, %s11097_s17  ;;  %p287_p4 = scmp.eq.s32.totalorder %s7639_s22, 1 }
  0x10   : > { %s11224_s26 = scalar_select %p268_p1, %s11105_s19, %s270_s24  }
  0x11   : > { %p11226_p5 = por %p281_p2, %p280_p0  ;;  %p11230_p6 = por %p287_p4, %p286_p3 }
  0x12   : > { %13448 = sst [smem:[#allocation20_spill]] %s11224_s26  ;;  %p7640_p7 = scmp.ge.s32.totalorder %s11109_s20, 1 }
  0x13   : > { %s13449_s27 = scalar_select %p11226_p5, 1, 0 }
  0x14   : > { %s13450_s28 = scalar_select %p11230_p6, 1, 0 }
  0x15   : > { %p294_p8 = scmp.lt.s32.totalorder %s11109_s20, 3  ;;  %p13435_p9 = scmp.eq.s32.totalorder %s11209_s21, 0 }
  0x16   : > { %13451 = sst [smem:[#allocation21_spill]] %s13450_s28  ;;  %s11111_s30 = smov [#allocation5]  }
  0x17   : > { %p11237_p10 = pnand %p7640_p7, %p294_p8  ;;  %s325_s12 = sshll.u32 %s11111_s30, 4  ;;  %s11243_s12 = int_to_ptr.vmem [resolvable:$true] %s325_s12 }
  0x18   : > { %s11112_s14 = smov [#allocation8]   ;;  %s11113_s16 = smov [#allocation2]  }
  0x19   : > { %s13452_s29 = scalar_select %p11237_p10, 1, 0 }
  0x1a   : > { %p10470_p11 = pneg %p11237_p10  ;;  %s351_s15 = sshll.u32 %s11112_s14, 4  ;;  %s11251_s15 = int_to_ptr.vmem [resolvable:$true] %s351_s15 }
  0x1b   : > { %s11253_s22 = sshll.u32 %s11113_s16, 4  ;;  %s13454_s4 = sld [smem:[#allocation22_spill]]  ;;  %s310_s22 = int_to_ptr.vmem [resolvable:$true] %s11253_s22 }
  0x1c   : > { %p11247_p12 = pnand %p13435_p9, %p10470_p11 }
  0x1e   : > { %p11263_p0 = pneg %p11247_p12 }
  0x21   : > { %s10895_s26 = scalar_lea.hbm %s13454_s4, 6144 }
  0x22   : > { %p10896_p13 = scmp.ne.s32.totalorder %s13454_s4, %s10895_s26  ;;  %p10902_p3 = scmp.lt.u32.totalorder %s10895_s26, %s13454_s4 }
  0x24   : > { %p10898_p1 = pnand %p11263_p0, %p10896_p13 }
  0x26   : > { %p10899_p2 = pneg %p10898_p1 }
  0x28   : > { %p10904_p4 = pnand %p10902_p3, %p10899_p2 }
  0x2a   : > { %10907 = shalt.err (!%p10904_p4)
}
  0x2b   : > { %s10908_s19 = scalar_lea.vmem %s11243_s12, 6144  ;;  %p10916_p9 = scmp.lt.s32.totalorder %s11243_s12, %s11243_s12 }
  0x2c   : > { %p10909_p7 = scmp.ne.s32.totalorder %s11243_s12, %s10908_s19  ;;  %p10917_p6 = scmp.lt.s32.totalorder %s10908_s19, %s10908_s19 }
  0x2e   : > { %p10911_p8 = pnand %p10909_p7, %p11263_p0  ;;  %p10918_p13 = por %p10917_p6, %p10916_p9 }
  0x30   : > { %p10912_p11 = pneg %p10911_p8 }
  0x32   : > { %p10919_p1 = pnand %p10918_p13, %p10912_p11 }
  0x34   : > { %10922 = shalt.err (!%p10919_p1)
}
  0x35   : > { %s11114_s24 = smov 128   ;;  %s11115_s26 = smov 8  }
  0x36   : > { %10476 = dma.hbm_to_vmem [thread:$0]  (!%p11247_p12), %s13454_s4, 6144, %s11243_s12, [#allocation6], %s11114_s24, %s11114_s24, %s11115_s26  }
  0x37   : > { %s10923_s19 = scalar_lea.hbm %s13426_s6, 6144 }
  0x38   : > { %p10924_p6 = scmp.ne.s32.totalorder %s13426_s6, %s10923_s19  ;;  %p10930_p3 = scmp.lt.u32.totalorder %s10923_s19, %s13426_s6 }
  0x3a   : > { %p10926_p9 = pnand %p10924_p6, %p11263_p0 }
  0x3c   : > { %p10927_p2 = pneg %p10926_p9 }
  0x3e   : > { %p10932_p4 = pnand %p10930_p3, %p10927_p2 }
  0x40   : > { %10935 = shalt.err (!%p10932_p4)
}
  0x41   : > { %s10936_s12 = scalar_lea.vmem %s11251_s15, 6144  ;;  %p10944_p13 = scmp.lt.s32.totalorder %s11251_s15, %s11251_s15 }
  0x42   : > { %p10937_p7 = scmp.ne.s32.totalorder %s11251_s15, %s10936_s12  ;;  %p10945_p1 = scmp.lt.s32.totalorder %s10936_s12, %s10936_s12 }
  0x44   : > { %p10939_p8 = pnand %p10937_p7, %p11263_p0  ;;  %p10946_p6 = por %p10945_p1, %p10944_p13 }
  0x46   : > { %p10940_p11 = pneg %p10939_p8 }
  0x48   : > { %p10947_p9 = pnand %p10946_p6, %p10940_p11 }
  0x4a   : > { %10950 = shalt.err (!%p10947_p9)
}
  0x4b   : > { %10482 = dma.hbm_to_vmem [thread:$0]  (!%p11247_p12), %s13426_s6, 6144, %s11251_s15, [#allocation9], %s11114_s24, %s11114_s24, %s11115_s26  }
  0x4c   : > { %s10951_s25 = scalar_lea.hbm %s13422_s2, 4608 }
  0x4d   : > { %p10952_p2 = scmp.ne.s32.totalorder %s13422_s2, %s10951_s25  ;;  %p10958_p7 = scmp.lt.u32.totalorder %s10951_s25, %s13422_s2 }
  0x4f   : > { %p10954_p3 = pnand %p10952_p2, %p11263_p0 }
  0x51   : > { %p10955_p4 = pneg %p10954_p3 }
  0x53   : > { %p10960_p8 = pnand %p10958_p7, %p10955_p4 }
  0x55   : > { %10963 = shalt.err (!%p10960_p8)
}
  0x56   : > { %s10964_s12 = scalar_lea.vmem %s310_s22, 4608  ;;  %p10972_p6 = scmp.lt.s32.totalorder %s310_s22, %s310_s22 }
  0x57   : > { %p10965_p11 = scmp.ne.s32.totalorder %s310_s22, %s10964_s12  ;;  %p10973_p9 = scmp.lt.s32.totalorder %s10964_s12, %s10964_s12 }
  0x59   : > { %p10967_p13 = pnand %p10965_p11, %p11263_p0  ;;  %p10974_p5 = por %p10973_p9, %p10972_p6 }
  0x5b   : > { %p10968_p1 = pneg %p10967_p13 }
  0x5d   : > { %p10975_p10 = pnand %p10974_p5, %p10968_p1 }
  0x5f   : > { %10978 = shalt.err (!%p10975_p10)
}
  0x60   : > { %10473 = dma.hbm_to_vmem [thread:$0]  (!%p11247_p12), %s13422_s2, 4608, %s310_s22, [#allocation3], %s11114_s24, %s11114_s24, %s11115_s26  }
  0x61   : > { %s11116_s17 = smov [#allocation7]   ;;  %s11117_s28 = smov [#allocation10]  }
  0x62   : > { %s338_s20 = sshll.u32 %s11116_s17, 4  ;;  %s364_s25 = sshll.u32 %s11117_s28, 4  ;;  %s339_s20 = int_to_ptr.vmem [resolvable:$true] %s338_s20  ;;  %s365_s25 = int_to_ptr.vmem [resolvable:$true] %s364_s25 }
  0x63   : > { %s10979_s16 = scalar_lea.hbm %s13425_s5, 1536 }
  0x64   : > { %p10980_p5 = scmp.ne.s32.totalorder %s13425_s5, %s10979_s16  ;;  %p10986_p3 = scmp.lt.u32.totalorder %s10979_s16, %s13425_s5 }
  0x66   : > { %p10982_p10 = pnand %p10980_p5, %p11263_p0 }
  0x68   : > { %p10983_p2 = pneg %p10982_p10 }
  0x6a   : > { %p10988_p4 = pnand %p10986_p3, %p10983_p2 }
  0x6c   : > { %10991 = shalt.err (!%p10988_p4)
}
  0x6d   : > { %s10992_s22 = scalar_lea.vmem %s339_s20, 1536  ;;  %p11000_p13 = scmp.lt.s32.totalorder %s339_s20, %s339_s20 }
  0x6e   : > { %p10993_p7 = scmp.ne.s32.totalorder %s339_s20, %s10992_s22  ;;  %p11001_p1 = scmp.lt.s32.totalorder %s10992_s22, %s10992_s22 }
  0x70   : > { %p10995_p8 = pnand %p10993_p7, %p11263_p0  ;;  %p11002_p6 = por %p11001_p1, %p11000_p13 }
  0x72   : > { %p10996_p11 = pneg %p10995_p8 }
  0x74   : > { %p11003_p9 = pnand %p11002_p6, %p10996_p11 }
  0x76   : > { %11006 = shalt.err (!%p11003_p9)
}
  0x77   : > { %10479 = dma.hbm_to_vmem [thread:$0]  (!%p11247_p12), %s13425_s5, 1536, %s339_s20, [#allocation6], %s11114_s24, %s11114_s24, %s11115_s26  }
  0x78   : > { %s11007_s30 = scalar_lea.hbm %s13427_s7, 768 }
  0x79   : > { %p11008_p5 = scmp.ne.s32.totalorder %s13427_s7, %s11007_s30  ;;  %p11014_p3 = scmp.lt.u32.totalorder %s11007_s30, %s13427_s7 }
  0x7b   : > { %p11010_p10 = pnand %p11008_p5, %p11263_p0 }
  0x7d   : > { %p11011_p2 = pneg %p11010_p10 }
  0x7f   : > { %p11016_p4 = pnand %p11014_p3, %p11011_p2 }
  0x81   : > { %11019 = shalt.err (!%p11016_p4)
}
  0x82   : > { %s11020_s15 = scalar_lea.vmem %s365_s25, 768  ;;  %p11028_p13 = scmp.lt.s32.totalorder %s365_s25, %s365_s25 }
  0x83   : > { %p11021_p7 = scmp.ne.s32.totalorder %s365_s25, %s11020_s15  ;;  %p11029_p1 = scmp.lt.s32.totalorder %s11020_s15, %s11020_s15 }
  0x85   : > { %p11023_p8 = pnand %p11021_p7, %p11263_p0  ;;  %p11030_p6 = por %p11029_p1, %p11028_p13 }
  0x87   : > { %p11024_p11 = pneg %p11023_p8 }
  0x89   : > { %p11031_p9 = pnand %p11030_p6, %p11024_p11 }
  0x8b   : > { %11034 = shalt.err (!%p11031_p9)
}
  0x8c   : > { %10485 = dma.hbm_to_vmem [thread:$0]  (!%p11247_p12), %s13427_s7, 768, %s365_s25, [#allocation9], %s11114_s24, %s11114_s24, %s11115_s26  }
  0x8d   : > { %p13456_p5 = scmp.ne.s32.totalorder %s13452_s29, 0 }
  0x8e   : > { %p13457_p0 = scmp.eq.s32.totalorder (!%p13456_p5), %s11209_s21, 0 }
  0x8f   : > { %397 = sbr.rel (%p13456_p5) target bundleno = 8915 (0x22d3), region = 64 }
  0x96   : > { %11080 = dma.done.wait (%p13457_p0), [#allocation3], 4608   ;;  %p13458_p10 = pmov %p13457_p0 }
  0x97   : > { %p13459_p2 = pmov %p13457_p0 }
  0x98   : > { %11082 = vsyncadd (%p13458_p10), [#allocation3], 4294962688 }
  0x99   : > { %11084 = dma.done.wait (%p13459_p2), [#allocation6], 7680   ;;  %p13460_p3 = pmov %p13457_p0 }
  0x9a   : > { %p13461_p4 = pmov %p13457_p0 }
  0x9b   : > { %11086 = vsyncadd (%p13460_p3), [#allocation6], 4294959616 }
  0x9c   : > { %11088 = dma.done.wait (%p13461_p4), [#allocation9], 6912   ;;  %p13462_p12 = pmov %p13457_p0 }
  0x9d   : > { %p453_p7 = scmp.lt.s32.totalorder %s11209_s21, 1  ;;  %v491_v25 = vld [vmem:[%s13421_s1 + $0x8] sm:$0xff]  ;;  %v490_v50 = vld [vmem:[%s13421_s1] sm:$0xff]  ;;  %v493_v52 = vld [vmem:[%s13421_s1 + $0x18] sm:$0xff]  ;;  %s11118_s22 = smov 96   ;;  %vm1226_vm0 = vcmask 261120  }
  0x9e   : > { %11090 = vsyncadd (%p13462_p12), [#allocation9], 4294960384  ;;  %586 = vmatprep.mubr.f32.mxu0 %v491_v25  ;;  %v7657_v26 = vld [vmem:[%s13421_s1 + $0x108] sm:$0xff]  ;;  %v7656_v51 = vld [vmem:[%s13421_s1 + $0x100] sm:$0xff]  ;;  %vm1168_vm1 = vcmask 523264   ;;  %vm1151_vm2 = vcmask 785408  }
  0x9f   : > { %s454_s23 = scalar_select %p453_p7, %s11209_s21, 1  ;;  %764 = vmatprep.mubr.f32.mxu1 %v7657_v26  ;;  %v7659_v53 = vld [vmem:[%s13421_s1 + $0x118] sm:$0xff]  ;;  %v492_v54 = vld [vmem:[%s13421_s1 + $0x10] sm:$0xff]  ;;  %v495_v56 = vld [vmem:[%s13421_s1 + $0x28] sm:$0xff]  ;;  %vm3328_vm3 = vcmask 64512   ;;  %vm4437_vm5 = vcmask 130048  }
  0xa0   : > { %v7658_v55 = vld [vmem:[%s13421_s1 + $0x110] sm:$0xff]  ;;  %v7661_v57 = vld [vmem:[%s13421_s1 + $0x128] sm:$0xff]  ;;  %v494_v58 = vld [vmem:[%s13421_s1 + $0x20] sm:$0xff]  ;;  %s11120_s14 = smov 120   ;;  %s11121_s16 = smov 112   ;;  %vm4442_vm6 = vcmask 195584  }
  0xa1   : > { %s7939_s29 = sshll.u32 %s454_s23, 8  ;;  %v7660_v59 = vld [vmem:[%s13421_s1 + $0x120] sm:$0xff]  ;;  %v497_v60 = vld [vmem:[%s13421_s1 + $0x38] sm:$0xff]  ;;  %v496_v62 = vld [vmem:[%s13421_s1 + $0x30] sm:$0xff]  ;;  %s11119_s23 = smov 64  }
  0xa2   : > { %s11396_s26 = scalar_lea.vmem %s13420_s0, %s7939_s29  ;;  %v7663_v61 = vld [vmem:[%s13421_s1 + $0x138] sm:$0xff]  ;;  %v7662_v63 = vld [vmem:[%s13421_s1 + $0x130] sm:$0xff]  ;;  %v7677_v25 = vld [vmem:[%s13421_s1 + $0x1a8] sm:$0xff]  ;;  %s11122_s19 = smov 104  }
  0xa3   : > { %v474_v0 = vld [vmem:[%s11396_s26 + $0x80] sm:$0xff]  ;;  %v475_v1 = vld [vmem:[%s11396_s26 + $0x88] sm:$0xff]  ;;  %v476_v5 = vld [vmem:[%s11396_s26 + $0x90] sm:$0xff]  ;;  %s11123_s12 = smov 8   ;;  %s11124_s11 = smov 16  }
  0xa4   : > { %v458_v2 = vld [vmem:[%s11396_s26] sm:$0xff]  ;;  %v11401_v3 = vpack.c.bf16 %v475_v1, %v474_v0  ;;  %v459_v4 = vld [vmem:[%s11396_s26 + $0x8] sm:$0xff]  ;;  %v477_v6 = vld [vmem:[%s11396_s26 + $0x98] sm:$0xff]  ;;  %s11125_s17 = smov 24   ;;  %p13466_p11 = scmp.ne.s32.totalorder %s13449_s27, 0 }
  0xa5   : > { %v11406_v7 = vpack.c.bf16 %v459_v4, %v458_v2  ;;  %v11408_v8 = vpack.c.bf16 %v477_v6, %v476_v5  ;;  %v460_v9 = vld [vmem:[%s11396_s26 + $0x10] sm:$0xff]  ;;  %v461_v10 = vld [vmem:[%s11396_s26 + $0x18] sm:$0xff]  ;;  %v478_v11 = vld [vmem:[%s11396_s26 + $0xa0] sm:$0xff] }
  0xa6   : > { %9641 = vmatprep.subr.bf16.mxu0 %v11401_v3  ;;  %9673 = vmatprep.subr.bf16.mxu1 %v11401_v3  ;;  %v479_v12 = vld [vmem:[%s11396_s26 + $0xa8] sm:$0xff]  ;;  %v11418_v13 = vpack.c.bf16 %v461_v10, %v460_v9  ;;  %v462_v15 = vld [vmem:[%s11396_s26 + $0x20] sm:$0xff]  ;;  %v480_v17 = vld [vmem:[%s11396_s26 + $0xb0] sm:$0xff] }
  0xa7   : > { %9643 = vmatpush3.bf16.msra.mxu0 %v11406_v7  ;;  %9675 = vmatpush3.bf16.msra.mxu1 %v11406_v7  ;;  %v11422_v14 = vpack.c.bf16 %v479_v12, %v478_v11  ;;  %v463_v16 = vld [vmem:[%s11396_s26 + $0x28] sm:$0xff]  ;;  %v481_v18 = vld [vmem:[%s11396_s26 + $0xb8] sm:$0xff]  ;;  %v464_v21 = vld [vmem:[%s11396_s26 + $0x30] sm:$0xff] }
  0xa8   : > { %9645 = vmatprep.subr.bf16.mxu0 %v11408_v8  ;;  %9677 = vmatprep.subr.bf16.mxu1 %v11408_v8  ;;  %v11430_v19 = vpack.c.bf16 %v463_v16, %v462_v15  ;;  %v11434_v20 = vpack.c.bf16 %v481_v18, %v480_v17  ;;  %v465_v22 = vld [vmem:[%s11396_s26 + $0x38] sm:$0xff]  ;;  %v482_v23 = vld [vmem:[%s11396_s26 + $0xc0] sm:$0xff]  ;;  %v483_v24 = vld [vmem:[%s11396_s26 + $0xc8] sm:$0xff] }
  0xa9   : > { %v11448_v27 = vpack.c.bf16 %v465_v22, %v464_v21  ;;  %v11452_v28 = vpack.c.bf16 %v483_v24, %v482_v23  ;;  %v466_v29 = vld [vmem:[%s11396_s26 + $0x40] sm:$0xff]  ;;  %v467_v30 = vld [vmem:[%s11396_s26 + $0x48] sm:$0xff]  ;;  %v484_v31 = vld [vmem:[%s11396_s26 + $0xd0] sm:$0xff] }
  0xaa   : > { %v485_v32 = vld [vmem:[%s11396_s26 + $0xd8] sm:$0xff]  ;;  %v11460_v33 = vpack.c.bf16 %v467_v30, %v466_v29  ;;  %v468_v35 = vld [vmem:[%s11396_s26 + $0x50] sm:$0xff]  ;;  %v486_v37 = vld [vmem:[%s11396_s26 + $0xe0] sm:$0xff] }
  0xab   : > { %9647 = vmatpush3.bf16.msra.mxu0 %v11418_v13  ;;  %9679 = vmatpush3.bf16.msra.mxu1 %v11418_v13  ;;  %v11464_v34 = vpack.c.bf16 %v485_v32, %v484_v31  ;;  %v469_v36 = vld [vmem:[%s11396_s26 + $0x58] sm:$0xff]  ;;  %v487_v38 = vld [vmem:[%s11396_s26 + $0xe8] sm:$0xff]  ;;  %v470_v41 = vld [vmem:[%s11396_s26 + $0x60] sm:$0xff] }
  0xac   : > { %9649 = vmatprep.subr.bf16.mxu0 %v11422_v14  ;;  %9681 = vmatprep.subr.bf16.mxu1 %v11422_v14  ;;  %v11472_v39 = vpack.c.bf16 %v469_v36, %v468_v35  ;;  %v11476_v40 = vpack.c.bf16 %v487_v38, %v486_v37  ;;  %v471_v42 = vld [vmem:[%s11396_s26 + $0x68] sm:$0xff]  ;;  %v488_v43 = vld [vmem:[%s11396_s26 + $0xf0] sm:$0xff]  ;;  %v489_v44 = vld [vmem:[%s11396_s26 + $0xf8] sm:$0xff] }
  0xad   : > { %v11484_v45 = vpack.c.bf16 %v471_v42, %v470_v41  ;;  %v11488_v46 = vpack.c.bf16 %v489_v44, %v488_v43  ;;  %v472_v47 = vld [vmem:[%s11396_s26 + $0x70] sm:$0xff]  ;;  %v473_v48 = vld [vmem:[%s11396_s26 + $0x78] sm:$0xff]  ;;  %v499_v0 = vld [vmem:[%s13421_s1 + $0x48] sm:$0xff]  ;;  %s13465_s26 = sld [smem:[#allocation23_spill]] }
  0xae   : > { %v11494_v49 = vpack.c.bf16 %v473_v48, %v472_v47  ;;  %v7665_v1 = vld [vmem:[%s13421_s1 + $0x148] sm:$0xff]  ;;  %v498_v2 = vld [vmem:[%s13421_s1 + $0x40] sm:$0xff]  ;;  %v501_v4 = vld [vmem:[%s13421_s1 + $0x58] sm:$0xff] }
  0xaf   : > { %9651 = vmatpush3.bf16.msra.mxu0 %v11430_v19  ;;  %9683 = vmatpush3.bf16.msra.mxu1 %v11430_v19  ;;  %v7667_v5 = vld [vmem:[%s13421_s1 + $0x158] sm:$0xff]  ;;  %v500_v6 = vld [vmem:[%s13421_s1 + $0x50] sm:$0xff]  ;;  %v7669_v9 = vld [vmem:[%s13421_s1 + $0x168] sm:$0xff] }
  0xb0   : > { %9653 = vmatprep.subr.bf16.mxu0 %v11434_v20  ;;  %9685 = vmatprep.subr.bf16.mxu1 %v11434_v20  ;;  %v502_v10 = vld [vmem:[%s13421_s1 + $0x60] sm:$0xff]  ;;  %v505_v12 = vld [vmem:[%s13421_s1 + $0x78] sm:$0xff]  ;;  %v7670_v15 = vld [vmem:[%s13421_s1 + $0x170] sm:$0xff] }
  0xb1   : > { %v7668_v11 = vld [vmem:[%s13421_s1 + $0x160] sm:$0xff]  ;;  %v507_v16 = vld [vmem:[%s13421_s1 + $0x88] sm:$0xff]  ;;  %v7675_v21 = vld [vmem:[%s13421_s1 + $0x198] sm:$0xff] }
  0xb2   : > { %v7673_v17 = vld [vmem:[%s13421_s1 + $0x188] sm:$0xff]  ;;  %v506_v18 = vld [vmem:[%s13421_s1 + $0x80] sm:$0xff]  ;;  %v508_v22 = vld [vmem:[%s13421_s1 + $0x90] sm:$0xff] }
  0xb3   : > { %9655 = vmatpush3.bf16.msra.mxu0 %v11448_v27  ;;  %9687 = vmatpush3.bf16.msra.mxu1 %v11448_v27  ;;  %v7674_v23 = vld [vmem:[%s13421_s1 + $0x190] sm:$0xff]  ;;  %v511_v24 = vld [vmem:[%s13421_s1 + $0xa8] sm:$0xff]  ;;  %v510_v26 = vld [vmem:[%s13421_s1 + $0xa0] sm:$0xff] }
  0xb4   : > { %9657 = vmatprep.subr.bf16.mxu0 %v11452_v28  ;;  %9689 = vmatprep.subr.bf16.mxu1 %v11452_v28  ;;  %v7679_v29 = vld [vmem:[%s13421_s1 + $0x1b8] sm:$0xff]  ;;  %v512_v30 = vld [vmem:[%s13421_s1 + $0xb0] sm:$0xff]  ;;  %v515_v32 = vld [vmem:[%s13421_s1 + $0xc8] sm:$0xff] }
  0xb5   : > { %v7678_v31 = vld [vmem:[%s13421_s1 + $0x1b0] sm:$0xff]  ;;  %v7680_v35 = vld [vmem:[%s13421_s1 + $0x1c0] sm:$0xff]  ;;  %v517_v36 = vld [vmem:[%s13421_s1 + $0xd8] sm:$0xff] }
  0xb6   : > { %v7683_v37 = vld [vmem:[%s13421_s1 + $0x1d8] sm:$0xff]  ;;  %v516_v38 = vld [vmem:[%s13421_s1 + $0xd0] sm:$0xff]  ;;  %v7685_v41 = vld [vmem:[%s13421_s1 + $0x1e8] sm:$0xff] }
  0xb7   : > { %9659 = vmatpush3.bf16.msra.mxu0 %v11460_v33  ;;  %9691 = vmatpush3.bf16.msra.mxu1 %v11460_v33  ;;  %v518_v42 = vld [vmem:[%s13421_s1 + $0xe0] sm:$0xff]  ;;  %v521_v44 = vld [vmem:[%s13421_s1 + $0xf8] sm:$0xff]  ;;  %v7686_v47 = vld [vmem:[%s13421_s1 + $0x1f0] sm:$0xff] }
  0xb8   : > { %9661 = vmatprep.subr.bf16.mxu0 %v11464_v34  ;;  %9693 = vmatprep.subr.bf16.mxu1 %v11464_v34  ;;  %v7684_v43 = vld [vmem:[%s13421_s1 + $0x1e0] sm:$0xff]  ;;  %v7689_v48 = vld [vmem:[%s13421_s1 + $0x208] sm:$0xff]  ;;  %vm12434_vm4 = vmpackc.low %vm3328_vm3, %vm3328_vm3 }
  0xbb   : > { %9663 = vmatpush3.bf16.msra.mxu0 %v11472_v39  ;;  %9695 = vmatpush3.bf16.msra.mxu1 %v11472_v39 }
  0xbc   : > { %9665 = vmatprep.subr.bf16.mxu0 %v11476_v40  ;;  %9697 = vmatprep.subr.bf16.mxu1 %v11476_v40 }
  0xbf   : > { %9667 = vmatpush3.bf16.msra.mxu0 %v11484_v45  ;;  %9699 = vmatpush3.bf16.msra.mxu1 %v11484_v45 }
  0xc0   : > { %9669 = vmatprep.subr.bf16.mxu0 %v11488_v46  ;;  %9701 = vmatprep.subr.bf16.mxu1 %v11488_v46 }
  0xc3   : > { %9671 = vmatpush3.bf16.msra.mxu0 %v11494_v49  ;;  %9703 = vmatpush3.bf16.msra.mxu1 %v11494_v49 }
  0xc4   : > { %9705 = vmatprep.subr.bf16.mxu0 %v11401_v3  ;;  %v7664_v3 = vld [vmem:[%s13421_s1 + $0x140] sm:$0xff] }
  0xc6   : > { %587 = vmatmul.mubr.f32.vlgmr.msra.gmra.mrb[0].mxu0 %v490_v50  ;;  %765 = vmatmul.mubr.f32.vlgmr.msra.gmra.mrb[0].mxu1 %v7656_v51  ;;  %v7691_v50 = vld [vmem:[%s13421_s1 + $0x218] sm:$0xff]  ;;  %v7690_v51 = vld [vmem:[%s13421_s1 + $0x210] sm:$0xff] }
  0xc7   : > { %591 = vmatprep.mubr.f32.mxu0 %v493_v52  ;;  %769 = vmatprep.mubr.f32.mxu1 %v7659_v53  ;;  %v7693_v52 = vld [vmem:[%s13421_s1 + $0x228] sm:$0xff]  ;;  %v7692_v53 = vld [vmem:[%s13421_s1 + $0x220] sm:$0xff] }
  0xc8   : > { %9707 = vmatpush3.bf16.msra.mxu0 %v11406_v7  ;;  %v7666_v7 = vld [vmem:[%s13421_s1 + $0x150] sm:$0xff] }
  0xc9   : > { %9709 = vmatprep.subr.bf16.mxu0 %v11408_v8  ;;  %v503_v8 = vld [vmem:[%s13421_s1 + $0x68] sm:$0xff] }
  0xca   : > { %592 = vmatmul.mubr.f32.gmra.mrb[2].mxu0 %v492_v54  ;;  %770 = vmatmul.mubr.f32.gmra.mrb[2].mxu1 %v7658_v55  ;;  %v7695_v54 = vld [vmem:[%s13421_s1 + $0x238] sm:$0xff]  ;;  %v7694_v55 = vld [vmem:[%s13421_s1 + $0x230] sm:$0xff] }
  0xcb   : > { %596 = vmatprep.mubr.f32.mxu0 %v495_v56  ;;  %774 = vmatprep.mubr.f32.mxu1 %v7661_v57  ;;  %v7697_v56 = vld [vmem:[%s13421_s1 + $0x248] sm:$0xff]  ;;  %v7696_v57 = vld [vmem:[%s13421_s1 + $0x240] sm:$0xff] }
  0xcc   : > { %9711 = vmatpush3.bf16.msra.mxu0 %v11418_v13  ;;  %v7671_v13 = vld [vmem:[%s13421_s1 + $0x178] sm:$0xff] }
  0xcd   : > { %9713 = vmatprep.subr.bf16.mxu0 %v11422_v14  ;;  %v504_v14 = vld [vmem:[%s13421_s1 + $0x70] sm:$0xff] }
  0xce   : > { %597 = vmatmul.mubr.f32.gmra.mrb[4].mxu0 %v494_v58  ;;  %775 = vmatmul.mubr.f32.gmra.mrb[4].mxu1 %v7660_v59  ;;  %v7699_v58 = vld [vmem:[%s13421_s1 + $0x258] sm:$0xff]  ;;  %v7698_v59 = vld [vmem:[%s13421_s1 + $0x250] sm:$0xff] }
  0xcf   : > { %601 = vmatprep.mubr.f32.mxu0 %v497_v60  ;;  %779 = vmatprep.mubr.f32.mxu1 %v7663_v61  ;;  %v7701_v60 = vld [vmem:[%s13421_s1 + $0x268] sm:$0xff]  ;;  %v7700_v61 = vld [vmem:[%s13421_s1 + $0x260] sm:$0xff] }
  0xd0   : > { %9715 = vmatpush3.bf16.msra.mxu0 %v11430_v19  ;;  %v7672_v19 = vld [vmem:[%s13421_s1 + $0x180] sm:$0xff] }
  0xd1   : > { %9717 = vmatprep.subr.bf16.mxu0 %v11434_v20  ;;  %v509_v20 = vld [vmem:[%s13421_s1 + $0x98] sm:$0xff] }
  0xd2   : > { %602 = vmatmul.mubr.f32.gmra.mrb[6].mxu0 %v496_v62  ;;  %780 = vmatmul.mubr.f32.gmra.mrb[6].mxu1 %v7662_v63  ;;  %v7703_v62 = vld [vmem:[%s13421_s1 + $0x278] sm:$0xff]  ;;  %v7702_v63 = vld [vmem:[%s13421_s1 + $0x270] sm:$0xff] }
  0xd3   : > { %606 = vmatprep.mubr.f32.mxu0 %v499_v0  ;;  %784 = vmatprep.mubr.f32.mxu1 %v7665_v1  ;;  %v7705_v0 = vld [vmem:[%s13421_s1 + $0x288] sm:$0xff]  ;;  %v7704_v1 = vld [vmem:[%s13421_s1 + $0x280] sm:$0xff] }
  0xd4   : > { %9719 = vmatpush3.bf16.msra.mxu0 %v11448_v27  ;;  %v7676_v27 = vld [vmem:[%s13421_s1 + $0x1a0] sm:$0xff] }
  0xd5   : > { %9721 = vmatprep.subr.bf16.mxu0 %v11452_v28  ;;  %v513_v28 = vld [vmem:[%s13421_s1 + $0xb8] sm:$0xff] }
  0xd6   : > { %607 = vmatmul.mubr.f32.gmra.mrb[8].mxu0 %v498_v2  ;;  %785 = vmatmul.mubr.f32.gmra.mrb[8].mxu1 %v7664_v3  ;;  %v7707_v2 = vld [vmem:[%s13421_s1 + $0x298] sm:$0xff]  ;;  %v7706_v3 = vld [vmem:[%s13421_s1 + $0x290] sm:$0xff] }
  0xd7   : > { %611 = vmatprep.mubr.f32.mxu0 %v501_v4  ;;  %789 = vmatprep.mubr.f32.mxu1 %v7667_v5  ;;  %v7709_v4 = vld [vmem:[%s13421_s1 + $0x2a8] sm:$0xff]  ;;  %v7708_v5 = vld [vmem:[%s13421_s1 + $0x2a0] sm:$0xff] }
  0xd8   : > { %9723 = vmatpush3.bf16.msra.mxu0 %v11460_v33  ;;  %v7681_v33 = vld [vmem:[%s13421_s1 + $0x1c8] sm:$0xff] }
  0xd9   : > { %9725 = vmatprep.subr.bf16.mxu0 %v11464_v34  ;;  %v514_v34 = vld [vmem:[%s13421_s1 + $0xc0] sm:$0xff] }
  0xda   : > { %612 = vmatmul.mubr.f32.gmra.mrb[10].mxu0 %v500_v6  ;;  %790 = vmatmul.mubr.f32.gmra.mrb[10].mxu1 %v7666_v7  ;;  %v7711_v6 = vld [vmem:[%s13421_s1 + $0x2b8] sm:$0xff]  ;;  %v7710_v7 = vld [vmem:[%s13421_s1 + $0x2b0] sm:$0xff] }
  0xdb   : > { %616 = vmatprep.mubr.f32.mxu0 %v503_v8  ;;  %794 = vmatprep.mubr.f32.mxu1 %v7669_v9  ;;  %v7713_v8 = vld [vmem:[%s13421_s1 + $0x2c8] sm:$0xff]  ;;  %v7712_v9 = vld [vmem:[%s13421_s1 + $0x2c0] sm:$0xff] }
  0xdc   : > { %9727 = vmatpush3.bf16.msra.mxu0 %v11472_v39  ;;  %v7682_v39 = vld [vmem:[%s13421_s1 + $0x1d0] sm:$0xff] }
  0xdd   : > { %9729 = vmatprep.subr.bf16.mxu0 %v11476_v40  ;;  %v519_v40 = vld [vmem:[%s13421_s1 + $0xe8] sm:$0xff] }
  0xde   : > { %617 = vmatmul.mubr.f32.gmra.mrb[12].mxu0 %v502_v10  ;;  %795 = vmatmul.mubr.f32.gmra.mrb[12].mxu1 %v7668_v11  ;;  %v7715_v10 = vld [vmem:[%s13421_s1 + $0x2d8] sm:$0xff]  ;;  %v7714_v11 = vld [vmem:[%s13421_s1 + $0x2d0] sm:$0xff] }
  0xdf   : > { %621 = vmatprep.mubr.f32.mxu0 %v505_v12  ;;  %799 = vmatprep.mubr.f32.mxu1 %v7671_v13  ;;  %v7717_v12 = vld [vmem:[%s13421_s1 + $0x2e8] sm:$0xff]  ;;  %v7716_v13 = vld [vmem:[%s13421_s1 + $0x2e0] sm:$0xff] }
  0xe0   : > { %9731 = vmatpush3.bf16.msra.mxu0 %v11484_v45  ;;  %v7687_v45 = vld [vmem:[%s13421_s1 + $0x1f8] sm:$0xff] }
  0xe1   : > { %9733 = vmatprep.subr.bf16.mxu0 %v11488_v46  ;;  %v520_v46 = vld [vmem:[%s13421_s1 + $0xf0] sm:$0xff] }
  0xe2   : > { %622 = vmatmul.mubr.f32.gmra.mrb[14].mxu0 %v504_v14  ;;  %800 = vmatmul.mubr.f32.gmra.mrb[14].mxu1 %v7670_v15  ;;  %v7719_v14 = vld [vmem:[%s13421_s1 + $0x2f8] sm:$0xff]  ;;  %v7718_v15 = vld [vmem:[%s13421_s1 + $0x2f0] sm:$0xff] }
  0xe3   : > { %626 = vmatprep.mubr.f32.mxu0 %v507_v16  ;;  %804 = vmatprep.mubr.f32.mxu1 %v7673_v17 }
  0xe4   : > { %9735 = vmatpush3.bf16.msra.mxu0 %v11494_v49  ;;  %v7688_v49 = vld [vmem:[%s13421_s1 + $0x200] sm:$0xff] }
  0xe6   : > { %627 = vmatmul.mubr.f32.gmra.mrb[16].mxu0 %v506_v18  ;;  %805 = vmatmul.mubr.f32.gmra.mrb[16].mxu1 %v7672_v19  ;;  %v1201_v18 = vld [vmem:[#allocation2 + $0x80] sm:$0xff]  ;;  %v1202_v19 = vld [vmem:[#allocation2 + $0x88] sm:$0xff] }
  0xe7   : > { %631 = vmatprep.mubr.f32.mxu0 %v509_v20  ;;  %809 = vmatprep.mubr.f32.mxu1 %v7675_v21  ;;  %v1185_v20 = vld [vmem:[#allocation2] sm:$0xff] }
  0xea   : > { %632 = vmatmul.mubr.f32.gmra.mrb[18].mxu0 %v508_v22  ;;  %810 = vmatmul.mubr.f32.gmra.mrb[18].mxu1 %v7674_v23  ;;  %v9736_v23 = vpack.c.bf16 %v1202_v19, %v1201_v18 }
  0xeb   : > { %636 = vmatprep.mubr.f32.mxu0 %v511_v24  ;;  %814 = vmatprep.mubr.f32.mxu1 %v7677_v25  ;;  %v1186_v24 = vld [vmem:[#allocation2 + $0x8] sm:$0xff]  ;;  %v1203_v25 = vld [vmem:[#allocation2 + $0x90] sm:$0xff] }
  0xec   : > { %9737 = vmatprep.subr.bf16.mxu1 %v9736_v23 }
  0xee   : > { %637 = vmatmul.mubr.f32.gmra.mrb[20].mxu0 %v510_v26  ;;  %815 = vmatmul.mubr.f32.gmra.mrb[20].mxu1 %v7676_v27  ;;  %v1204_v26 = vld [vmem:[#allocation2 + $0x98] sm:$0xff] }
  0xef   : > { %641 = vmatprep.mubr.f32.mxu0 %v513_v28  ;;  %819 = vmatprep.mubr.f32.mxu1 %v7679_v29  ;;  %v9738_v29 = vpack.c.bf16 %v1186_v24, %v1185_v20  ;;  %v1213_v20 = vld [vmem:[#allocation2 + $0xe0] sm:$0xff] }
  0xf1   : > { %9739 = vmatpush3.bf16.msra.mxu1 %v9738_v29  ;;  %v1197_v29 = vld [vmem:[#allocation2 + $0x60] sm:$0xff] }
  0xf2   : > { %642 = vmatmul.mubr.f32.gmra.mrb[22].mxu0 %v512_v30  ;;  %820 = vmatmul.mubr.f32.gmra.mrb[22].mxu1 %v7678_v31  ;;  %v9740_v30 = vpack.c.bf16 %v1204_v26, %v1203_v25  ;;  %v1187_v31 = vld [vmem:[#allocation2 + $0x10] sm:$0xff] }
  0xf3   : > { %646 = vmatprep.mubr.f32.mxu0 %v515_v32  ;;  %824 = vmatprep.mubr.f32.mxu1 %v7681_v33  ;;  %v1188_v32 = vld [vmem:[#allocation2 + $0x18] sm:$0xff]  ;;  %v1205_v33 = vld [vmem:[#allocation2 + $0xa0] sm:$0xff] }
  0xf4   : > { %9741 = vmatprep.subr.bf16.mxu1 %v9740_v30  ;;  %v1198_v30 = vld [vmem:[#allocation2 + $0x68] sm:$0xff] }
  0xf6   : > { %647 = vmatmul.mubr.f32.gmra.mrb[24].mxu0 %v514_v34  ;;  %825 = vmatmul.mubr.f32.gmra.mrb[24].mxu1 %v7680_v35  ;;  %v1206_v34 = vld [vmem:[#allocation2 + $0xa8] sm:$0xff] }
  0xf7   : > { %651 = vmatprep.mubr.f32.mxu0 %v517_v36  ;;  %829 = vmatprep.mubr.f32.mxu1 %v7683_v37  ;;  %v9742_v37 = vpack.c.bf16 %v1188_v32, %v1187_v31 }
  0xf9   : > { %9743 = vmatpush3.bf16.msra.mxu1 %v9742_v37  ;;  %v9762_v37 = vpack.c.bf16 %v1198_v30, %v1197_v29  ;;  %v1220_v29 = vld [vmem:[#allocation2 + $0x118] sm:$0xff] }
  0xfa   : > { %652 = vmatmul.mubr.f32.gmra.mrb[26].mxu0 %v516_v38  ;;  %830 = vmatmul.mubr.f32.gmra.mrb[26].mxu1 %v7682_v39 }
  0xfb   : > { %656 = vmatprep.mubr.f32.mxu0 %v519_v40  ;;  %834 = vmatprep.mubr.f32.mxu1 %v7685_v41  ;;  %v9744_v40 = vpack.c.bf16 %v1206_v34, %v1205_v33  ;;  %v1189_v41 = vld [vmem:[#allocation2 + $0x20] sm:$0xff]  ;;  %v1215_v33 = vld [vmem:[#allocation2 + $0xf0] sm:$0xff]  ;;  %v1216_v34 = vld [vmem:[#allocation2 + $0xf8] sm:$0xff] }
  0xfd   : > { %9745 = vmatprep.subr.bf16.mxu1 %v9744_v40  ;;  %v9764_v40 = vpack.c.bf16 %v1216_v34, %v1215_v33 }
  0xfe   : > { %657 = vmatmul.mubr.f32.gmra.mrb[28].mxu0 %v518_v42  ;;  %835 = vmatmul.mubr.f32.gmra.mrb[28].mxu1 %v7684_v43  ;;  %v1190_v42 = vld [vmem:[#allocation2 + $0x28] sm:$0xff] }
  0xff   : > { %661 = vmatprep.mubr.f32.mxu0 %v521_v44  ;;  %839 = vmatprep.mubr.f32.mxu1 %v7687_v45  ;;  %v1207_v45 = vld [vmem:[#allocation2 + $0xb0] sm:$0xff] }
 0x102   : > { %662 = vmatmul.mubr.f32.gmra.mrb[30].mxu0 %v520_v46  ;;  %840 = vmatmul.mubr.f32.gmra.mrb[30].mxu1 %v7686_v47  ;;  %v1208_v46 = vld [vmem:[#allocation2 + $0xb8] sm:$0xff]  ;;  %v1217_v47 = vld [vmem:[#allocation2 + $0x100] sm:$0xff] }
 0x103   : > { %942 = vmatprep.mubr.f32.mxu0 %v7689_v48  ;;  %v1218_v48 = vld [vmem:[#allocation2 + $0x108] sm:$0xff] }
 0x106   : > { %943 = vmatmul.mubr.f32.vlgmr.msra.gmra.mrb[32].mxu0 %v7688_v49 }
 0x107   : > { %947 = vmatprep.mubr.f32.mxu0 %v7691_v50 }
 0x10a   : > { %948 = vmatmul.mubr.f32.gmra.mrb[34].mxu0 %v7690_v51  ;;  %v9746_v51 = vpack.c.bf16 %v1190_v42, %v1189_v41  ;;  %v1199_v41 = vld [vmem:[#allocation2 + $0x70] sm:$0xff]  ;;  %v1200_v42 = vld [vmem:[#allocation2 + $0x78] sm:$0xff] }
 0x10b   : > { %952 = vmatprep.mubr.f32.mxu0 %v7693_v52  ;;  %v9768_v52 = vpack.c.bf16 %v1218_v48, %v1217_v47  ;;  %v9766_v48 = vpack.c.bf16 %v1200_v42, %v1199_v41 }
 0x10c   : > { %9747 = vmatpush3.bf16.msra.mxu1 %v9746_v51 }
 0x10d   : > { %9769 = vmatprep.subr.bf16.mxu0 %v9768_v52 }
 0x10e   : > { %953 = vmatmul.mubr.f32.gmra.mrb[36].mxu0 %v7692_v53 }
 0x10f   : > { %957 = vmatprep.mubr.f32.mxu0 %v7695_v54  ;;  %9771 = vmatpush3.bf16.msra.mxu0 %v9768_v52 }
 0x112   : > { %958 = vmatmul.mubr.f32.gmra.mrb[38].mxu0 %v7694_v55  ;;  %v9748_v55 = vpack.c.bf16 %v1208_v46, %v1207_v45 }
 0x113   : > { %962 = vmatprep.mubr.f32.mxu0 %v7697_v56  ;;  %v1191_v56 = vld [vmem:[#allocation2 + $0x30] sm:$0xff] }
 0x114   : > { %9749 = vmatprep.subr.bf16.mxu1 %v9748_v55 }
 0x116   : > { %963 = vmatmul.mubr.f32.gmra.mrb[40].mxu0 %v7696_v57  ;;  %v1192_v57 = vld [vmem:[#allocation2 + $0x38] sm:$0xff] }
 0x117   : > { %967 = vmatprep.mubr.f32.mxu0 %v7699_v58 }
 0x11a   : > { %968 = vmatmul.mubr.f32.gmra.mrb[42].mxu0 %v7698_v59 }
 0x11b   : > { %972 = vmatprep.mubr.f32.mxu0 %v7701_v60  ;;  %v1209_v60 = vld [vmem:[#allocation2 + $0xc0] sm:$0xff] }
 0x11e   : > { %973 = vmatmul.mubr.f32.gmra.mrb[44].mxu0 %v7700_v61  ;;  %v1210_v61 = vld [vmem:[#allocation2 + $0xc8] sm:$0xff] }
 0x11f   : > { %977 = vmatprep.mubr.f32.mxu0 %v7703_v62 }
 0x122   : > { %978 = vmatmul.mubr.f32.gmra.mrb[46].mxu0 %v7702_v63 }
 0x123   : > { %982 = vmatprep.mubr.f32.mxu0 %v7705_v0  ;;  %v9750_v0 = vpack.c.bf16 %v1192_v57, %v1191_v56 }
 0x125   : > { %9751 = vmatpush3.bf16.msra.mxu1 %v9750_v0 }
 0x126   : > { %983 = vmatmul.mubr.f32.gmra.mrb[48].mxu0 %v7704_v1 }
 0x127   : > { %987 = vmatprep.mubr.f32.mxu0 %v7707_v2 }
 0x12a   : > { %988 = vmatmul.mubr.f32.gmra.mrb[50].mxu0 %v7706_v3  ;;  %v9752_v3 = vpack.c.bf16 %v1210_v61, %v1209_v60 }
 0x12b   : > { %992 = vmatprep.mubr.f32.mxu0 %v7709_v4  ;;  %v1193_v4 = vld [vmem:[#allocation2 + $0x40] sm:$0xff] }
 0x12c   : > { %9753 = vmatprep.subr.bf16.mxu1 %v9752_v3 }
 0x12e   : > { %993 = vmatmul.mubr.f32.gmra.mrb[52].mxu0 %v7708_v5  ;;  %v1194_v5 = vld [vmem:[#allocation2 + $0x48] sm:$0xff] }
 0x12f   : > { %997 = vmatprep.mubr.f32.mxu0 %v7711_v6 }
 0x132   : > { %998 = vmatmul.mubr.f32.gmra.mrb[54].mxu0 %v7710_v7 }
 0x133   : > { %1002 = vmatprep.mubr.f32.mxu0 %v7713_v8  ;;  %v1211_v8 = vld [vmem:[#allocation2 + $0xd0] sm:$0xff] }
 0x136   : > { %1003 = vmatmul.mubr.f32.gmra.mrb[56].mxu0 %v7712_v9  ;;  %v1212_v9 = vld [vmem:[#allocation2 + $0xd8] sm:$0xff] }
 0x137   : > { %1007 = vmatprep.mubr.f32.mxu0 %v7715_v10 }
 0x13a   : > { %1008 = vmatmul.mubr.f32.gmra.mrb[58].mxu0 %v7714_v11 }
 0x13b   : > { %1012 = vmatprep.mubr.f32.mxu0 %v7717_v12  ;;  %v9754_v12 = vpack.c.bf16 %v1194_v5, %v1193_v4 }
 0x13d   : > { %9755 = vmatpush3.bf16.msra.mxu1 %v9754_v12 }
 0x13e   : > { %1013 = vmatmul.mubr.f32.gmra.mrb[60].mxu0 %v7716_v13 }
 0x13f   : > { %1017 = vmatprep.mubr.f32.mxu0 %v7719_v14 }
 0x142   : > { %1018 = vmatmul.mubr.f32.gmra.mrb[62].mxu0 %v7718_v15  ;;  %v9756_v15 = vpack.c.bf16 %v1212_v9, %v1211_v8 }
 0x144   : > { %9757 = vmatprep.subr.bf16.mxu1 %v9756_v15 }
 0x199   : > { %v7973_v16 = vpop.f32.mrb[0].mxu0  ;;  %v8053_v17 = vpop.f32.mrb[0].mxu1 }
 0x19a   : > { %v7974_v21 = vpop.f32.mrb[1].mxu0  ;;  %v8054_v22 = vpop.f32.mrb[1].mxu1 }
 0x19b   : > { %v11798_v27 = vadd.f32 %v7974_v21, %v7973_v16  ;;  %v8055_v28 = vadd.f32 %v8054_v22, %v8053_v17  ;;  %v1195_v16 = vld [vmem:[#allocation2 + $0x50] sm:$0xff]  ;;  %v1196_v17 = vld [vmem:[#allocation2 + $0x58] sm:$0xff]  ;;  %v1214_v21 = vld [vmem:[#allocation2 + $0xe8] sm:$0xff] }
 0x19c   : > { %v9758_v24 = vpack.c.bf16 %v1196_v17, %v1195_v16 }
 0x19d   : > { %v8056_v35 = vpop.f32.mrb[2].mxu1  ;;  %1039 = vrot.lane.b32.xlu0 %v8055_v28, %s11118_s22  ;;  %v7976_v36 = vpop.f32.mrb[2].mxu0  ;;  %v9760_v28 = vpack.c.bf16 %v1214_v21, %v1213_v20 }
 0x19e   : > { %v7977_v38 = vpop.f32.mrb[3].mxu0  ;;  %v8057_v39 = vpop.f32.mrb[3].mxu1  ;;  %9759 = vmatpush3.bf16.msra.mxu1 %v9758_v24 }
 0x19f   : > { %v11801_v43 = vadd.f32 %v7977_v38, %v7976_v36  ;;  %v8058_v44 = vadd.f32 %v8057_v39, %v8056_v35  ;;  %9761 = vmatprep.subr.bf16.mxu1 %v9760_v28  ;;  %v1219_v28 = vld [vmem:[#allocation2 + $0x110] sm:$0xff] }
 0x1a0   : > { %v9772_v34 = vpack.c.bf16 %v1220_v29, %v1219_v28 }
 0x1a1   : > { %1041 = vrot.lane.b32.xlu1 %v8058_v44, %s11118_s22  ;;  %v7979_v49 = vpop.f32.mrb[4].mxu0  ;;  %v8059_v50 = vpop.f32.mrb[4].mxu1 }
 0x1a2   : > { %v7980_v53 = vpop.f32.mrb[5].mxu0  ;;  %v8060_v54 = vpop.f32.mrb[5].mxu1  ;;  %9763 = vmatpush3.bf16.msra.mxu1 %v9762_v37  ;;  %9773 = vmatprep.subr.bf16.mxu0 %v9772_v34 }
 0x1a3   : > { %v11804_v58 = vadd.f32 %v7980_v53, %v7979_v49  ;;  %v11806_v59 = vadd.f32 %v8060_v54, %v8059_v50  ;;  %9765 = vmatprep.subr.bf16.mxu1 %v9764_v40  ;;  %9775 = vmatpush3.bf16.msra.mxu0 %v9772_v34 }
 0x1a5   : > { %v7982_v62 = vpop.f32.mrb[6].mxu0  ;;  %v8062_v63 = vpop.f32.mrb[6].mxu1 }
 0x1a6   : > { %v7983_v1 = vpop.f32.mrb[7].mxu0  ;;  %v8063_v2 = vpop.f32.mrb[7].mxu1  ;;  %9767 = vmatpush3.bf16.msra.mxu1 %v9766_v48 }
 0x1a7   : > { %v11808_v6 = vadd.f32 %v7983_v1, %v7982_v62  ;;  %v11810_v7 = vadd.f32 %v8063_v2, %v8062_v63 }
 0x1a9   : > { %v7985_v10 = vpop.f32.mrb[8].mxu0  ;;  %v8065_v11 = vpop.f32.mrb[8].mxu1 }
 0x1aa   : > { %v7986_v13 = vpop.f32.mrb[9].mxu0  ;;  %v8066_v14 = vpop.f32.mrb[9].mxu1 }
 0x1ab   : > { %v11812_v18 = vadd.f32 %v7986_v13, %v7985_v10  ;;  %v11814_v19 = vadd.f32 %v8066_v14, %v8065_v11 }
 0x1ad   : > { %v7988_v22 = vpop.f32.mrb[10].mxu0  ;;  %v8068_v23 = vpop.f32.mrb[10].mxu1 }
 0x1ae   : > { %v7989_v25 = vpop.f32.mrb[11].mxu0  ;;  %v8069_v26 = vpop.f32.mrb[11].mxu1 }
 0x1af   : > { %v11816_v31 = vadd.f32 %v7989_v25, %v7988_v22  ;;  %v11818_v32 = vadd.f32 %v8069_v26, %v8068_v23 }
 0x1b1   : > { %v7991_v35 = vpop.f32.mrb[12].mxu0  ;;  %v8071_v36 = vpop.f32.mrb[12].mxu1 }
 0x1b2   : > { %v7992_v38 = vpop.f32.mrb[13].mxu0  ;;  %v8072_v39 = vpop.f32.mrb[13].mxu1 }
 0x1b3   : > { %v11820_v44 = vadd.f32 %v7992_v38, %v7991_v35  ;;  %v11822_v45 = vadd.f32 %v8072_v39, %v8071_v36 }
 0x1b5   : > { %v7994_v46 = vpop.f32.mrb[14].mxu0  ;;  %v8074_v47 = vpop.f32.mrb[14].mxu1 }
 0x1b6   : > { %v7995_v49 = vpop.f32.mrb[15].mxu0  ;;  %v8075_v50 = vpop.f32.mrb[15].mxu1 }
 0x1b7   : > { %v11824_v51 = vadd.f32 %v7995_v49, %v7994_v46  ;;  %v11826_v52 = vadd.f32 %v8075_v50, %v8074_v47 }
 0x1b9   : > { %v7997_v53 = vpop.f32.mrb[16].mxu0  ;;  %v8077_v54 = vpop.f32.mrb[16].mxu1 }
 0x1ba   : > { %v7998_v55 = vpop.f32.mrb[17].mxu0  ;;  %v8078_v56 = vpop.f32.mrb[17].mxu1 }
 0x1bb   : > { %v11828_v57 = vadd.f32 %v7998_v55, %v7997_v53  ;;  %v11830_v60 = vadd.f32 %v8078_v56, %v8077_v54 }
 0x1bd   : > { %v8000_v61 = vpop.f32.mrb[18].mxu0  ;;  %v8080_v62 = vpop.f32.mrb[18].mxu1 }
 0x1be   : > { %v8001_v63 = vpop.f32.mrb[19].mxu0  ;;  %v8081_v0 = vpop.f32.mrb[19].mxu1 }
 0x1bf   : > { %v11832_v1 = vadd.f32 %v8001_v63, %v8000_v61  ;;  %v11834_v2 = vadd.f32 %v8081_v0, %v8080_v62 }
 0x1c1   : > { %v8003_v3 = vpop.f32.mrb[20].mxu0  ;;  %v8083_v4 = vpop.f32.mrb[20].mxu1 }
 0x1c2   : > { %v8004_v5 = vpop.f32.mrb[21].mxu0  ;;  %v8084_v8 = vpop.f32.mrb[21].mxu1 }
 0x1c3   : > { %v11836_v9 = vadd.f32 %v8004_v5, %v8003_v3  ;;  %v11838_v10 = vadd.f32 %v8084_v8, %v8083_v4 }
 0x1c5   : > { %v8006_v11 = vpop.f32.mrb[22].mxu0  ;;  %v8086_v12 = vpop.f32.mrb[22].mxu1 }
 0x1c6   : > { %v8007_v13 = vpop.f32.mrb[23].mxu0  ;;  %v8087_v14 = vpop.f32.mrb[23].mxu1 }
 0x1c7   : > { %v11840_v15 = vadd.f32 %v8007_v13, %v8006_v11  ;;  %v11842_v16 = vadd.f32 %v8087_v14, %v8086_v12 }
 0x1c9   : > { %v8009_v17 = vpop.f32.mrb[24].mxu0  ;;  %v8089_v20 = vpop.f32.mrb[24].mxu1 }
 0x1ca   : > { %v8010_v21 = vpop.f32.mrb[25].mxu0  ;;  %v8090_v22 = vpop.f32.mrb[25].mxu1 }
 0x1cb   : > { %v11844_v23 = vadd.f32 %v8010_v21, %v8009_v17  ;;  %v11846_v24 = vadd.f32 %v8090_v22, %v8089_v20 }
 0x1cd   : > { %v8012_v25 = vpop.f32.mrb[26].mxu0  ;;  %v8092_v26 = vpop.f32.mrb[26].mxu1 }
 0x1ce   : > { %v8013_v30 = vpop.f32.mrb[27].mxu0  ;;  %v8093_v33 = vpop.f32.mrb[27].mxu1 }
 0x1cf   : > { %v11848_v35 = vadd.f32 %v8013_v30, %v8012_v25  ;;  %v11850_v36 = vadd.f32 %v8093_v33, %v8092_v26 }
 0x1d1   : > { %v8015_v37 = vpop.f32.mrb[28].mxu0  ;;  %v8095_v38 = vpop.f32.mrb[28].mxu1 }
 0x1d2   : > { %v8016_v39 = vpop.f32.mrb[29].mxu0  ;;  %v8096_v40 = vpop.f32.mrb[29].mxu1 }
 0x1d3   : > { %v11852_v41 = vadd.f32 %v8016_v39, %v8015_v37  ;;  %v11854_v42 = vadd.f32 %v8096_v40, %v8095_v38 }
 0x1d5   : > { %v8018_v46 = vpop.f32.mrb[30].mxu0  ;;  %v8098_v47 = vpop.f32.mrb[30].mxu1 }
 0x1d6   : > { %v8019_v48 = vpop.f32.mrb[31].mxu0  ;;  %v8099_v49 = vpop.f32.mrb[31].mxu1 }
 0x1d7   : > { %v11856_v50 = vadd.f32 %v8019_v48, %v8018_v46  ;;  %v11858_v53 = vadd.f32 %v8099_v49, %v8098_v47 }
 0x1d9   : > { %v8133_v54 = vpop.f32.mrb[32].mxu0 }
 0x1da   : > { %v8134_v55 = vpop.f32.mrb[33].mxu0 }
 0x1db   : > { %v8135_v56 = vadd.f32 %v8134_v55, %v8133_v54 }
 0x1dd   : > { %v8136_v61 = vpop.f32.mrb[34].mxu0  ;;  %1103 = vrot.lane.b32.xlu0 %v8135_v56, %s11119_s23 }
 0x1de   : > { %v8137_v62 = vpop.f32.mrb[35].mxu0 }
 0x1df   : > { %v8138_v63 = vadd.f32 %v8137_v62, %v8136_v61 }
 0x1e1   : > { %v8139_v0 = vpop.f32.mrb[36].mxu0  ;;  %1105 = vrot.lane.b32.xlu1 %v8138_v63, %s11119_s23  ;;  %1043 = vrot.lane.b32.xlu0 %v11806_v59, %s11118_s22 }
 0x1e2   : > { %v8140_v3 = vpop.f32.mrb[37].mxu0 }
 0x1e3   : > { %v8141_v4 = vadd.f32 %v8140_v3, %v8139_v0 }
 0x1e5   : > { %v8142_v5 = vpop.f32.mrb[38].mxu0  ;;  %1107 = vrot.lane.b32.xlu1 %v8141_v4, %s11119_s23  ;;  %1045 = vrot.lane.b32.xlu0 %v11810_v7, %s11118_s22 }
 0x1e6   : > { %v8143_v8 = vpop.f32.mrb[39].mxu0 }
 0x1e7   : > { %v8144_v11 = vadd.f32 %v8143_v8, %v8142_v5 }
 0x1e9   : > { %v8145_v12 = vpop.f32.mrb[40].mxu0  ;;  %1109 = vrot.lane.b32.xlu1 %v8144_v11, %s11119_s23  ;;  %1047 = vrot.lane.b32.xlu0 %v11814_v19, %s11118_s22 }
 0x1ea   : > { %v8146_v13 = vpop.f32.mrb[41].mxu0 }
 0x1eb   : > { %v8147_v14 = vadd.f32 %v8146_v13, %v8145_v12 }
 0x1ed   : > { %v8148_v17 = vpop.f32.mrb[42].mxu0  ;;  %1111 = vrot.lane.b32.xlu1 %v8147_v14, %s11119_s23  ;;  %1049 = vrot.lane.b32.xlu0 %v11818_v32, %s11118_s22 }
 0x1ee   : > { %v8149_v59 = vpop.f32.mrb[43].mxu0 }
 0x1ef   : > { %v8150_v20 = vadd.f32 %v8149_v59, %v8148_v17 }
 0x1f1   : > { %v8151_v21 = vpop.f32.mrb[44].mxu0  ;;  %1113 = vrot.lane.b32.xlu1 %v8150_v20, %s11119_s23  ;;  %1051 = vrot.lane.b32.xlu0 %v11822_v45, %s11118_s22 }
 0x1f2   : > { %v8152_v7 = vpop.f32.mrb[45].mxu0 }
 0x1f3   : > { %v8153_v22 = vadd.f32 %v8152_v7, %v8151_v21 }
 0x1f5   : > { %v8154_v25 = vpop.f32.mrb[46].mxu0  ;;  %1115 = vrot.lane.b32.xlu1 %v8153_v22, %s11119_s23  ;;  %1053 = vrot.lane.b32.xlu0 %v11826_v52, %s11118_s22 }
 0x1f6   : > { %v8155_v19 = vpop.f32.mrb[47].mxu0 }
 0x1f7   : > { %v8156_v26 = vadd.f32 %v8155_v19, %v8154_v25 }
 0x1f9   : > { %v8157_v28 = vpop.f32.mrb[48].mxu0  ;;  %1117 = vrot.lane.b32.xlu1 %v8156_v26, %s11119_s23  ;;  %1055 = vrot.lane.b32.xlu0 %v11830_v60, %s11118_s22 }
 0x1fa   : > { %v8158_v32 = vpop.f32.mrb[49].mxu0 }
 0x1fb   : > { %v8159_v29 = vadd.f32 %v8158_v32, %v8157_v28 }
 0x1fd   : > { %v8160_v30 = vpop.f32.mrb[50].mxu0  ;;  %1119 = vrot.lane.b32.xlu1 %v8159_v29, %s11119_s23  ;;  %1057 = vrot.lane.b32.xlu0 %v11834_v2, %s11118_s22 }
 0x1fe   : > { %v8161_v45 = vpop.f32.mrb[51].mxu0 }
 0x1ff   : > { %v8162_v33 = vadd.f32 %v8161_v45, %v8160_v30 }
 0x201   : > { %v8163_v34 = vpop.f32.mrb[52].mxu0  ;;  %1121 = vrot.lane.b32.xlu1 %v8162_v33, %s11119_s23  ;;  %1059 = vrot.lane.b32.xlu0 %v11838_v10, %s11118_s22 }
 0x202   : > { %v8164_v52 = vpop.f32.mrb[53].mxu0 }
 0x203   : > { %v8165_v37 = vadd.f32 %v8164_v52, %v8163_v34 }
 0x205   : > { %v8166_v38 = vpop.f32.mrb[54].mxu0  ;;  %1123 = vrot.lane.b32.xlu1 %v8165_v37, %s11119_s23  ;;  %1061 = vrot.lane.b32.xlu0 %v11842_v16, %s11118_s22 }
 0x206   : > { %v8167_v60 = vpop.f32.mrb[55].mxu0 }
 0x207   : > { %v8168_v39 = vadd.f32 %v8167_v60, %v8166_v38 }
 0x209   : > { %v8169_v40 = vpop.f32.mrb[56].mxu0  ;;  %1125 = vrot.lane.b32.xlu1 %v8168_v39, %s11119_s23  ;;  %1063 = vrot.lane.b32.xlu0 %v11846_v24, %s11118_s22 }
 0x20a   : > { %v8170_v2 = vpop.f32.mrb[57].mxu0 }
 0x20b   : > { %v8171_v46 = vadd.f32 %v8170_v2, %v8169_v40 }
 0x20d   : > { %v8172_v47 = vpop.f32.mrb[58].mxu0  ;;  %1127 = vrot.lane.b32.xlu1 %v8171_v46, %s11119_s23  ;;  %1065 = vrot.lane.b32.xlu0 %v11850_v36, %s11118_s22 }
 0x20e   : > { %v8173_v10 = vpop.f32.mrb[59].mxu0 }
 0x20f   : > { %v8174_v48 = vadd.f32 %v8173_v10, %v8172_v47  ;;  %v1040_v36 = vpop.permute.xlu0 %1039 }
 0x210   : > { %v1152_v63 = vsel %vm1151_vm2, %v11798_v27, %v1040_v36 }
 0x211   : > { %v8175_v49 = vpop.f32.mrb[60].mxu0  ;;  %1129 = vrot.lane.b32.xlu1 %v8174_v48, %s11119_s23  ;;  %1067 = vrot.lane.b32.xlu0 %v11854_v42, %s11118_s22 }
 0x212   : > { %v8176_v16 = vpop.f32.mrb[61].mxu0 }
 0x213   : > { %v8177_v54 = vadd.f32 %v8176_v16, %v8175_v49  ;;  %v1042_v61 = vpop.permute.xlu1 %1041 }
 0x214   : > { %v1153_v4 = vsel %vm1151_vm2, %v11801_v43, %v1042_v61 }
 0x215   : > { %v8178_v55 = vpop.f32.mrb[62].mxu0  ;;  %1131 = vrot.lane.b32.xlu1 %v8177_v54, %s11119_s23  ;;  %1069 = vrot.lane.b32.xlu0 %v11858_v53, %s11118_s22 }
 0x216   : > { %v8179_v24 = vpop.f32.mrb[63].mxu0 }
 0x217   : > { %v8180_v56 = vadd.f32 %v8179_v24, %v8178_v55 }
 0x219   : > { %1133 = vrot.lane.b32.xlu1 %v8180_v56, %s11119_s23 }
 0x24f   : > { %v1104_v62 = vpop.permute.xlu0 %1103 }
 0x250   : > { %8849 = vmatprep.mubr.msk.f32.mxu0 %vm1226_vm0, %v1104_v62  ;;  %v1169_v42 = vsel %vm1168_vm1, %v1040_v36, %v1104_v62  ;;  %v1565_v62 = vld [vmem:[%s13423_s3] sm:$0xff] }
 0x251   : > { %1323 = vmatprep.mubr.f32.mxu1 %v1169_v42 }
 0x252   : > { %1324 = vmatmul.mubr.f32.vlgmr.msra.gmra.mrb[32].mxu1 %v1152_v63 }
 0x253   : > { %v1106_v53 = vpop.permute.xlu1 %1105  ;;  %v1044_v0 = vpop.permute.xlu0 %1043 }
 0x254   : > { %8850 = vmatmul.mubr.msk.f32.vlgmr.msra.gmra.mrb[64].mxu0 %vm1226_vm0, %v1106_v53  ;;  %v1170_v3 = vsel %vm1168_vm1, %v1042_v61, %v1106_v53  ;;  %v1154_v27 = vsel %vm1151_vm2, %v11804_v58, %v1044_v0  ;;  %v11977_v53 = vld [vmem:[%s13429_s9] ss:$0 sm:$0xff] }
 0x255   : > { %1328 = vmatprep.mubr.f32.mxu1 %v1170_v3 }
 0x256   : > { %1329 = vmatmul.mubr.f32.gmra.mrb[34].mxu1 %v1153_v4 }
 0x257   : > { %v1108_v5 = vpop.permute.xlu1 %1107  ;;  %v1046_v8 = vpop.permute.xlu0 %1045 }
 0x258   : > { %8852 = vmatprep.mubr.msk.f32.mxu0 %vm1226_vm0, %v1108_v5  ;;  %v1171_v11 = vsel %vm1168_vm1, %v1044_v0, %v1108_v5  ;;  %v1155_v43 = vsel %vm1151_vm2, %v11808_v6, %v1046_v8 }
 0x259   : > { %1333 = vmatprep.mubr.f32.mxu1 %v1171_v11 }
 0x25a   : > { %1334 = vmatmul.mubr.f32.gmra.mrb[36].mxu1 %v1154_v27 }
 0x25b   : > { %v1110_v12 = vpop.permute.xlu1 %1109  ;;  %v1048_v13 = vpop.permute.xlu0 %1047 }
 0x25c   : > { %8853 = vmatmul.mubr.msk.f32.gmra.mrb[66].mxu0 %vm1226_vm0, %v1110_v12  ;;  %v1172_v14 = vsel %vm1168_vm1, %v1046_v8, %v1110_v12  ;;  %v1156_v58 = vsel %vm1151_vm2, %v11812_v18, %v1048_v13 }
 0x25d   : > { %1338 = vmatprep.mubr.f32.mxu1 %v1172_v14 }
 0x25e   : > { %1339 = vmatmul.mubr.f32.gmra.mrb[38].mxu1 %v1155_v43 }
 0x25f   : > { %v1112_v17 = vpop.permute.xlu1 %1111  ;;  %v1050_v59 = vpop.permute.xlu0 %1049 }
 0x260   : > { %8855 = vmatprep.mubr.msk.f32.mxu0 %vm1226_vm0, %v1112_v17  ;;  %v1173_v20 = vsel %vm1168_vm1, %v1048_v13, %v1112_v17  ;;  %v1157_v6 = vsel %vm1151_vm2, %v11816_v31, %v1050_v59 }
 0x261   : > { %1343 = vmatprep.mubr.f32.mxu1 %v1173_v20 }
 0x262   : > { %1344 = vmatmul.mubr.f32.gmra.mrb[40].mxu1 %v1156_v58 }
 0x263   : > { %v1114_v21 = vpop.permute.xlu1 %1113  ;;  %v1052_v7 = vpop.permute.xlu0 %1051 }
 0x264   : > { %8856 = vmatmul.mubr.msk.f32.gmra.mrb[68].mxu0 %vm1226_vm0, %v1114_v21  ;;  %v1174_v22 = vsel %vm1168_vm1, %v1050_v59, %v1114_v21  ;;  %v1158_v18 = vsel %vm1151_vm2, %v11820_v44, %v1052_v7 }
 0x265   : > { %1348 = vmatprep.mubr.f32.mxu1 %v1174_v22 }
 0x266   : > { %1349 = vmatmul.mubr.f32.gmra.mrb[42].mxu1 %v1157_v6 }
 0x267   : > { %v1116_v25 = vpop.permute.xlu1 %1115  ;;  %v1054_v19 = vpop.permute.xlu0 %1053 }
 0x268   : > { %8858 = vmatprep.mubr.msk.f32.mxu0 %vm1226_vm0, %v1116_v25  ;;  %v1175_v26 = vsel %vm1168_vm1, %v1052_v7, %v1116_v25  ;;  %v1159_v31 = vsel %vm1151_vm2, %v11824_v51, %v1054_v19 }
 0x269   : > { %1353 = vmatprep.mubr.f32.mxu1 %v1175_v26 }
 0x26a   : > { %1354 = vmatmul.mubr.f32.gmra.mrb[44].mxu1 %v1158_v18 }
 0x26b   : > { %v1118_v28 = vpop.permute.xlu1 %1117  ;;  %v1056_v32 = vpop.permute.xlu0 %1055 }
 0x26c   : > { %8859 = vmatmul.mubr.msk.f32.gmra.mrb[70].mxu0 %vm1226_vm0, %v1118_v28  ;;  %v1176_v29 = vsel %vm1168_vm1, %v1054_v19, %v1118_v28  ;;  %v1160_v44 = vsel %vm1151_vm2, %v11828_v57, %v1056_v32 }
 0x26d   : > { %1358 = vmatprep.mubr.f32.mxu1 %v1176_v29 }
 0x26e   : > { %1359 = vmatmul.mubr.f32.gmra.mrb[46].mxu1 %v1159_v31 }
 0x26f   : > { %v1120_v30 = vpop.permute.xlu1 %1119  ;;  %v1058_v45 = vpop.permute.xlu0 %1057 }
 0x270   : > { %8861 = vmatprep.mubr.msk.f32.mxu0 %vm1226_vm0, %v1120_v30  ;;  %v1177_v33 = vsel %vm1168_vm1, %v1056_v32, %v1120_v30  ;;  %v1161_v51 = vsel %vm1151_vm2, %v11832_v1, %v1058_v45 }
 0x271   : > { %1363 = vmatprep.mubr.f32.mxu1 %v1177_v33 }
 0x272   : > { %1364 = vmatmul.mubr.f32.gmra.mrb[48].mxu1 %v1160_v44 }
 0x273   : > { %v1122_v34 = vpop.permute.xlu1 %1121  ;;  %v1060_v52 = vpop.permute.xlu0 %1059 }
 0x274   : > { %8862 = vmatmul.mubr.msk.f32.gmra.mrb[72].mxu0 %vm1226_vm0, %v1122_v34  ;;  %v1178_v37 = vsel %vm1168_vm1, %v1058_v45, %v1122_v34  ;;  %v1162_v57 = vsel %vm1151_vm2, %v11836_v9, %v1060_v52 }
 0x275   : > { %1368 = vmatprep.mubr.f32.mxu1 %v1178_v37 }
 0x276   : > { %1369 = vmatmul.mubr.f32.gmra.mrb[50].mxu1 %v1161_v51 }
 0x277   : > { %v1124_v38 = vpop.permute.xlu1 %1123  ;;  %v1062_v60 = vpop.permute.xlu0 %1061 }
 0x278   : > { %8864 = vmatprep.mubr.msk.f32.mxu0 %vm1226_vm0, %v1124_v38  ;;  %v1179_v39 = vsel %vm1168_vm1, %v1060_v52, %v1124_v38  ;;  %v1163_v1 = vsel %vm1151_vm2, %v11840_v15, %v1062_v60 }
 0x279   : > { %1373 = vmatprep.mubr.f32.mxu1 %v1179_v39 }
 0x27a   : > { %1374 = vmatmul.mubr.f32.gmra.mrb[52].mxu1 %v1162_v57 }
 0x27b   : > { %v1126_v40 = vpop.permute.xlu1 %1125  ;;  %v1064_v2 = vpop.permute.xlu0 %1063 }
 0x27c   : > { %8865 = vmatmul.mubr.msk.f32.gmra.mrb[74].mxu0 %vm1226_vm0, %v1126_v40  ;;  %v1180_v46 = vsel %vm1168_vm1, %v1062_v60, %v1126_v40  ;;  %v1164_v9 = vsel %vm1151_vm2, %v11844_v23, %v1064_v2 }
 0x27d   : > { %1378 = vmatprep.mubr.f32.mxu1 %v1180_v46 }
 0x27e   : > { %1379 = vmatmul.mubr.f32.gmra.mrb[54].mxu1 %v1163_v1 }
 0x27f   : > { %v1128_v47 = vpop.permute.xlu1 %1127  ;;  %v1066_v10 = vpop.permute.xlu0 %1065 }
 0x280   : > { %8867 = vmatprep.mubr.msk.f32.mxu0 %vm1226_vm0, %v1128_v47  ;;  %v1181_v48 = vsel %vm1168_vm1, %v1064_v2, %v1128_v47  ;;  %v1165_v15 = vsel %vm1151_vm2, %v11848_v35, %v1066_v10 }
 0x281   : > { %1383 = vmatprep.mubr.f32.mxu1 %v1181_v48 }
 0x282   : > { %1384 = vmatmul.mubr.f32.gmra.mrb[56].mxu1 %v1164_v9 }
 0x283   : > { %v1130_v49 = vpop.permute.xlu1 %1129  ;;  %v1068_v16 = vpop.permute.xlu0 %1067 }
 0x284   : > { %8868 = vmatmul.mubr.msk.f32.gmra.mrb[76].mxu0 %vm1226_vm0, %v1130_v49  ;;  %v1182_v54 = vsel %vm1168_vm1, %v1066_v10, %v1130_v49  ;;  %v1166_v23 = vsel %vm1151_vm2, %v11852_v41, %v1068_v16  ;;  %v7737_v41 = vld [vmem:[%s13423_s3 + $0x40] sm:$0xff] }
 0x285   : > { %1388 = vmatprep.mubr.f32.mxu1 %v1182_v54 }
 0x286   : > { %1389 = vmatmul.mubr.f32.gmra.mrb[58].mxu1 %v1165_v15 }
 0x287   : > { %v1132_v55 = vpop.permute.xlu1 %1131  ;;  %v1070_v56 = vpop.permute.xlu0 %1069 }
 0x288   : > { %8870 = vmatprep.mubr.msk.f32.mxu0 %vm1226_vm0, %v1132_v55  ;;  %v1183_v24 = vsel %vm1168_vm1, %v1068_v16, %v1132_v55  ;;  %v1167_v35 = vsel %vm1151_vm2, %v11856_v50, %v1070_v56 }
 0x289   : > { %1393 = vmatprep.mubr.f32.mxu1 %v1183_v24 }
 0x28a   : > { %1394 = vmatmul.mubr.f32.gmra.mrb[60].mxu1 %v1166_v23 }
 0x28b   : > { %v1134_v36 = vpop.permute.xlu1 %1133 }
 0x28c   : > { %8871 = vmatmul.mubr.msk.f32.gmra.mrb[78].mxu0 %vm1226_vm0, %v1134_v36  ;;  %v1184_v61 = vsel %vm1168_vm1, %v1070_v56, %v1134_v36 }
 0x28d   : > { %1398 = vmatprep.mubr.f32.mxu1 %v1184_v61  ;;  %8949 = vmatprep.mubr.f32.mxu0 %v7737_v41 }
 0x28e   : > { %1399 = vmatmul.mubr.f32.gmra.mrb[62].mxu1 %v1167_v35 }
 0x28f   : > { %8905 = vmatprep.mubr.f32.mxu1 %v1565_v62 }
 0x325   : > { %v8213_v42 = vpop.f32.mrb[32].mxu1 }
 0x326   : > { %v8214_v63 = vpop.f32.mrb[33].mxu1 }
 0x327   : > { %v8215_v0 = vadd.f32 %v8214_v63, %v8213_v42  ;;  %v8851_v50 = vpop.f32.mrb[64].mxu0 }
 0x328   : > { %v1470_v3 = vpop.f32.mrb[65].mxu0 }
 0x329   : > { %v1326_v4 = vadd.f32 %v8215_v0, %v11977_v53  ;;  %v8216_v5 = vpop.f32.mrb[34].mxu1 }
 0x32a   : > { %v8217_v8 = vpop.f32.mrb[35].mxu1 }
 0x32b   : > { %v1471_v11 = vadd.f32 %v1470_v3, %v1326_v4  ;;  %v8218_v27 = vadd.f32 %v8217_v8, %v8216_v5 }
 0x32d   : > { %v1331_v12 = vadd.f32 %v8218_v27, %v11977_v53  ;;  %v8219_v13 = vpop.f32.mrb[36].mxu1  ;;  %v1549_v58 = vmax.f32 %v1471_v11, 0.0 }
 0x32e   : > { %v8220_v14 = vpop.f32.mrb[37].mxu1 }
 0x32f   : > { %v1476_v43 = vadd.f32 %v8851_v50, %v1331_v12  ;;  %v8221_v17 = vadd.f32 %v8220_v14, %v8219_v13  ;;  %v8854_v59 = vpop.f32.mrb[66].mxu0 }
 0x330   : > { %v1480_v20 = vpop.f32.mrb[67].mxu0 }
 0x331   : > { %v1550_v21 = vmax.f32 %v1476_v43, 0.0  ;;  %v1336_v7 = vadd.f32 %v8221_v17, %v11977_v53  ;;  %v8222_v22 = vpop.f32.mrb[38].mxu1 }
 0x332   : > { %v8223_v6 = vpop.f32.mrb[39].mxu1 }
 0x333   : > { %v11982_v25 = vpack.c.bf16 %v1550_v21, %v1549_v58  ;;  %v1481_v19 = vadd.f32 %v1480_v20, %v1336_v7  ;;  %v8224_v26 = vadd.f32 %v8223_v6, %v8222_v22 }
 0x335   : > { %v1341_v18 = vadd.f32 %v8224_v26, %v11977_v53  ;;  %v8225_v28 = vpop.f32.mrb[40].mxu1  ;;  %9777 = vmatprep.subr.bf16.mxu1 %v11982_v25  ;;  %9809 = vmatprep.subr.bf16.mxu0 %v11982_v25  ;;  %v1551_v33 = vmax.f32 %v1481_v19, 0.0 }
 0x336   : > { %v8226_v32 = vpop.f32.mrb[41].mxu1  ;;  %9779 = vmatpush3.bf16.msra.mxu1 %v11982_v25  ;;  %9811 = vmatpush3.bf16.msra.mxu0 %v11982_v25 }
 0x337   : > { %v1486_v29 = vadd.f32 %v8854_v59, %v1341_v18  ;;  %v8227_v31 = vadd.f32 %v8226_v32, %v8225_v28  ;;  %v8857_v30 = vpop.f32.mrb[68].mxu0 }
 0x338   : > { %v1490_v45 = vpop.f32.mrb[69].mxu0 }
 0x339   : > { %v1552_v44 = vmax.f32 %v1486_v29, 0.0  ;;  %v1346_v34 = vadd.f32 %v8227_v31, %v11977_v53  ;;  %v8228_v52 = vpop.f32.mrb[42].mxu1 }
 0x33a   : > { %v8229_v37 = vpop.f32.mrb[43].mxu1 }
 0x33b   : > { %v11990_v51 = vpack.c.bf16 %v1552_v44, %v1551_v33  ;;  %v1491_v38 = vadd.f32 %v1490_v45, %v1346_v34  ;;  %v8230_v60 = vadd.f32 %v8229_v37, %v8228_v52 }
 0x33d   : > { %v1351_v39 = vadd.f32 %v8230_v60, %v11977_v53  ;;  %v8231_v57 = vpop.f32.mrb[44].mxu1  ;;  %9781 = vmatprep.subr.bf16.mxu1 %v11990_v51  ;;  %9813 = vmatprep.subr.bf16.mxu0 %v11990_v51  ;;  %v1553_v10 = vmax.f32 %v1491_v38, 0.0 }
 0x33e   : > { %v8232_v40 = vpop.f32.mrb[45].mxu1  ;;  %9783 = vmatpush3.bf16.msra.mxu1 %v11990_v51  ;;  %9815 = vmatpush3.bf16.msra.mxu0 %v11990_v51 }
 0x33f   : > { %v1496_v2 = vadd.f32 %v8857_v30, %v1351_v39  ;;  %v8233_v46 = vadd.f32 %v8232_v40, %v8231_v57  ;;  %v8860_v1 = vpop.f32.mrb[70].mxu0 }
 0x340   : > { %v1500_v47 = vpop.f32.mrb[71].mxu0 }
 0x341   : > { %v1554_v48 = vmax.f32 %v1496_v2, 0.0  ;;  %v1356_v9 = vadd.f32 %v8233_v46, %v11977_v53  ;;  %v8234_v49 = vpop.f32.mrb[46].mxu1 }
 0x342   : > { %v8235_v16 = vpop.f32.mrb[47].mxu1 }
 0x343   : > { %v11998_v54 = vpack.c.bf16 %v1554_v48, %v1553_v10  ;;  %v1501_v15 = vadd.f32 %v1500_v47, %v1356_v9  ;;  %v8236_v55 = vadd.f32 %v8235_v16, %v8234_v49 }
 0x345   : > { %v1361_v24 = vadd.f32 %v8236_v55, %v11977_v53  ;;  %v8237_v23 = vpop.f32.mrb[48].mxu1  ;;  %9785 = vmatprep.subr.bf16.mxu1 %v11998_v54  ;;  %9817 = vmatprep.subr.bf16.mxu0 %v11998_v54  ;;  %v1555_v41 = vmax.f32 %v1501_v15, 0.0 }
 0x346   : > { %v8238_v56 = vpop.f32.mrb[49].mxu1  ;;  %9787 = vmatpush3.bf16.msra.mxu1 %v11998_v54  ;;  %9819 = vmatpush3.bf16.msra.mxu0 %v11998_v54 }
 0x347   : > { %v1506_v36 = vadd.f32 %v8860_v1, %v1361_v24  ;;  %v8239_v61 = vadd.f32 %v8238_v56, %v8237_v23  ;;  %v8863_v35 = vpop.f32.mrb[72].mxu0  ;;  %v1922_v56 = vld [vmem:[#allocation5 + $0x80] sm:$0xff] }
 0x348   : > { %v1510_v62 = vpop.f32.mrb[73].mxu0 }
 0x349   : > { %v1556_v42 = vmax.f32 %v1506_v36, 0.0  ;;  %v1366_v63 = vadd.f32 %v8239_v61, %v11977_v53  ;;  %v8240_v0 = vpop.f32.mrb[50].mxu1  ;;  %v1923_v36 = vld [vmem:[#allocation5 + $0x88] sm:$0xff] }
 0x34a   : > { %v8241_v50 = vpop.f32.mrb[51].mxu1 }
 0x34b   : > { %v12006_v3 = vpack.c.bf16 %v1556_v42, %v1555_v41  ;;  %v1511_v4 = vadd.f32 %v1510_v62, %v1366_v63  ;;  %v8242_v5 = vadd.f32 %v8241_v50, %v8240_v0  ;;  %v9872_v41 = vpack.c.bf16 %v1923_v36, %v1922_v56  ;;  %v1907_v42 = vld [vmem:[#allocation5 + $0x8] sm:$0xff]  ;;  %v7739_v50 = vld [vmem:[%s13423_s3 + $0x50] sm:$0xff] }
 0x34c   : > { %v1566_v63 = vld [vmem:[%s13423_s3 + $0x8] sm:$0xff]  ;;  %v7747_v36 = vld [vmem:[%s13423_s3 + $0x90] sm:$0xff] }
 0x34d   : > { %v1371_v8 = vadd.f32 %v8242_v5, %v11977_v53  ;;  %v8243_v11 = vpop.f32.mrb[52].mxu1  ;;  %9789 = vmatprep.subr.bf16.mxu1 %v12006_v3  ;;  %9821 = vmatprep.subr.bf16.mxu0 %v12006_v3  ;;  %v1557_v17 = vmax.f32 %v1511_v4, 0.0  ;;  %v7738_v0 = vld [vmem:[%s13423_s3 + $0x48] sm:$0xff]  ;;  %v1567_v4 = vld [vmem:[%s13423_s3 + $0x10] sm:$0xff] }
 0x34e   : > { %v8244_v27 = vpop.f32.mrb[53].mxu1  ;;  %9791 = vmatpush3.bf16.msra.mxu1 %v12006_v3  ;;  %9823 = vmatpush3.bf16.msra.mxu0 %v12006_v3  ;;  %v7746_v56 = vld [vmem:[%s13423_s3 + $0x88] sm:$0xff] }
 0x34f   : > { %v1516_v12 = vadd.f32 %v8863_v35, %v1371_v8  ;;  %v8245_v13 = vadd.f32 %v8244_v27, %v8243_v11  ;;  %v8866_v14 = vpop.f32.mrb[74].mxu0  ;;  %v1924_v8 = vld [vmem:[#allocation5 + $0x90] sm:$0xff]  ;;  %v1925_v11 = vld [vmem:[#allocation5 + $0x98] sm:$0xff] }
 0x350   : > { %v1520_v43 = vpop.f32.mrb[75].mxu0  ;;  %v7740_v27 = vld [vmem:[%s13423_s3 + $0x58] sm:$0xff] }
 0x351   : > { %v1558_v59 = vmax.f32 %v1516_v12, 0.0  ;;  %v1376_v20 = vadd.f32 %v8245_v13, %v11977_v53  ;;  %v8246_v58 = vpop.f32.mrb[54].mxu1  ;;  %v1568_v12 = vld [vmem:[%s13423_s3 + $0x18] sm:$0xff]  ;;  %v7741_v13 = vld [vmem:[%s13423_s3 + $0x60] sm:$0xff] }
 0x352   : > { %v8247_v21 = vpop.f32.mrb[55].mxu1 }
 0x353   : > { %v12014_v7 = vpack.c.bf16 %v1558_v59, %v1557_v17  ;;  %v1521_v22 = vadd.f32 %v1520_v43, %v1376_v20  ;;  %v8248_v6 = vadd.f32 %v8247_v21, %v8246_v58  ;;  %v1908_v43 = vld [vmem:[#allocation5 + $0x10] sm:$0xff]  ;;  %v1909_v17 = vld [vmem:[#allocation5 + $0x18] sm:$0xff]  ;;  %v7742_v59 = vld [vmem:[%s13423_s3 + $0x68] sm:$0xff] }
 0x354   : > { %v1570_v20 = vld [vmem:[%s13423_s3 + $0x28] sm:$0xff]  ;;  %v7743_v58 = vld [vmem:[%s13423_s3 + $0x70] sm:$0xff]  ;;  %v9878_v21 = vpack.c.bf16 %v1909_v17, %v1908_v43  ;;  %v1946_v17 = vld [vmem:[#allocation5 + $0x140] sm:$0xff] }
 0x355   : > { %v1381_v19 = vadd.f32 %v8248_v6, %v11977_v53  ;;  %v8249_v26 = vpop.f32.mrb[56].mxu1  ;;  %9793 = vmatprep.subr.bf16.mxu1 %v12014_v7  ;;  %9825 = vmatprep.subr.bf16.mxu0 %v12014_v7  ;;  %v1559_v30 = vmax.f32 %v1521_v22, 0.0  ;;  %v1926_v22 = vld [vmem:[#allocation5 + $0xa0] sm:$0xff]  ;;  %v1927_v6 = vld [vmem:[#allocation5 + $0xa8] sm:$0xff] }
 0x356   : > { %v8250_v18 = vpop.f32.mrb[57].mxu1  ;;  %9795 = vmatpush3.bf16.msra.mxu1 %v12014_v7  ;;  %9827 = vmatpush3.bf16.msra.mxu0 %v12014_v7 }
 0x357   : > { %v1526_v28 = vadd.f32 %v8866_v14, %v1381_v19  ;;  %v8251_v32 = vadd.f32 %v8250_v18, %v8249_v26  ;;  %v8869_v29 = vpop.f32.mrb[76].mxu0  ;;  %v9876_v14 = vpack.c.bf16 %v1925_v11, %v1924_v8  ;;  %v7744_v19 = vld [vmem:[%s13423_s3 + $0x78] sm:$0xff]  ;;  %v1910_v26 = vld [vmem:[#allocation5 + $0x20] sm:$0xff]  ;;  %v1911_v18 = vld [vmem:[#allocation5 + $0x28] sm:$0xff] }
 0x358   : > { %v1530_v31 = vpop.f32.mrb[77].mxu0  ;;  %v1941_v8 = vld [vmem:[#allocation5 + $0x118] sm:$0xff] }
 0x359   : > { %v1560_v45 = vmax.f32 %v1526_v28, 0.0  ;;  %v1386_v33 = vadd.f32 %v8251_v32, %v11977_v53  ;;  %v8252_v44 = vpop.f32.mrb[58].mxu1  ;;  %v1572_v28 = vld [vmem:[%s13423_s3 + $0x38] sm:$0xff]  ;;  %v1928_v32 = vld [vmem:[#allocation5 + $0xb0] sm:$0xff] }
 0x35a   : > { %v8253_v34 = vpop.f32.mrb[59].mxu1 }
 0x35b   : > { %v12022_v52 = vpack.c.bf16 %v1560_v45, %v1559_v30  ;;  %v1531_v37 = vadd.f32 %v1530_v31, %v1386_v33  ;;  %v8254_v38 = vadd.f32 %v8253_v34, %v8252_v44  ;;  %v7745_v31 = vld [vmem:[%s13423_s3 + $0x80] sm:$0xff]  ;;  %v9880_v30 = vpack.c.bf16 %v1927_v6, %v1926_v22  ;;  %v1912_v33 = vld [vmem:[#allocation5 + $0x30] sm:$0xff]  ;;  %v1913_v44 = vld [vmem:[#allocation5 + $0x38] sm:$0xff] }
 0x35c   : > { %v9882_v45 = vpack.c.bf16 %v1911_v18, %v1910_v26  ;;  %v1930_v34 = vld [vmem:[#allocation5 + $0xc0] sm:$0xff]  ;;  %v1951_v6 = vld [vmem:[#allocation5 + $0x168] sm:$0xff]  ;;  %v1952_v26 = vld [vmem:[#allocation5 + $0x170] sm:$0xff] }
 0x35d   : > { %v1391_v60 = vadd.f32 %v8254_v38, %v11977_v53  ;;  %v8255_v39 = vpop.f32.mrb[60].mxu1  ;;  %9797 = vmatprep.subr.bf16.mxu1 %v12022_v52  ;;  %9829 = vmatprep.subr.bf16.mxu0 %v12022_v52  ;;  %v1561_v47 = vmax.f32 %v1531_v37, 0.0  ;;  %v1931_v37 = vld [vmem:[#allocation5 + $0xc8] sm:$0xff]  ;;  %v9886_v38 = vpack.c.bf16 %v1913_v44, %v1912_v33  ;;  %v1950_v22 = vld [vmem:[#allocation5 + $0x160] sm:$0xff]  ;;  %v1953_v18 = vld [vmem:[#allocation5 + $0x178] sm:$0xff] }
 0x35e   : > { %v8256_v57 = vpop.f32.mrb[61].mxu1  ;;  %9799 = vmatpush3.bf16.msra.mxu1 %v12022_v52  ;;  %9831 = vmatpush3.bf16.msra.mxu0 %v12022_v52 }
 0x35f   : > { %v1536_v40 = vadd.f32 %v8869_v29, %v1391_v60  ;;  %v8257_v2 = vadd.f32 %v8256_v57, %v8255_v39  ;;  %v8872_v46 = vpop.f32.mrb[78].mxu0  ;;  %v1929_v29 = vld [vmem:[#allocation5 + $0xb8] sm:$0xff]  ;;  %v9888_v60 = vpack.c.bf16 %v1931_v37, %v1930_v34  ;;  %v1914_v39 = vld [vmem:[#allocation5 + $0x40] sm:$0xff]  ;;  %v1915_v57 = vld [vmem:[#allocation5 + $0x48] sm:$0xff] }
 0x360   : > { %v1540_v1 = vpop.f32.mrb[79].mxu0 }
 0x361   : > { %v1562_v10 = vmax.f32 %v1536_v40, 0.0  ;;  %v1396_v48 = vadd.f32 %v8257_v2, %v11977_v53  ;;  %v8258_v9 = vpop.f32.mrb[62].mxu1  ;;  %v1932_v40 = vld [vmem:[#allocation5 + $0xd0] sm:$0xff]  ;;  %v1933_v2 = vld [vmem:[#allocation5 + $0xd8] sm:$0xff] }
 0x362   : > { %v8259_v49 = vpop.f32.mrb[63].mxu1 }
 0x363   : > { %v12030_v16 = vpack.c.bf16 %v1562_v10, %v1561_v47  ;;  %v1541_v15 = vadd.f32 %v1540_v1, %v1396_v48  ;;  %v8260_v55 = vadd.f32 %v8259_v49, %v8258_v9  ;;  %v1916_v1 = vld [vmem:[#allocation5 + $0x50] sm:$0xff]  ;;  %v1917_v47 = vld [vmem:[#allocation5 + $0x58] sm:$0xff]  ;;  %v1934_v10 = vld [vmem:[#allocation5 + $0xe0] sm:$0xff] }
 0x364   : > { %v1935_v48 = vld [vmem:[#allocation5 + $0xe8] sm:$0xff]  ;;  %v9894_v9 = vpack.c.bf16 %v1917_v47, %v1916_v1  ;;  %v1918_v49 = vld [vmem:[#allocation5 + $0x60] sm:$0xff] }
 0x365   : > { %v1401_v24 = vadd.f32 %v8260_v55, %v11977_v53  ;;  %9801 = vmatprep.subr.bf16.mxu1 %v12030_v16  ;;  %9833 = vmatprep.subr.bf16.mxu0 %v12030_v16  ;;  %v1563_v61 = vmax.f32 %v1541_v15, 0.0  ;;  %v1906_v53 = vld [vmem:[#allocation5] sm:$0xff]  ;;  %v1919_v15 = vld [vmem:[#allocation5 + $0x68] sm:$0xff]  ;;  %v1936_v55 = vld [vmem:[#allocation5 + $0xf0] sm:$0xff] }
 0x366   : > { %9803 = vmatpush3.bf16.msra.mxu1 %v12030_v16  ;;  %9835 = vmatpush3.bf16.msra.mxu0 %v12030_v16  ;;  %v9874_v5 = vpack.c.bf16 %v1907_v42, %v1906_v53  ;;  %v1920_v53 = vld [vmem:[#allocation5 + $0x70] sm:$0xff]  ;;  %v1921_v42 = vld [vmem:[#allocation5 + $0x78] sm:$0xff] }
 0x367   : > { %v1546_v23 = vadd.f32 %v8872_v46, %v1401_v24  ;;  %v9892_v46 = vpack.c.bf16 %v1933_v2, %v1932_v40  ;;  %v1937_v24 = vld [vmem:[#allocation5 + $0xf8] sm:$0xff] }
 0x369   : > { %v1564_v35 = vmax.f32 %v1546_v23, 0.0  ;;  %v9898_v23 = vpack.c.bf16 %v1919_v15, %v1918_v49  ;;  %v2279_v49 = vld [vmem:[#allocation7 + $0x20] sm:$0xff] }
 0x36a   : > { %v2177_v15 = vld [vmem:[#allocation7] sm:$0xff] }
 0x36b   : > { %v12037_v62 = vpack.c.bf16 %v1564_v35, %v1563_v61  ;;  %v7749_v61 = vld [vmem:[%s13423_s3 + $0xa0] sm:$0xff]  ;;  %v7750_v35 = vld [vmem:[%s13423_s3 + $0xa8] sm:$0xff] }
 0x36d   : > { %9805 = vmatprep.subr.bf16.mxu1 %v12037_v62  ;;  %9837 = vmatprep.subr.bf16.mxu0 %v12037_v62 }
 0x36e   : > { %9807 = vmatpush3.bf16.msra.mxu1 %v12037_v62  ;;  %9839 = vmatpush3.bf16.msra.mxu0 %v12037_v62 }
 0x36f   : > { %9841 = vmatprep.subr.bf16.mxu1 %v11982_v25  ;;  %9873 = vmatprep.subr.bf16.mxu0 %v9872_v41  ;;  %v7752_v41 = vld [vmem:[%s13423_s3 + $0xb8] sm:$0xff] }
 0x371   : > { %8906 = vmatmul.mubr.f32.vlgmr.msra.gmra.mrb[64].mxu1 %v1566_v63  ;;  %8950 = vmatmul.mubr.f32.vlgmr.msra.gmra.mrb[80].mxu0 %v7738_v0  ;;  %v9902_v63 = vpack.c.bf16 %v1921_v42, %v1920_v53  ;;  %v1938_v0 = vld [vmem:[#allocation5 + $0x100] sm:$0xff] }
 0x372   : > { %9843 = vmatpush3.bf16.msra.mxu1 %v11982_v25  ;;  %8952 = vmatprep.mubr.f32.mxu0 %v7739_v50  ;;  %v1569_v25 = vld [vmem:[%s13423_s3 + $0x20] sm:$0xff]  ;;  %v1939_v50 = vld [vmem:[#allocation5 + $0x108] sm:$0xff] }
 0x373   : > { %9845 = vmatprep.subr.bf16.mxu1 %v11990_v51  ;;  %8908 = vmatprep.mubr.f32.mxu1 %v1567_v4  ;;  %v9904_v4 = vpack.c.bf16 %v1939_v50, %v1938_v0 }
 0x374   : > { %9875 = vmatpush3.bf16.msra.mxu0 %v9874_v5  ;;  %v1940_v5 = vld [vmem:[#allocation5 + $0x110] sm:$0xff] }
 0x375   : > { %8953 = vmatmul.mubr.f32.gmra.mrb[82].mxu0 %v7740_v27  ;;  %8909 = vmatmul.mubr.f32.gmra.mrb[66].mxu1 %v1568_v12  ;;  %v9908_v11 = vpack.c.bf16 %v1941_v8, %v1940_v5  ;;  %v1942_v27 = vld [vmem:[#allocation5 + $0x120] sm:$0xff]  ;;  %v1943_v12 = vld [vmem:[#allocation5 + $0x128] sm:$0xff] }
 0x376   : > { %9847 = vmatpush3.bf16.msra.mxu1 %v11990_v51  ;;  %8955 = vmatprep.mubr.f32.mxu0 %v7741_v13  ;;  %v1571_v51 = vld [vmem:[%s13423_s3 + $0x30] sm:$0xff]  ;;  %v9912_v13 = vpack.c.bf16 %v1943_v12, %v1942_v27 }
 0x377   : > { %9849 = vmatprep.subr.bf16.mxu1 %v11998_v54  ;;  %8911 = vmatprep.mubr.f32.mxu1 %v1569_v25  ;;  %v1944_v25 = vld [vmem:[#allocation5 + $0x130] sm:$0xff] }
 0x378   : > { %9877 = vmatprep.subr.bf16.mxu0 %v9876_v14  ;;  %v1945_v14 = vld [vmem:[#allocation5 + $0x138] sm:$0xff] }
 0x379   : > { %8956 = vmatmul.mubr.f32.gmra.mrb[84].mxu0 %v7742_v59  ;;  %8912 = vmatmul.mubr.f32.gmra.mrb[68].mxu1 %v1570_v20  ;;  %v9916_v43 = vpack.c.bf16 %v1945_v14, %v1944_v25  ;;  %v1947_v59 = vld [vmem:[#allocation5 + $0x148] sm:$0xff]  ;;  %v7753_v25 = vld [vmem:[%s13429_s9 + $0x1] ss:$0 sm:$0xff] }
 0x37a   : > { %9851 = vmatpush3.bf16.msra.mxu1 %v11998_v54  ;;  %8958 = vmatprep.mubr.f32.mxu0 %v7743_v58  ;;  %v9884_v54 = vpack.c.bf16 %v1929_v29, %v1928_v32  ;;  %v9920_v20 = vpack.c.bf16 %v1947_v59, %v1946_v17  ;;  %v1948_v58 = vld [vmem:[#allocation5 + $0x150] sm:$0xff] }
 0x37b   : > { %9853 = vmatprep.subr.bf16.mxu1 %v12006_v3  ;;  %8914 = vmatprep.mubr.f32.mxu1 %v1571_v51  ;;  %v1949_v51 = vld [vmem:[#allocation5 + $0x158] sm:$0xff] }
 0x37c   : > { %9879 = vmatpush3.bf16.msra.mxu0 %v9878_v21  ;;  %v9924_v21 = vpack.c.bf16 %v1949_v51, %v1948_v58 }
 0x37d   : > { %8959 = vmatmul.mubr.f32.gmra.mrb[86].mxu0 %v7744_v19  ;;  %8915 = vmatmul.mubr.f32.gmra.mrb[70].mxu1 %v1572_v28  ;;  %v9928_v19 = vpack.c.bf16 %v1951_v6, %v1950_v22  ;;  %v9932_v28 = vpack.c.bf16 %v1953_v18, %v1952_v26 }
 0x37e   : > { %9855 = vmatpush3.bf16.msra.mxu1 %v12006_v3  ;;  %8993 = vmatprep.mubr.f32.mxu1 %v7745_v31  ;;  %v9890_v3 = vpack.c.bf16 %v1915_v57, %v1914_v39 }
 0x37f   : > { %9857 = vmatprep.subr.bf16.mxu1 %v12014_v7  ;;  %9881 = vmatprep.subr.bf16.mxu0 %v9880_v30 }
 0x380   : > { %9883 = vmatpush3.bf16.msra.mxu0 %v9882_v45 }
 0x381   : > { %9885 = vmatprep.subr.bf16.mxu0 %v9884_v54 }
 0x382   : > { %9859 = vmatpush3.bf16.msra.mxu1 %v12014_v7  ;;  %v9896_v7 = vpack.c.bf16 %v1935_v48, %v1934_v10 }
 0x383   : > { %9861 = vmatprep.subr.bf16.mxu1 %v12022_v52 }
 0x384   : > { %9887 = vmatpush3.bf16.msra.mxu0 %v9886_v38 }
 0x385   : > { %9889 = vmatprep.subr.bf16.mxu0 %v9888_v60 }
 0x386   : > { %9863 = vmatpush3.bf16.msra.mxu1 %v12022_v52  ;;  %v9900_v52 = vpack.c.bf16 %v1937_v24, %v1936_v55 }
 0x387   : > { %9865 = vmatprep.subr.bf16.mxu1 %v12030_v16 }
 0x388   : > { %9891 = vmatpush3.bf16.msra.mxu0 %v9890_v3 }
 0x389   : > { %9893 = vmatprep.subr.bf16.mxu0 %v9892_v46 }
 0x38a   : > { %9867 = vmatpush3.bf16.msra.mxu1 %v12030_v16  ;;  %v7748_v16 = vld [vmem:[%s13423_s3 + $0x98] sm:$0xff] }
 0x38b   : > { %9869 = vmatprep.subr.bf16.mxu1 %v12037_v62 }
 0x38c   : > { %9895 = vmatpush3.bf16.msra.mxu0 %v9894_v9 }
 0x38d   : > { %9897 = vmatprep.subr.bf16.mxu0 %v9896_v7 }
 0x38e   : > { %9871 = vmatpush3.bf16.msra.mxu1 %v12037_v62  ;;  %v7751_v62 = vld [vmem:[%s13423_s3 + $0xb0] sm:$0xff] }
 0x38f   : > { %9905 = vmatprep.subr.bf16.mxu1 %v9904_v4 }
 0x390   : > { %9899 = vmatpush3.bf16.msra.mxu0 %v9898_v23 }
 0x391   : > { %8994 = vmatmul.mubr.f32.vlgmr.msra.gmra.mrb[72].mxu1 %v7746_v56  ;;  %9901 = vmatprep.subr.bf16.mxu0 %v9900_v52 }
 0x392   : > { %8996 = vmatprep.mubr.f32.mxu1 %v7747_v36  ;;  %9907 = vmatpush3.bf16.msra.mxu1 %v9904_v4 }
 0x393   : > { %9909 = vmatprep.subr.bf16.mxu1 %v9908_v11 }
 0x394   : > { %9903 = vmatpush3.bf16.msra.mxu0 %v9902_v63 }
 0x395   : > { %8997 = vmatmul.mubr.f32.gmra.mrb[74].mxu1 %v7748_v16 }
 0x396   : > { %8999 = vmatprep.mubr.f32.mxu1 %v7749_v61  ;;  %9911 = vmatpush3.bf16.msra.mxu1 %v9908_v11 }
 0x397   : > { %9913 = vmatprep.subr.bf16.mxu1 %v9912_v13 }
 0x399   : > { %9000 = vmatmul.mubr.f32.gmra.mrb[76].mxu1 %v7750_v35 }
 0x39a   : > { %9002 = vmatprep.mubr.f32.mxu1 %v7751_v62  ;;  %9915 = vmatpush3.bf16.msra.mxu1 %v9912_v13 }
 0x39b   : > { %9917 = vmatprep.subr.bf16.mxu1 %v9916_v43 }
 0x39d   : > { %9003 = vmatmul.mubr.f32.gmra.mrb[78].mxu1 %v7752_v41 }
 0x39e   : > { %9919 = vmatpush3.bf16.msra.mxu1 %v9916_v43 }
 0x39f   : > { %9921 = vmatprep.subr.bf16.mxu1 %v9920_v20 }
 0x3a2   : > { %9923 = vmatpush3.bf16.msra.mxu1 %v9920_v20 }
 0x3a3   : > { %9925 = vmatprep.subr.bf16.mxu1 %v9924_v21 }
 0x3a6   : > { %9927 = vmatpush3.bf16.msra.mxu1 %v9924_v21 }
 0x3a7   : > { %9929 = vmatprep.subr.bf16.mxu1 %v9928_v19 }
 0x3aa   : > { %9931 = vmatpush3.bf16.msra.mxu1 %v9928_v19 }
 0x3ab   : > { %9933 = vmatprep.subr.bf16.mxu1 %v9932_v28 }
 0x3ae   : > { %9935 = vmatpush3.bf16.msra.mxu1 %v9932_v28 }
 0x444   : > { %v8907_v32 = vpop.f32.mrb[64].mxu1  ;;  %v8951_v29 = vpop.f32.mrb[80].mxu0 }
 0x445   : > { %v1639_v31 = vpop.f32.mrb[65].mxu1  ;;  %v1753_v30 = vpop.f32.mrb[81].mxu0 }
 0x446   : > { %2023 = vmatprep.mubr.f32.mxu0 %v1753_v30 }
 0x447   : > { %2024 = vmatmul.mubr.f32.vlgmr.msra.gmra.mrb[88].mxu0 %v1639_v31 }
 0x448   : > { %2028 = vmatprep.mubr.f32.mxu0 %v8951_v29  ;;  %v8954_v45 = vpop.f32.mrb[82].mxu0  ;;  %v8910_v54 = vpop.f32.mrb[66].mxu1 }
 0x449   : > { %v1763_v33 = vpop.f32.mrb[83].mxu0  ;;  %v1649_v44 = vpop.f32.mrb[67].mxu1 }
 0x44b   : > { %2029 = vmatmul.mubr.f32.gmra.mrb[90].mxu0 %v8907_v32 }
 0x44c   : > { %2033 = vmatprep.mubr.f32.mxu0 %v1763_v33  ;;  %v8957_v34 = vpop.f32.mrb[84].mxu0  ;;  %v8913_v37 = vpop.f32.mrb[68].mxu1 }
 0x44d   : > { %v1773_v38 = vpop.f32.mrb[85].mxu0  ;;  %v1659_v60 = vpop.f32.mrb[69].mxu1 }
 0x44f   : > { %2034 = vmatmul.mubr.f32.gmra.mrb[92].mxu0 %v1649_v44 }
 0x450   : > { %2038 = vmatprep.mubr.f32.mxu0 %v8954_v45  ;;  %v8960_v39 = vpop.f32.mrb[86].mxu0  ;;  %v8916_v57 = vpop.f32.mrb[70].mxu1 }
 0x451   : > { %v1783_v40 = vpop.f32.mrb[87].mxu0  ;;  %v1669_v2 = vpop.f32.mrb[71].mxu1 }
 0x453   : > { %2039 = vmatmul.mubr.f32.gmra.mrb[94].mxu0 %v8910_v54 }
 0x454   : > { %2043 = vmatprep.mubr.f32.mxu0 %v1773_v38 }
 0x457   : > { %2044 = vmatmul.mubr.f32.gmra.mrb[96].mxu0 %v1659_v60 }
 0x458   : > { %2048 = vmatprep.mubr.f32.mxu0 %v8957_v34 }
 0x45b   : > { %2049 = vmatmul.mubr.f32.gmra.mrb[98].mxu0 %v8913_v37 }
 0x45c   : > { %2053 = vmatprep.mubr.f32.mxu0 %v1783_v40 }
 0x45f   : > { %2054 = vmatmul.mubr.f32.gmra.mrb[100].mxu0 %v1669_v2 }
 0x460   : > { %2058 = vmatprep.mubr.f32.mxu0 %v8960_v39 }
 0x463   : > { %2059 = vmatmul.mubr.f32.gmra.mrb[102].mxu0 %v8916_v57 }
 0x464   : > { %v8995_v3 = vpop.f32.mrb[72].mxu1  ;;  %9087 = vmatprep.mubr.msk.f32.mxu0 %vm1168_vm1, %v2279_v49 }
 0x465   : > { %v1867_v46 = vpop.f32.mrb[73].mxu1 }
 0x466   : > { %9037 = vmatprep.mubr.f32.mxu1 %v1867_v46 }
 0x467   : > { %9038 = vmatmul.mubr.f32.vlgmr.msra.gmra.mrb[80].mxu1 %v8995_v3 }
 0x468   : > { %v8998_v1 = vpop.f32.mrb[74].mxu1 }
 0x469   : > { %v1877_v47 = vpop.f32.mrb[75].mxu1 }
 0x46a   : > { %9040 = vmatprep.mubr.f32.mxu1 %v1877_v47 }
 0x46b   : > { %9041 = vmatmul.mubr.f32.gmra.mrb[82].mxu1 %v8998_v1 }
 0x46c   : > { %v9001_v10 = vpop.f32.mrb[76].mxu1 }
 0x46d   : > { %v1887_v48 = vpop.f32.mrb[77].mxu1 }
 0x46e   : > { %9043 = vmatprep.mubr.f32.mxu1 %v1887_v48  ;;  %v2498_v48 = vld [vmem:[#allocation8 + $0x80] sm:$0xff] }
 0x46f   : > { %9044 = vmatmul.mubr.f32.gmra.mrb[84].mxu1 %v9001_v10 }
 0x470   : > { %v9004_v9 = vpop.f32.mrb[78].mxu1 }
 0x471   : > { %v1897_v7 = vpop.f32.mrb[79].mxu1 }
 0x472   : > { %9046 = vmatprep.mubr.f32.mxu1 %v1897_v7 }
 0x473   : > { %9047 = vmatmul.mubr.f32.gmra.mrb[86].mxu1 %v9004_v9  ;;  %v2499_v9 = vld [vmem:[#allocation8 + $0x88] sm:$0xff] }
 0x474   : > { %9065 = vmatprep.mubr.msk.f32.mxu1 %vm1168_vm1, %v2177_v15  ;;  %v9984_v15 = vpack.c.bf16 %v2499_v9, %v2498_v48  ;;  %v2512_v48 = vld [vmem:[#allocation8 + $0xf0] sm:$0xff]  ;;  %v2513_v9 = vld [vmem:[#allocation8 + $0xf8] sm:$0xff] }
 0x51a   : > { %v8385_v55 = vpop.f32.mrb[88].mxu0 }
 0x51b   : > { %v8386_v24 = vpop.f32.mrb[89].mxu0 }
 0x51c   : > { %v8387_v23 = vadd.f32 %v8386_v24, %v8385_v55  ;;  %v2482_v55 = vld [vmem:[#allocation8] sm:$0xff]  ;;  %v2483_v24 = vld [vmem:[#allocation8 + $0x8] sm:$0xff] }
 0x51e   : > { %v8388_v52 = vpop.f32.mrb[90].mxu0  ;;  %v2026_v59 = vadd.f32 %v8387_v23, %v7753_v25  ;;  %v2280_v23 = vld [vmem:[#allocation7 + $0x28] sm:$0xff] }
 0x51f   : > { %v8389_v56 = vpop.f32.mrb[91].mxu0 }
 0x520   : > { %v8390_v36 = vadd.f32 %v8389_v56, %v8388_v52  ;;  %v2178_v52 = vld [vmem:[#allocation7 + $0x8] sm:$0xff]  ;;  %v2281_v56 = vld [vmem:[#allocation7 + $0x30] sm:$0xff] }
 0x522   : > { %v8391_v16 = vpop.f32.mrb[92].mxu0  ;;  %v2031_v43 = vadd.f32 %v8390_v36, %v7753_v25  ;;  %v2179_v36 = vld [vmem:[#allocation7 + $0x10] sm:$0xff] }
 0x523   : > { %v8392_v61 = vpop.f32.mrb[93].mxu0 }
 0x524   : > { %v8393_v35 = vadd.f32 %v8392_v61, %v8391_v16  ;;  %v9986_v16 = vpack.c.bf16 %v2483_v24, %v2482_v55  ;;  %v2500_v61 = vld [vmem:[#allocation8 + $0x90] sm:$0xff]  ;;  %v2497_v24 = vld [vmem:[#allocation8 + $0x78] sm:$0xff] }
 0x525   : > { %v2496_v55 = vld [vmem:[#allocation8 + $0x70] sm:$0xff] }
 0x526   : > { %v8394_v62 = vpop.f32.mrb[94].mxu0  ;;  %v2036_v26 = vadd.f32 %v8393_v35, %v7753_v25  ;;  %v2501_v35 = vld [vmem:[#allocation8 + $0x98] sm:$0xff] }
 0x527   : > { %v8395_v41 = vpop.f32.mrb[95].mxu0 }
 0x528   : > { %v8396_v53 = vadd.f32 %v8395_v41, %v8394_v62  ;;  %v2282_v62 = vld [vmem:[#allocation7 + $0x38] sm:$0xff]  ;;  %v2484_v41 = vld [vmem:[#allocation8 + $0x10] sm:$0xff] }
 0x52a   : > { %v8397_v42 = vpop.f32.mrb[96].mxu0  ;;  %v2041_v22 = vadd.f32 %v8396_v53, %v7753_v25  ;;  %v2485_v53 = vld [vmem:[#allocation8 + $0x18] sm:$0xff] }
 0x52b   : > { %v8398_v63 = vpop.f32.mrb[97].mxu0 }
 0x52c   : > { %v8399_v0 = vadd.f32 %v8398_v63, %v8397_v42  ;;  %v2180_v42 = vld [vmem:[#allocation7 + $0x18] sm:$0xff]  ;;  %v2502_v63 = vld [vmem:[#allocation8 + $0xa0] sm:$0xff] }
 0x52e   : > { %v8400_v50 = vpop.f32.mrb[98].mxu0  ;;  %v2046_v33 = vadd.f32 %v8399_v0, %v7753_v25  ;;  %v2503_v0 = vld [vmem:[#allocation8 + $0xa8] sm:$0xff] }
 0x52f   : > { %v8401_v4 = vpop.f32.mrb[99].mxu0 }
 0x530   : > { %v8402_v5 = vadd.f32 %v8401_v4, %v8400_v50  ;;  %v2381_v50 = vld [vmem:[#allocation7 + $0x40] sm:$0xff]  ;;  %v9988_v4 = vpack.c.bf16 %v2501_v35, %v2500_v61  ;;  %v2525_v61 = vld [vmem:[#allocation8 + $0x158] sm:$0xff] }
 0x532   : > { %v8403_v8 = vpop.f32.mrb[100].mxu0  ;;  %v2051_v30 = vadd.f32 %v8402_v5, %v7753_v25  ;;  %v9990_v5 = vpack.c.bf16 %v2485_v53, %v2484_v41  ;;  %v2527_v41 = vld [vmem:[#allocation8 + $0x168] sm:$0xff] }
 0x533   : > { %v8404_v11 = vpop.f32.mrb[101].mxu0 }
 0x534   : > { %v8405_v27 = vadd.f32 %v8404_v11, %v8403_v8  ;;  %v9992_v8 = vpack.c.bf16 %v2503_v0, %v2502_v63  ;;  %v2486_v11 = vld [vmem:[#allocation8 + $0x20] sm:$0xff]  ;;  %v2529_v63 = vld [vmem:[#allocation8 + $0x178] sm:$0xff] }
 0x536   : > { %v8406_v12 = vpop.f32.mrb[102].mxu0  ;;  %v2056_v2 = vadd.f32 %v8405_v27, %v7753_v25  ;;  %v2487_v27 = vld [vmem:[#allocation8 + $0x28] sm:$0xff] }
 0x537   : > { %v8407_v13 = vpop.f32.mrb[103].mxu0 }
 0x538   : > { %v8408_v14 = vadd.f32 %v8407_v13, %v8406_v12  ;;  %v2504_v12 = vld [vmem:[#allocation8 + $0xb0] sm:$0xff]  ;;  %v2505_v13 = vld [vmem:[#allocation8 + $0xb8] sm:$0xff] }
 0x53a   : > { %v9039_v17 = vpop.f32.mrb[80].mxu1  ;;  %v2061_v39 = vadd.f32 %v8408_v14, %v7753_v25  ;;  %v9994_v25 = vpack.c.bf16 %v2487_v27, %v2486_v11  ;;  %v2514_v14 = vld [vmem:[#allocation8 + $0x100] sm:$0xff] }
 0x53b   : > { %v2136_v20 = vadd.f32 %v9039_v17, %v2031_v43  ;;  %v2130_v58 = vpop.f32.mrb[81].mxu1  ;;  %v2515_v43 = vld [vmem:[#allocation8 + $0x108] sm:$0xff]  ;;  %v9996_v17 = vpack.c.bf16 %v2505_v13, %v2504_v12 }
 0x53c   : > { %v2131_v51 = vadd.f32 %v2130_v58, %v2026_v59  ;;  %v2488_v59 = vld [vmem:[#allocation8 + $0x30] sm:$0xff]  ;;  %v2506_v58 = vld [vmem:[#allocation8 + $0xc0] sm:$0xff] }
 0x53d   : > { %v2170_v21 = vmax.f32 %v2136_v20, 0.0  ;;  %v2489_v20 = vld [vmem:[#allocation8 + $0x38] sm:$0xff] }
 0x53e   : > { %v2169_v6 = vmax.f32 %v2131_v51, 0.0  ;;  %v9042_v19 = vpop.f32.mrb[82].mxu1  ;;  %v2507_v51 = vld [vmem:[#allocation8 + $0xc8] sm:$0xff] }
 0x53f   : > { %v2146_v18 = vadd.f32 %v9042_v19, %v2041_v22  ;;  %v2140_v28 = vpop.f32.mrb[83].mxu1  ;;  %v9998_v22 = vpack.c.bf16 %v2489_v20, %v2488_v59  ;;  %v2517_v19 = vld [vmem:[#allocation8 + $0x118] sm:$0xff]  ;;  %v2709_v59 = vld [vmem:[#allocation10] sm:$0xff]  ;;  %v2793_v20 = vld [vmem:[#allocation10 + $0x10] sm:$0xff] }
 0x540   : > { %v9936_v32 = vpack.c.bf16 %v2170_v21, %v2169_v6  ;;  %v2141_v29 = vadd.f32 %v2140_v28, %v2036_v26  ;;  %v10016_v21 = vpack.c.bf16 %v2515_v43, %v2514_v14  ;;  %v2516_v6 = vld [vmem:[#allocation8 + $0x110] sm:$0xff]  ;;  %v10000_v26 = vpack.c.bf16 %v2507_v51, %v2506_v58  ;;  %v2491_v28 = vld [vmem:[#allocation8 + $0x48] sm:$0xff] }
 0x541   : > { %v2172_v31 = vmax.f32 %v2146_v18, 0.0  ;;  %v2490_v18 = vld [vmem:[#allocation8 + $0x40] sm:$0xff] }
 0x542   : > { %v2171_v45 = vmax.f32 %v2141_v29, 0.0  ;;  %v9045_v54 = vpop.f32.mrb[84].mxu1  ;;  %9937 = vmatprep.subr.bf16.mxu1 %v9936_v32  ;;  %9953 = vmatprep.subr.bf16.mxu0 %v9936_v32  ;;  %v2508_v29 = vld [vmem:[#allocation8 + $0xd0] sm:$0xff] }
 0x543   : > { %v2156_v44 = vadd.f32 %v9045_v54, %v2051_v30  ;;  %v2150_v34 = vpop.f32.mrb[85].mxu1  ;;  %9939 = vmatpush3.bf16.msra.mxu1 %v9936_v32  ;;  %9955 = vmatpush3.bf16.msra.mxu0 %v9936_v32  ;;  %v2383_v30 = vld [vmem:[#allocation7 + $0x50] sm:$0xff]  ;;  %v10002_v54 = vpack.c.bf16 %v2491_v28, %v2490_v18 }
 0x544   : > { %v9940_v37 = vpack.c.bf16 %v2172_v31, %v2171_v45  ;;  %v2151_v38 = vadd.f32 %v2150_v34, %v2046_v33  ;;  %v2509_v31 = vld [vmem:[#allocation8 + $0xd8] sm:$0xff]  ;;  %v10020_v45 = vpack.c.bf16 %v2517_v19, %v2516_v6  ;;  %v2518_v33 = vld [vmem:[#allocation8 + $0x120] sm:$0xff] }
 0x545   : > { %v2174_v60 = vmax.f32 %v2156_v44, 0.0  ;;  %v2519_v44 = vld [vmem:[#allocation8 + $0x128] sm:$0xff]  ;;  %v10004_v34 = vpack.c.bf16 %v2509_v31, %v2508_v29  ;;  %v7766_v31 = vld [vmem:[%s13429_s9 + $0x2] ss:$0 sm:$0xff] }
 0x546   : > { %v2173_v57 = vmax.f32 %v2151_v38, 0.0  ;;  %v9048_v40 = vpop.f32.mrb[86].mxu1  ;;  %9941 = vmatprep.subr.bf16.mxu1 %v9940_v37  ;;  %9957 = vmatprep.subr.bf16.mxu0 %v9940_v37  ;;  %v2493_v38 = vld [vmem:[#allocation8 + $0x58] sm:$0xff] }
 0x547   : > { %v2166_v3 = vadd.f32 %v9048_v40, %v2061_v39  ;;  %v2160_v46 = vpop.f32.mrb[87].mxu1  ;;  %9943 = vmatpush3.bf16.msra.mxu1 %v9940_v37  ;;  %9959 = vmatpush3.bf16.msra.mxu0 %v9940_v37  ;;  %v2510_v39 = vld [vmem:[#allocation8 + $0xe0] sm:$0xff]  ;;  %v10024_v40 = vpack.c.bf16 %v2519_v44, %v2518_v33 }
 0x548   : > { %v9944_v1 = vpack.c.bf16 %v2174_v60, %v2173_v57  ;;  %v2161_v47 = vadd.f32 %v2160_v46, %v2056_v2  ;;  %v2384_v60 = vld [vmem:[#allocation7 + $0x58] sm:$0xff]  ;;  %v2511_v57 = vld [vmem:[#allocation8 + $0xe8] sm:$0xff] }
 0x549   : > { %v2176_v10 = vmax.f32 %v2166_v3, 0.0  ;;  %v2520_v3 = vld [vmem:[#allocation8 + $0x130] sm:$0xff]  ;;  %v2521_v46 = vld [vmem:[#allocation8 + $0x138] sm:$0xff] }
 0x54a   : > { %v2175_v7 = vmax.f32 %v2161_v47, 0.0  ;;  %9945 = vmatprep.subr.bf16.mxu1 %v9944_v1  ;;  %9961 = vmatprep.subr.bf16.mxu0 %v9944_v1  ;;  %v2494_v47 = vld [vmem:[#allocation8 + $0x60] sm:$0xff] }
 0x54b   : > { %9947 = vmatpush3.bf16.msra.mxu1 %v9944_v1  ;;  %9963 = vmatpush3.bf16.msra.mxu0 %v9944_v1 }
 0x54c   : > { %v12130_v49 = vpack.c.bf16 %v2176_v10, %v2175_v7  ;;  %v2495_v10 = vld [vmem:[#allocation8 + $0x68] sm:$0xff]  ;;  %v10028_v7 = vpack.c.bf16 %v2521_v46, %v2520_v3 }
 0x54e   : > { %9949 = vmatprep.subr.bf16.mxu1 %v12130_v49  ;;  %9965 = vmatprep.subr.bf16.mxu0 %v12130_v49 }
 0x54f   : > { %9951 = vmatpush3.bf16.msra.mxu1 %v12130_v49  ;;  %9967 = vmatpush3.bf16.msra.mxu0 %v12130_v49 }
 0x550   : > { %9969 = vmatprep.subr.bf16.mxu1 %v9936_v32  ;;  %9985 = vmatprep.subr.bf16.mxu0 %v9984_v15  ;;  %v10012_v15 = vpack.c.bf16 %v2513_v9, %v2512_v48  ;;  %v2977_v48 = vld [vmem:[%s13428_s8 + $0x88] sm:$0xff] }
 0x552   : > { %9088 = vmatmul.mubr.msk.f32.vlgmr.msra.gmra.mrb[104].mxu0 %vm1168_vm1, %v2280_v23  ;;  %9066 = vmatmul.mubr.msk.f32.vlgmr.msra.gmra.mrb[88].mxu1 %vm1168_vm1, %v2178_v52  ;;  %v10014_v23 = vpack.c.bf16 %v2497_v24, %v2496_v55  ;;  %v2522_v52 = vld [vmem:[#allocation8 + $0x140] sm:$0xff]  ;;  %v2961_v55 = vld [vmem:[%s13428_s8 + $0x8] sm:$0xff]  ;;  %v2978_v24 = vld [vmem:[%s13428_s8 + $0x90] sm:$0xff] }
 0x553   : > { %9971 = vmatpush3.bf16.msra.mxu1 %v9936_v32  ;;  %9090 = vmatprep.mubr.msk.f32.mxu0 %vm1168_vm1, %v2281_v56  ;;  %v2382_v32 = vld [vmem:[#allocation7 + $0x48] sm:$0xff] }
 0x554   : > { %9973 = vmatprep.subr.bf16.mxu1 %v9940_v37  ;;  %9068 = vmatprep.mubr.msk.f32.mxu1 %vm1168_vm1, %v2179_v36  ;;  %v2523_v56 = vld [vmem:[#allocation8 + $0x148] sm:$0xff] }
 0x555   : > { %9987 = vmatpush3.bf16.msra.mxu0 %v9986_v16  ;;  %v10032_v36 = vpack.c.bf16 %v2523_v56, %v2522_v52  ;;  %v2524_v16 = vld [vmem:[#allocation8 + $0x150] sm:$0xff]  ;;  %v2710_v52 = vld [vmem:[#allocation10 + $0x8] sm:$0xff]  ;;  %v2794_v56 = vld [vmem:[#allocation10 + $0x18] sm:$0xff] }
 0x556   : > { %9091 = vmatmul.mubr.msk.f32.gmra.mrb[106].mxu0 %vm1168_vm1, %v2282_v62  ;;  %9069 = vmatmul.mubr.msk.f32.gmra.mrb[90].mxu1 %vm1168_vm1, %v2180_v42  ;;  %v10036_v35 = vpack.c.bf16 %v2525_v61, %v2524_v16  ;;  %v2526_v62 = vld [vmem:[#allocation8 + $0x160] sm:$0xff]  ;;  %v2528_v42 = vld [vmem:[#allocation8 + $0x170] sm:$0xff] }
 0x557   : > { %9975 = vmatpush3.bf16.msra.mxu1 %v9940_v37  ;;  %9109 = vmatprep.mubr.msk.f32.mxu1 %vm1168_vm1, %v2381_v50  ;;  %v2492_v37 = vld [vmem:[#allocation8 + $0x50] sm:$0xff]  ;;  %v10040_v53 = vpack.c.bf16 %v2527_v41, %v2526_v62  ;;  %v10044_v0 = vpack.c.bf16 %v2529_v63, %v2528_v42  ;;  %v2963_v62 = vld [vmem:[%s13428_s8 + $0x18] sm:$0xff]  ;;  %v2992_v41 = vld [vmem:[%s13428_s8 + $0x100] sm:$0xff] }
 0x558   : > { %9977 = vmatprep.subr.bf16.mxu1 %v9944_v1  ;;  %9989 = vmatprep.subr.bf16.mxu0 %v9988_v4  ;;  %v10006_v2 = vpack.c.bf16 %v2493_v38, %v2492_v37  ;;  %v2962_v61 = vld [vmem:[%s13428_s8 + $0x10] sm:$0xff]  ;;  %v2980_v42 = vld [vmem:[%s13428_s8 + $0xa0] sm:$0xff]  ;;  %v2981_v63 = vld [vmem:[%s13428_s8 + $0xa8] sm:$0xff] }
 0x559   : > { %9991 = vmatpush3.bf16.msra.mxu0 %v9990_v5 }
 0x55a   : > { %9993 = vmatprep.subr.bf16.mxu0 %v9992_v8 }
 0x55b   : > { %9979 = vmatpush3.bf16.msra.mxu1 %v9944_v1  ;;  %v10008_v1 = vpack.c.bf16 %v2511_v57, %v2510_v39 }
 0x55c   : > { %9981 = vmatprep.subr.bf16.mxu1 %v12130_v49 }
 0x55d   : > { %9995 = vmatpush3.bf16.msra.mxu0 %v9994_v25 }
 0x55e   : > { %9997 = vmatprep.subr.bf16.mxu0 %v9996_v17 }
 0x55f   : > { %9983 = vmatpush3.bf16.msra.mxu1 %v12130_v49  ;;  %v10010_v49 = vpack.c.bf16 %v2495_v10, %v2494_v47  ;;  %v2976_v10 = vld [vmem:[%s13428_s8 + $0x80] sm:$0xff] }
 0x560   : > { %10017 = vmatprep.subr.bf16.mxu1 %v10016_v21 }
 0x561   : > { %9999 = vmatpush3.bf16.msra.mxu0 %v9998_v22 }
 0x562   : > { %9110 = vmatmul.mubr.msk.f32.vlgmr.msra.gmra.mrb[92].mxu1 %vm1168_vm1, %v2382_v32  ;;  %10001 = vmatprep.subr.bf16.mxu0 %v10000_v26 }
 0x563   : > { %9112 = vmatprep.mubr.msk.f32.mxu1 %vm1168_vm1, %v2383_v30  ;;  %10019 = vmatpush3.bf16.msra.mxu1 %v10016_v21 }
 0x564   : > { %10021 = vmatprep.subr.bf16.mxu1 %v10020_v45 }
 0x565   : > { %10003 = vmatpush3.bf16.msra.mxu0 %v10002_v54 }
 0x566   : > { %9113 = vmatmul.mubr.msk.f32.gmra.mrb[94].mxu1 %vm1168_vm1, %v2384_v60  ;;  %10005 = vmatprep.subr.bf16.mxu0 %v10004_v34 }
 0x567   : > { %10023 = vmatpush3.bf16.msra.mxu1 %v10020_v45 }
 0x568   : > { %10025 = vmatprep.subr.bf16.mxu1 %v10024_v40 }
 0x569   : > { %10007 = vmatpush3.bf16.msra.mxu0 %v10006_v2 }
 0x56a   : > { %10009 = vmatprep.subr.bf16.mxu0 %v10008_v1 }
 0x56b   : > { %10027 = vmatpush3.bf16.msra.mxu1 %v10024_v40 }
 0x56c   : > { %10029 = vmatprep.subr.bf16.mxu1 %v10028_v7 }
 0x56d   : > { %10011 = vmatpush3.bf16.msra.mxu0 %v10010_v49  ;;  %v10072_v49 = vpack.c.bf16 %v2977_v48, %v2976_v10  ;;  %v2990_v10 = vld [vmem:[%s13428_s8 + $0xf0] sm:$0xff]  ;;  %v2991_v48 = vld [vmem:[%s13428_s8 + $0xf8] sm:$0xff] }
 0x56e   : > { %10013 = vmatprep.subr.bf16.mxu0 %v10012_v15  ;;  %v2960_v15 = vld [vmem:[%s13428_s8] sm:$0xff] }
 0x56f   : > { %10031 = vmatpush3.bf16.msra.mxu1 %v10028_v7  ;;  %v10074_v16 = vpack.c.bf16 %v2961_v55, %v2960_v15  ;;  %v2974_v15 = vld [vmem:[%s13428_s8 + $0x70] sm:$0xff]  ;;  %v2975_v55 = vld [vmem:[%s13428_s8 + $0x78] sm:$0xff] }
 0x570   : > { %10033 = vmatprep.subr.bf16.mxu1 %v10032_v36 }
 0x571   : > { %10015 = vmatpush3.bf16.msra.mxu0 %v10014_v23  ;;  %v2979_v23 = vld [vmem:[%s13428_s8 + $0x98] sm:$0xff] }
 0x573   : > { %10035 = vmatpush3.bf16.msra.mxu1 %v10032_v36  ;;  %v2877_v36 = vld [vmem:[#allocation10 + $0x20] sm:$0xff] }
 0x574   : > { %10037 = vmatprep.subr.bf16.mxu1 %v10036_v35 }
 0x577   : > { %10039 = vmatpush3.bf16.msra.mxu1 %v10036_v35  ;;  %v10076_v35 = vpack.c.bf16 %v2979_v23, %v2978_v24  ;;  %v10102_v24 = vpack.c.bf16 %v2975_v55, %v2974_v15  ;;  %v3004_v23 = vld [vmem:[%s13428_s8 + $0x160] sm:$0xff] }
 0x578   : > { %10041 = vmatprep.subr.bf16.mxu1 %v10040_v53 }
 0x57b   : > { %10043 = vmatpush3.bf16.msra.mxu1 %v10040_v53  ;;  %v2993_v53 = vld [vmem:[%s13428_s8 + $0x108] sm:$0xff] }
 0x57c   : > { %10045 = vmatprep.subr.bf16.mxu1 %v10044_v0 }
 0x57f   : > { %10047 = vmatpush3.bf16.msra.mxu1 %v10044_v0  ;;  %v10078_v0 = vpack.c.bf16 %v2963_v62, %v2962_v61 }
 0x625   : > { %v9089_v50 = vpop.f32.mrb[104].mxu0  ;;  %v9067_v4 = vpop.f32.mrb[88].mxu1 }
 0x626   : > { %v2361_v5 = vpop.f32.mrb[105].mxu0  ;;  %v2259_v8 = vpop.f32.mrb[89].mxu1 }
 0x627   : > { %2599 = vmatprep.mubr.f32.mxu0 %v2361_v5  ;;  %v10080_v5 = vpack.c.bf16 %v2981_v63, %v2980_v42 }
 0x628   : > { %2600 = vmatmul.mubr.f32.vlgmr.msra.gmra.mrb[108].mxu0 %v2259_v8  ;;  %v2965_v8 = vld [vmem:[%s13428_s8 + $0x28] sm:$0xff] }
 0x629   : > { %2604 = vmatprep.mubr.f32.mxu0 %v9089_v50  ;;  %v9092_v11 = vpop.f32.mrb[106].mxu0  ;;  %v9070_v27 = vpop.f32.mrb[90].mxu1  ;;  %v10104_v50 = vpack.c.bf16 %v2993_v53, %v2992_v41 }
 0x62a   : > { %v2371_v12 = vpop.f32.mrb[107].mxu0  ;;  %v2269_v13 = vpop.f32.mrb[91].mxu1 }
 0x62c   : > { %2605 = vmatmul.mubr.f32.gmra.mrb[110].mxu0 %v9067_v4  ;;  %v2964_v4 = vld [vmem:[%s13428_s8 + $0x20] sm:$0xff] }
 0x62d   : > { %2609 = vmatprep.mubr.f32.mxu0 %v2371_v12  ;;  %v2982_v12 = vld [vmem:[%s13428_s8 + $0xb0] sm:$0xff] }
 0x630   : > { %2610 = vmatmul.mubr.f32.gmra.mrb[112].mxu0 %v2269_v13  ;;  %v2983_v13 = vld [vmem:[%s13428_s8 + $0xb8] sm:$0xff] }
 0x631   : > { %2614 = vmatprep.mubr.f32.mxu0 %v9092_v11  ;;  %v2994_v11 = vld [vmem:[%s13428_s8 + $0x110] sm:$0xff] }
 0x634   : > { %2615 = vmatmul.mubr.f32.gmra.mrb[114].mxu0 %v9070_v27  ;;  %v2995_v27 = vld [vmem:[%s13428_s8 + $0x118] sm:$0xff] }
 0x635   : > { %v9111_v25 = vpop.f32.mrb[92].mxu1  ;;  %9172 = vmatprep.mubr.msk.f32.mxu0 %vm1226_vm0, %v2793_v20  ;;  %v2967_v20 = vld [vmem:[%s13428_s8 + $0x38] sm:$0xff] }
 0x636   : > { %v2463_v14 = vpop.f32.mrb[93].mxu1 }
 0x637   : > { %9147 = vmatprep.mubr.f32.mxu1 %v2463_v14  ;;  %v10082_v14 = vpack.c.bf16 %v2965_v8, %v2964_v4  ;;  %v3184_v8 = vld [vmem:[%s13430_s10 + $0x48] sm:$0xff] }
 0x638   : > { %9148 = vmatmul.mubr.f32.vlgmr.msra.gmra.mrb[96].mxu1 %v9111_v25  ;;  %v2878_v25 = vld [vmem:[#allocation10 + $0x28] sm:$0xff] }
 0x639   : > { %v9114_v43 = vpop.f32.mrb[94].mxu1 }
 0x63a   : > { %v2473_v17 = vpop.f32.mrb[95].mxu1 }
 0x63b   : > { %9150 = vmatprep.mubr.f32.mxu1 %v2473_v17  ;;  %v2966_v17 = vld [vmem:[%s13428_s8 + $0x30] sm:$0xff] }
 0x63c   : > { %9151 = vmatmul.mubr.f32.gmra.mrb[98].mxu1 %v9114_v43  ;;  %v10108_v43 = vpack.c.bf16 %v2995_v27, %v2994_v11 }
 0x63d   : > { %9161 = vmatprep.mubr.msk.f32.mxu1 %vm1226_vm0, %v2709_v59  ;;  %v10084_v59 = vpack.c.bf16 %v2983_v13, %v2982_v12 }
 0x6fb   : > { %v8501_v58 = vpop.f32.mrb[108].mxu0 }
 0x6fc   : > { %v8502_v51 = vpop.f32.mrb[109].mxu0 }
 0x6fd   : > { %v8503_v21 = vadd.f32 %v8502_v51, %v8501_v58  ;;  %v2996_v58 = vld [vmem:[%s13428_s8 + $0x120] sm:$0xff]  ;;  %v2997_v51 = vld [vmem:[%s13428_s8 + $0x128] sm:$0xff] }
 0x6ff   : > { %v8504_v22 = vpop.f32.mrb[110].mxu0  ;;  %v2602_v33 = vadd.f32 %v8503_v21, %v7766_v31  ;;  %v2984_v21 = vld [vmem:[%s13428_s8 + $0xc0] sm:$0xff] }
 0x700   : > { %v8505_v6 = vpop.f32.mrb[111].mxu0 }
 0x701   : > { %v8506_v19 = vadd.f32 %v8505_v6, %v8504_v22  ;;  %v2985_v22 = vld [vmem:[%s13428_s8 + $0xc8] sm:$0xff]  ;;  %v10086_v6 = vpack.c.bf16 %v2967_v20, %v2966_v17 }
 0x703   : > { %v8507_v26 = vpop.f32.mrb[112].mxu0  ;;  %v2607_v45 = vadd.f32 %v8506_v19, %v7766_v31  ;;  %v10112_v19 = vpack.c.bf16 %v2997_v51, %v2996_v58 }
 0x704   : > { %v8508_v18 = vpop.f32.mrb[113].mxu0 }
 0x705   : > { %v8509_v28 = vadd.f32 %v8508_v18, %v8507_v26  ;;  %v2968_v26 = vld [vmem:[%s13428_s8 + $0x40] sm:$0xff]  ;;  %v10088_v18 = vpack.c.bf16 %v2985_v22, %v2984_v21 }
 0x707   : > { %v8510_v32 = vpop.f32.mrb[114].mxu0  ;;  %v2612_v40 = vadd.f32 %v8509_v28, %v7766_v31  ;;  %v2969_v28 = vld [vmem:[%s13428_s8 + $0x48] sm:$0xff] }
 0x708   : > { %v8511_v29 = vpop.f32.mrb[115].mxu0 }
 0x709   : > { %v8512_v30 = vadd.f32 %v8511_v29, %v8510_v32  ;;  %v2998_v32 = vld [vmem:[%s13428_s8 + $0x130] sm:$0xff]  ;;  %v2999_v29 = vld [vmem:[%s13428_s8 + $0x138] sm:$0xff] }
 0x70b   : > { %v9149_v54 = vpop.f32.mrb[96].mxu1  ;;  %v2617_v60 = vadd.f32 %v8512_v30, %v7766_v31  ;;  %v2986_v31 = vld [vmem:[%s13428_s8 + $0xd0] sm:$0xff]  ;;  %v2987_v30 = vld [vmem:[%s13428_s8 + $0xd8] sm:$0xff] }
 0x70c   : > { %v2692_v44 = vadd.f32 %v9149_v54, %v2607_v45  ;;  %v2686_v34 = vpop.f32.mrb[97].mxu1  ;;  %v10090_v45 = vpack.c.bf16 %v2969_v28, %v2968_v26  ;;  %v10116_v54 = vpack.c.bf16 %v2999_v29, %v2998_v32  ;;  %v3175_v29 = vld [vmem:[%s13430_s10 + $0x10] sm:$0xff] }
 0x70d   : > { %v2687_v37 = vadd.f32 %v2686_v34, %v2602_v33  ;;  %v2970_v33 = vld [vmem:[%s13428_s8 + $0x50] sm:$0xff]  ;;  %v2971_v34 = vld [vmem:[%s13428_s8 + $0x58] sm:$0xff] }
 0x70e   : > { %v2706_v38 = vmax.f32 %v2692_v44, 0.0  ;;  %v10092_v44 = vpack.c.bf16 %v2987_v30, %v2986_v31  ;;  %v3176_v31 = vld [vmem:[%s13430_s10 + $0x18] sm:$0xff] }
 0x70f   : > { %v2705_v39 = vmax.f32 %v2687_v37, 0.0  ;;  %v9152_v57 = vpop.f32.mrb[98].mxu1  ;;  %v3000_v37 = vld [vmem:[%s13428_s8 + $0x140] sm:$0xff] }
 0x710   : > { %v2702_v2 = vadd.f32 %v9152_v57, %v2617_v60  ;;  %v2696_v3 = vpop.f32.mrb[99].mxu1  ;;  %v2988_v60 = vld [vmem:[%s13428_s8 + $0xe0] sm:$0xff]  ;;  %v10094_v57 = vpack.c.bf16 %v2971_v34, %v2970_v33 }
 0x711   : > { %v10048_v46 = vpack.c.bf16 %v2706_v38, %v2705_v39  ;;  %v2697_v1 = vadd.f32 %v2696_v3, %v2612_v40  ;;  %v3001_v38 = vld [vmem:[%s13428_s8 + $0x148] sm:$0xff] }
 0x712   : > { %v2708_v47 = vmax.f32 %v2702_v2, 0.0  ;;  %v2989_v39 = vld [vmem:[%s13428_s8 + $0xe8] sm:$0xff]  ;;  %v10120_v40 = vpack.c.bf16 %v3001_v38, %v3000_v37  ;;  %v2972_v2 = vld [vmem:[%s13428_s8 + $0x60] sm:$0xff] }
 0x713   : > { %v2707_v9 = vmax.f32 %v2697_v1, 0.0  ;;  %10049 = vmatprep.subr.bf16.mxu1 %v10048_v46  ;;  %10057 = vmatprep.subr.bf16.mxu0 %v10048_v46  ;;  %v10096_v3 = vpack.c.bf16 %v2989_v39, %v2988_v60  ;;  %v3002_v1 = vld [vmem:[%s13428_s8 + $0x150] sm:$0xff] }
 0x714   : > { %10051 = vmatpush3.bf16.msra.mxu1 %v10048_v46  ;;  %10059 = vmatpush3.bf16.msra.mxu0 %v10048_v46 }
 0x715   : > { %v10052_v7 = vpack.c.bf16 %v2708_v47, %v2707_v9  ;;  %v3003_v47 = vld [vmem:[%s13428_s8 + $0x158] sm:$0xff] }
 0x717   : > { %10053 = vmatprep.subr.bf16.mxu1 %v10052_v7  ;;  %10061 = vmatprep.subr.bf16.mxu0 %v10052_v7 }
 0x718   : > { %10055 = vmatpush3.bf16.msra.mxu1 %v10052_v7  ;;  %10063 = vmatpush3.bf16.msra.mxu0 %v10052_v7 }
 0x719   : > { %10065 = vmatprep.subr.bf16.mxu1 %v10048_v46  ;;  %10073 = vmatprep.subr.bf16.mxu0 %v10072_v49  ;;  %v10100_v49 = vpack.c.bf16 %v2991_v48, %v2990_v10 }
 0x71b   : > { %9162 = vmatmul.mubr.msk.f32.vlgmr.msra.gmra.mrb[100].mxu1 %vm1226_vm0, %v2710_v52  ;;  %9173 = vmatmul.mubr.msk.f32.vlgmr.msra.gmra.mrb[116].mxu0 %vm1226_vm0, %v2794_v56  ;;  %v3005_v52 = vld [vmem:[%s13428_s8 + $0x168] sm:$0xff] }
 0x71c   : > { %10067 = vmatpush3.bf16.msra.mxu1 %v10048_v46  ;;  %9183 = vmatprep.mubr.msk.f32.mxu1 %vm1226_vm0, %v2877_v36  ;;  %v2973_v46 = vld [vmem:[%s13428_s8 + $0x68] sm:$0xff]  ;;  %v10128_v56 = vpack.c.bf16 %v3005_v52, %v3004_v23  ;;  %v3006_v36 = vld [vmem:[%s13428_s8 + $0x170] sm:$0xff] }
 0x71d   : > { %10069 = vmatprep.subr.bf16.mxu1 %v10052_v7  ;;  %10075 = vmatpush3.bf16.msra.mxu0 %v10074_v16  ;;  %v10098_v9 = vpack.c.bf16 %v2973_v46, %v2972_v2  ;;  %v3007_v16 = vld [vmem:[%s13428_s8 + $0x178] sm:$0xff] }
 0x71e   : > { %10077 = vmatprep.subr.bf16.mxu0 %v10076_v35  ;;  %v10132_v61 = vpack.c.bf16 %v3007_v16, %v3006_v36 }
 0x720   : > { %10071 = vmatpush3.bf16.msra.mxu1 %v10052_v7  ;;  %v10124_v7 = vpack.c.bf16 %v3003_v47, %v3002_v1 }
 0x721   : > { %10079 = vmatpush3.bf16.msra.mxu0 %v10078_v0  ;;  %10105 = vmatprep.subr.bf16.mxu1 %v10104_v50  ;;  %v3181_v0 = vld [vmem:[%s13430_s10 + $0x30] sm:$0xff] }
 0x722   : > { %10081 = vmatprep.subr.bf16.mxu0 %v10080_v5  ;;  %v3183_v5 = vld [vmem:[%s13430_s10 + $0x40] sm:$0xff] }
 0x723   : > { %9184 = vmatmul.mubr.msk.f32.vlgmr.msra.gmra.mrb[102].mxu1 %vm1226_vm0, %v2878_v25  ;;  %v10140_v11 = vpack.c.bf16 %v3184_v8, %v3183_v5 }
 0x724   : > { %10107 = vmatpush3.bf16.msra.mxu1 %v10104_v50  ;;  %v3182_v50 = vld [vmem:[%s13430_s10 + $0x38] sm:$0xff] }
 0x725   : > { %10083 = vmatpush3.bf16.msra.mxu0 %v10082_v14  ;;  %10109 = vmatprep.subr.bf16.mxu1 %v10108_v43  ;;  %v10136_v4 = vpack.c.bf16 %v3182_v50, %v3181_v0 }
 0x726   : > { %10085 = vmatprep.subr.bf16.mxu0 %v10084_v59 }
 0x728   : > { %10111 = vmatpush3.bf16.msra.mxu1 %v10108_v43  ;;  %v7773_v43 = vld [vmem:[%s13429_s9 + $0x3] ss:$0 sm:$0xff] }
 0x729   : > { %10087 = vmatpush3.bf16.msra.mxu0 %v10086_v6  ;;  %10113 = vmatprep.subr.bf16.mxu1 %v10112_v19  ;;  %v3174_v6 = vld [vmem:[%s13430_s10 + $0x8] sm:$0xff] }
 0x72a   : > { %10089 = vmatprep.subr.bf16.mxu0 %v10088_v18 }
 0x72c   : > { %10115 = vmatpush3.bf16.msra.mxu1 %v10112_v19  ;;  %v3173_v19 = vld [vmem:[%s13430_s10] sm:$0xff] }
 0x72d   : > { %10091 = vmatpush3.bf16.msra.mxu0 %v10090_v45  ;;  %10117 = vmatprep.subr.bf16.mxu1 %v10116_v54 }
 0x72e   : > { %10093 = vmatprep.subr.bf16.mxu0 %v10092_v44  ;;  %v7774_v44 = vld [vmem:[%s13430_s10 + $0x50] ss:$0 sm:$0xff] }
 0x730   : > { %10119 = vmatpush3.bf16.msra.mxu1 %v10116_v54 }
 0x731   : > { %10095 = vmatpush3.bf16.msra.mxu0 %v10094_v57  ;;  %10121 = vmatprep.subr.bf16.mxu1 %v10120_v40 }
 0x732   : > { %10097 = vmatprep.subr.bf16.mxu0 %v10096_v3 }
 0x734   : > { %10123 = vmatpush3.bf16.msra.mxu1 %v10120_v40 }
 0x735   : > { %10099 = vmatpush3.bf16.msra.mxu0 %v10098_v9  ;;  %10125 = vmatprep.subr.bf16.mxu1 %v10124_v7 }
 0x736   : > { %10101 = vmatprep.subr.bf16.mxu0 %v10100_v49 }
 0x738   : > { %10127 = vmatpush3.bf16.msra.mxu1 %v10124_v7 }
 0x739   : > { %10103 = vmatpush3.bf16.msra.mxu0 %v10102_v24  ;;  %10129 = vmatprep.subr.bf16.mxu1 %v10128_v56 }
 0x73a   : > { %10137 = vmatprep.subr.bf16.mxu0 %v10136_v4 }
 0x73c   : > { %10131 = vmatpush3.bf16.msra.mxu1 %v10128_v56 }
 0x73d   : > { %10133 = vmatprep.subr.bf16.mxu1 %v10132_v61 }
 0x740   : > { %10135 = vmatpush3.bf16.msra.mxu1 %v10132_v61 }
 0x7ee   : > { %v9174_v35 = vpop.f32.mrb[116].mxu0  ;;  %v9163_v62 = vpop.f32.mrb[100].mxu1 }
 0x7ef   : > { %v2867_v41 = vpop.f32.mrb[117].mxu0  ;;  %v2783_v53 = vpop.f32.mrb[101].mxu1 }
 0x7f0   : > { %3077 = vmatprep.mubr.f32.mxu0 %v2867_v41 }
 0x7f1   : > { %3078 = vmatmul.mubr.f32.vlgmr.msra.gmra.mrb[118].mxu0 %v2783_v53 }
 0x7f2   : > { %3082 = vmatprep.mubr.f32.mxu0 %v9174_v35  ;;  %10139 = vmatpush3.bf16.msra.mxu0 %v10136_v4 }
 0x7f3   : > { %10141 = vmatprep.subr.bf16.mxu0 %v10140_v11 }
 0x7f5   : > { %3083 = vmatmul.mubr.f32.gmra.mrb[120].mxu0 %v9163_v62 }
 0x7f6   : > { %v9185_v42 = vpop.f32.mrb[102].mxu1  ;;  %10143 = vmatpush3.bf16.msra.mxu0 %v10140_v11 }
 0x7f7   : > { %v2951_v63 = vpop.f32.mrb[103].mxu1 }
 0x7f8   : > { %9218 = vmatprep.mubr.f32.mxu1 %v2951_v63 }
 0x7f9   : > { %9219 = vmatmul.mubr.f32.vlgmr.msra.gmra.mrb[104].mxu1 %v9185_v42 }
 0x8c4   : > { %v8583_v27 = vpop.f32.mrb[118].mxu0 }
 0x8c5   : > { %v8584_v12 = vpop.f32.mrb[119].mxu0 }
 0x8c6   : > { %v8585_v13 = vadd.f32 %v8584_v12, %v8583_v27 }
 0x8c8   : > { %v8586_v25 = vpop.f32.mrb[120].mxu0  ;;  %v3080_v58 = vadd.f32 %v8585_v13, %v7773_v43 }
 0x8c9   : > { %v8587_v14 = vpop.f32.mrb[121].mxu0 }
 0x8ca   : > { %v8588_v17 = vadd.f32 %v8587_v14, %v8586_v25 }
 0x8cc   : > { %v3085_v59 = vadd.f32 %v8588_v17, %v7773_v43  ;;  %v9220_v20 = vpop.f32.mrb[104].mxu1 }
 0x8cd   : > { %v3154_v51 = vpop.f32.mrb[105].mxu1 }
 0x8ce   : > { %v3160_v21 = vadd.f32 %v9220_v20, %v3085_v59  ;;  %v3155_v22 = vadd.f32 %v3154_v51, %v3080_v58 }
 0x8d0   : > { %v3164_v26 = vmax.f32 %v3160_v21, 0.0  ;;  %v3163_v18 = vmax.f32 %v3155_v22, 0.0 }
 0x8d2   : > { %v12322_v28 = vadd.f32 %v3174_v6, %v3164_v26  ;;  %v12324_v32 = vadd.f32 %v3173_v19, %v3163_v18  ;;  %3167 = vrot.lane.b32.xlu0 %v3163_v18, %s11118_s22  ;;  %3169 = vrot.lane.b32.xlu1 %v3164_v26, %s11118_s22 }
 0x8d4   : > { %9229 = vmatprep.mubr.msk.f32.mxu0 %vm1226_vm0, %v12324_v32 }
 0x8d5   : > { %9230 = vmatmul.mubr.msk.f32.vlgmr.msra.gmra.mrb[122].mxu0 %vm1226_vm0, %v12322_v28 }
 0x944   : > { %v3168_v30 = vpop.permute.xlu0 %3167  ;;  %v3170_v45 = vpop.permute.xlu1 %3169 }
 0x945   : > { %v12338_v54 = vadd.f32 %v3175_v29, %v3168_v30  ;;  %v12340_v33 = vadd.f32 %v3176_v31, %v3170_v45 }
 0x947   : > { %9232 = vmatprep.mubr.msk.f32.mxu0 %vm1226_vm0, %v12338_v54 }
 0x948   : > { %9233 = vmatmul.mubr.msk.f32.gmra.mrb[124].mxu0 %vm1226_vm0, %v12340_v33 }
 0x9a8   : > { %v9231_v34 = vpop.f32.mrb[122].mxu0 }
 0x9a9   : > { %v12349_v37 = vadd.f32 %v9231_v34, %v7774_v44  ;;  %v3273_v38 = vpop.f32.mrb[123].mxu0 }
 0x9aa   : > { %v3274_v60 = vadd.f32 %v7774_v44, %v3273_v38 }
 0x9ab   : > { %3298 = vrot.lane.b32.xlu1 %v12349_v37, %s11120_s14 }
 0x9ac   : > { %3296 = vrot.lane.b32.xlu0 %v3274_v60, %s11120_s14  ;;  %9243 = vmatprep.mubr.msk.f32.mxu1 %vm3328_vm3, %v3274_v60  ;;  %v10549_v47 = vpack.i.bf16 %v12349_v37, %v3274_v60 }
 0xa1b   : > { %v9234_v39 = vpop.f32.mrb[124].mxu0 }
 0xa1c   : > { %v12355_v57 = vadd.f32 %v9234_v39, %v7774_v44  ;;  %v3283_v40 = vpop.f32.mrb[125].mxu0 }
 0xa1d   : > { %v12357_v2 = vadd.f32 %v7774_v44, %v3283_v40  ;;  %v12374_v46 = vpop.permute.xlu1 %3298 }
 0xa1e   : > { %3302 = vrot.lane.b32.xlu1 %v12355_v57, %s11120_s14  ;;  %v3297_v3 = vpop.permute.xlu0 %3296 }
 0xa1f   : > { %3300 = vrot.lane.b32.xlu0 %v12357_v2, %s11120_s14  ;;  %9257 = vmatprep.mubr.msk.f32.mxu0 %vm3328_vm3, %v3297_v3  ;;  %v10554_v1 = vpack.i.bf16 %v12374_v46, %v3297_v3  ;;  %v10559_v10 = vpack.i.bf16 %v12355_v57, %v12357_v2 }
 0xa22   : > { %3306 = vrot.lane.b32.xlu1 %v12349_v37, %s11121_s16 }
 0xa23   : > { %3304 = vrot.lane.b32.xlu0 %v3274_v60, %s11121_s16 }
 0xa26   : > { %3314 = vrot.lane.b32.xlu1 %v12349_v37, %s11122_s19 }
 0xa27   : > { %3312 = vrot.lane.b32.xlu0 %v3274_v60, %s11122_s19 }
 0xa2a   : > { %3310 = vrot.lane.b32.xlu1 %v12355_v57, %s11121_s16 }
 0xa2b   : > { %3308 = vrot.lane.b32.xlu0 %v12357_v2, %s11121_s16 }
 0xa2e   : > { %3318 = vrot.lane.b32.xlu1 %v12355_v57, %s11122_s19 }
 0xa2f   : > { %3316 = vrot.lane.b32.xlu0 %v12357_v2, %s11122_s19 }
 0xa32   : > { %10555 = vrot.lane.b32.xlu1 %v10554_v1, %s11118_s22 }
 0xa33   : > { %10550 = vrot.lane.b32.xlu0 %v10549_v47, %s11118_s22 }
 0xa37   : > { %10560 = vrot.lane.b32.xlu0 %v10559_v10, %s11118_s22 }
 0xa90   : > { %v12387_v48 = vpop.permute.xlu1 %3302 }
 0xa91   : > { %v12389_v9 = vpop.permute.xlu0 %3300 }
 0xa92   : > { %v10564_v7 = vpack.i.bf16 %v12387_v48, %v12389_v9 }
 0xa94   : > { %v12393_v49 = vpop.permute.xlu1 %3306  ;;  %10565 = vrot.lane.b32.xlu1 %v10564_v7, %s11118_s22 }
 0xa95   : > { %v3305_v15 = vpop.permute.xlu0 %3304 }
 0xa96   : > { %v12397_v55 = vpack.i.bf16 %v12393_v49, %v3305_v15 }
 0xa98   : > { %v12399_v24 = vpop.permute.xlu1 %3314  ;;  %10570 = vrot.lane.b32.xlu0 %v12397_v55, %s11118_s22 }
 0xa99   : > { %v12403_v23 = vpop.permute.xlu0 %3312 }
 0xa9a   : > { %v12407_v52 = vpack.i.bf16 %v12399_v24, %v12403_v23 }
 0xa9c   : > { %v12409_v56 = vpop.permute.xlu1 %3310  ;;  %10575 = vrot.lane.b32.xlu1 %v12407_v52, %s11118_s22 }
 0xa9d   : > { %v12413_v36 = vpop.permute.xlu0 %3308 }
 0xa9e   : > { %v12417_v16 = vpack.i.bf16 %v12409_v56, %v12413_v36 }
 0xaa0   : > { %v12419_v61 = vpop.permute.xlu1 %3318  ;;  %10580 = vrot.lane.b32.xlu0 %v12417_v16, %s11118_s22 }
 0xaa1   : > { %v12423_v35 = vpop.permute.xlu0 %3316 }
 0xaa2   : > { %v12427_v62 = vpack.i.bf16 %v12419_v61, %v12423_v35 }
 0xaa4   : > { %v10556_v41 = vpop.permute.xlu1 %10555  ;;  %10595 = vrot.lane.b32.xlu0 %v10554_v1, %s11119_s23  ;;  %10585 = vrot.lane.b32.xlu1 %v12427_v62, %s11118_s22 }
 0xaa5   : > { %v10558_v53 = vunpack.i.h.bf16 %v10556_v41  ;;  %v10557_v42 = vunpack.i.l.bf16 %v10556_v41  ;;  %v10551_v63 = vpop.permute.xlu0 %10550 }
 0xaa6   : > { %v10553_v0 = vunpack.i.h.bf16 %v10551_v63  ;;  %v10552_v50 = vunpack.i.l.bf16 %v10551_v63 }
 0xaa7   : > { %v10156_v5 = vpack.c.bf16 %v10558_v53, %v10557_v42 }
 0xaa8   : > { %v10144_v8 = vpack.c.bf16 %v10553_v0, %v10552_v50  ;;  %10590 = vrot.lane.b32.xlu1 %v10549_v47, %s11119_s23 }
 0xaa9   : > { %10158 = vmatprep.subr.msk.bf16.mxu0 %vm12434_vm4, %v10156_v5  ;;  %v10561_v11 = vpop.permute.xlu0 %10560 }
 0xaaa   : > { %v10563_v27 = vunpack.i.h.bf16 %v10561_v11  ;;  %v10562_v12 = vunpack.i.l.bf16 %v10561_v11  ;;  %10146 = vmatprep.subr.msk.bf16.mxu1 %vm12434_vm4, %v10144_v8  ;;  %10161 = vmatpush3.bf16.xpose.msk.msra.mxu0 %vm12434_vm4, %v10156_v5 }
 0xaab   : > { %10149 = vmatpush3.bf16.xpose.msk.msra.mxu1 %vm12434_vm4, %v10144_v8 }
 0xaac   : > { %v10150_v13 = vpack.c.bf16 %v10563_v27, %v10562_v12  ;;  %10600 = vrot.lane.b32.xlu1 %v10559_v10, %s11119_s23 }
 0xaae   : > { %10152 = vmatprep.subr.msk.bf16.mxu1 %vm12434_vm4, %v10150_v13 }
 0xab0   : > { %10605 = vrot.lane.b32.xlu1 %v10564_v7, %s11119_s23 }
 0xab3   : > { %10155 = vmatpush3.bf16.xpose.msk.msra.mxu1 %vm12434_vm4, %v10150_v13 }
 0xaba   : > { %9244 = vmatmul.mubr.msk.f32.vlgmr.msra.gmra.mrb[106].mxu1 %vm3328_vm3, %v12349_v37 }
 0xabb   : > { %9246 = vmatprep.mubr.msk.f32.mxu1 %vm3328_vm3, %v12357_v2 }
 0xabe   : > { %9247 = vmatmul.mubr.msk.f32.gmra.mrb[108].mxu1 %vm3328_vm3, %v12355_v57 }
 0xabf   : > { %9271 = vmatprep.mubr.msk.f32.mxu1 %vm3328_vm3, %v3305_v15 }
 0xb06   : > { %v10566_v25 = vpop.permute.xlu1 %10565 }
 0xb07   : > { %v10568_v14 = vunpack.i.h.bf16 %v10566_v25  ;;  %v10567_v43 = vunpack.i.l.bf16 %v10566_v25 }
 0xb09   : > { %v10162_v17 = vpack.c.bf16 %v10568_v14, %v10567_v43 }
 0xb0a   : > { %v10571_v59 = vpop.permute.xlu0 %10570 }
 0xb0b   : > { %v10573_v20 = vunpack.i.h.bf16 %v10571_v59  ;;  %v10572_v58 = vunpack.i.l.bf16 %v10571_v59  ;;  %10164 = vmatprep.subr.msk.bf16.mxu0 %vm12434_vm4, %v10162_v17 }
 0xb0c   : > { %10167 = vmatpush3.bf16.xpose.msk.msra.mxu0 %vm12434_vm4, %v10162_v17 }
 0xb0d   : > { %v10168_v51 = vpack.c.bf16 %v10573_v20, %v10572_v58 }
 0xb0e   : > { %v10576_v21 = vpop.permute.xlu1 %10575 }
 0xb0f   : > { %v10578_v22 = vunpack.i.h.bf16 %v10576_v21  ;;  %v10577_v6 = vunpack.i.l.bf16 %v10576_v21  ;;  %10170 = vmatprep.subr.msk.bf16.mxu1 %vm12434_vm4, %v10168_v51 }
 0xb10   : > { %10173 = vmatpush3.bf16.xpose.msk.msra.mxu1 %vm12434_vm4, %v10168_v51 }
 0xb11   : > { %v10180_v19 = vpack.c.bf16 %v10578_v22, %v10577_v6 }
 0xb12   : > { %v10581_v26 = vpop.permute.xlu0 %10580 }
 0xb13   : > { %v10583_v18 = vunpack.i.h.bf16 %v10581_v26  ;;  %v10582_v29 = vunpack.i.l.bf16 %v10581_v26  ;;  %9258 = vmatmul.mubr.msk.f32.vlgmr.msra.gmra.mrb[126].mxu0 %vm3328_vm3, %v12374_v46  ;;  %10182 = vmatprep.subr.msk.bf16.mxu0 %vm12434_vm4, %v10180_v19 }
 0xb14   : > { %9260 = vmatprep.mubr.msk.f32.mxu0 %vm3328_vm3, %v12389_v9  ;;  %10185 = vmatpush3.bf16.xpose.msk.msra.mxu0 %vm12434_vm4, %v10180_v19 }
 0xb15   : > { %v10174_v31 = vpack.c.bf16 %v10583_v18, %v10582_v29 }
 0xb16   : > { %v10586_v30 = vpop.permute.xlu1 %10585  ;;  %v10596_v45 = vpop.permute.xlu0 %10595 }
 0xb17   : > { %v10588_v44 = vunpack.i.h.bf16 %v10586_v30  ;;  %v10587_v34 = vunpack.i.l.bf16 %v10586_v30  ;;  %v10598_v37 = vunpack.i.h.bf16 %v10596_v45  ;;  %v10597_v38 = vunpack.i.l.bf16 %v10596_v45  ;;  %9261 = vmatmul.mubr.msk.f32.gmra.mrb[128].mxu0 %vm3328_vm3, %v12387_v48  ;;  %10176 = vmatprep.subr.msk.bf16.mxu1 %vm12434_vm4, %v10174_v31 }
 0xb18   : > { %10179 = vmatpush3.bf16.xpose.msk.msra.mxu1 %vm12434_vm4, %v10174_v31  ;;  %9285 = vmatprep.mubr.msk.f32.mxu0 %vm3328_vm3, %v12403_v23 }
 0xb19   : > { %v10186_v60 = vpack.c.bf16 %v10588_v44, %v10587_v34  ;;  %v10200_v2 = vpack.c.bf16 %v10598_v37, %v10597_v38 }
 0xb1a   : > { %v10591_v39 = vpop.permute.xlu1 %10590 }
 0xb1b   : > { %v10593_v57 = vunpack.i.h.bf16 %v10591_v39  ;;  %v10592_v40 = vunpack.i.l.bf16 %v10591_v39  ;;  %10188 = vmatprep.subr.msk.bf16.mxu0 %vm12434_vm4, %v10186_v60 }
 0xb1c   : > { %10191 = vmatpush3.bf16.xpose.msk.msra.mxu0 %vm12434_vm4, %v10186_v60 }
 0xb1d   : > { %10201 = vmatprep.subr.bf16.mxu0 %v10200_v2  ;;  %v10192_v3 = vpack.c.bf16 %v10593_v57, %v10592_v40 }
 0xb1e   : > { %v10601_v46 = vpop.permute.xlu1 %10600 }
 0xb1f   : > { %v10603_v1 = vunpack.i.h.bf16 %v10601_v46  ;;  %v10602_v47 = vunpack.i.l.bf16 %v10601_v46  ;;  %9272 = vmatmul.mubr.msk.f32.vlgmr.msra.gmra.mrb[110].mxu1 %vm3328_vm3, %v12393_v49  ;;  %10193 = vmatprep.subr.bf16.mxu1 %v10192_v3 }
 0xb20   : > { %9274 = vmatprep.mubr.msk.f32.mxu1 %vm3328_vm3, %v12413_v36  ;;  %10195 = vmatpush3.bf16.msra.mxu1 %v10192_v3 }
 0xb21   : > { %v10196_v10 = vpack.c.bf16 %v10603_v1, %v10602_v47 }
 0xb22   : > { %v10606_v48 = vpop.permute.xlu1 %10605 }
 0xb23   : > { %v10608_v9 = vunpack.i.h.bf16 %v10606_v48  ;;  %v10607_v7 = vunpack.i.l.bf16 %v10606_v48  ;;  %9275 = vmatmul.mubr.msk.f32.gmra.mrb[112].mxu1 %vm3328_vm3, %v12409_v56  ;;  %9286 = vmatmul.mubr.msk.f32.vlgmr.msra.gmra.mrb[130].mxu0 %vm3328_vm3, %v12399_v24 }
 0xb24   : > { %10197 = vmatprep.subr.bf16.mxu1 %v10196_v10  ;;  %9288 = vmatprep.mubr.msk.f32.mxu0 %vm3328_vm3, %v12423_v35 }
 0xb25   : > { %10199 = vmatpush3.bf16.msra.mxu1 %v10196_v10  ;;  %10203 = vmatpush3.bf16.msra.mxu0 %v10200_v2  ;;  %v10204_v49 = vpack.c.bf16 %v10608_v9, %v10607_v7 }
 0xb27   : > { %9289 = vmatmul.mubr.msk.f32.gmra.mrb[132].mxu0 %vm3328_vm3, %v12419_v61  ;;  %10205 = vmatprep.subr.bf16.mxu0 %v10204_v49 }
 0xb29   : > { %10207 = vmatpush3.bf16.msra.mxu0 %v10204_v49 }
 0xb8d   : > { %v9245_v15 = vpop.f32.mrb[106].mxu1 }
 0xb8e   : > { %v12500_v23 = vmul.f32 0.35355338, %v9245_v15  ;;  %v3411_v36 = vpop.f32.mrb[107].mxu1 }
 0xb8f   : > { %v12502_v56 = vmul.f32 0.35355338, %v3411_v36 }
 0xb90   : > { %v3776_v24 = vsel %vm1226_vm0, %v12500_v23, -inf }
 0xb91   : > { %3777 = vmax.xlane.f32.xlu1 %v3776_v24  ;;  %v9248_v41 = vpop.f32.mrb[108].mxu1  ;;  %v3773_v35 = vsel %vm1226_vm0, %v12502_v56, -inf }
 0xb92   : > { %v12508_v53 = vmul.f32 0.35355338, %v9248_v41  ;;  %3774 = vmax.xlane.f32.xlu0 %v3773_v35  ;;  %v3421_v61 = vpop.f32.mrb[109].mxu1 }
 0xb93   : > { %v12510_v42 = vmul.f32 0.35355338, %v3421_v61 }
 0xb94   : > { %v3782_v63 = vsel %vm1226_vm0, %v12508_v53, -inf }
 0xb95   : > { %v3779_v0 = vsel %vm1226_vm0, %v12510_v42, -inf }
 0xb96   : > { %3783 = vmax.xlane.f32.xlu0 %v3782_v63  ;;  %3780 = vmax.xlane.f32.xlu1 %v3779_v0 }
 0xbe6   : > { %v9259_v50 = vpop.f32.mrb[126].mxu0 }
 0xbe7   : > { %v12516_v5 = vmul.f32 0.35355338, %v9259_v50  ;;  %v3520_v8 = vpop.f32.mrb[127].mxu0 }
 0xbe8   : > { %v12524_v17 = vmul.f32 0.35355338, %v3520_v8 }
 0xbe9   : > { %v3788_v11 = vsel %vm1226_vm0, %v12516_v5, -inf }
 0xbea   : > { %v9262_v27 = vpop.f32.mrb[128].mxu0  ;;  %3789 = vmax.xlane.f32.xlu0 %v3788_v11  ;;  %v3785_v26 = vsel %vm1226_vm0, %v12524_v17, -inf }
 0xbeb   : > { %v3530_v12 = vpop.f32.mrb[129].mxu0  ;;  %v12532_v19 = vmul.f32 0.35355338, %v9262_v27 }
 0xbec   : > { %v12528_v20 = vmul.f32 0.35355338, %v3530_v12 }
 0xbed   : > { %v3794_v44 = vsel %vm1226_vm0, %v12532_v19, -inf }
 0xbee   : > { %v3791_v31 = vsel %vm1226_vm0, %v12528_v20, -inf }
 0xbf2   : > { %v9273_v13 = vpop.f32.mrb[110].mxu1 }
 0xbf3   : > { %v12520_v25 = vmul.f32 0.35355338, %v9273_v13  ;;  %v3629_v14 = vpop.f32.mrb[111].mxu1 }
 0xbf4   : > { %v12522_v43 = vmul.f32 0.35355338, %v3629_v14 }
 0xbf5   : > { %v3800_v59 = vsel %vm1226_vm0, %v12520_v25, -inf }
 0xbf6   : > { %v9287_v58 = vpop.f32.mrb[130].mxu0  ;;  %3801 = vmax.xlane.f32.xlu0 %v3800_v59  ;;  %v9276_v51 = vpop.f32.mrb[112].mxu1  ;;  %v3797_v21 = vsel %vm1226_vm0, %v12522_v43, -inf }
 0xbf7   : > { %v3738_v22 = vpop.f32.mrb[131].mxu0  ;;  %3798 = vmax.xlane.f32.xlu1 %v3797_v21  ;;  %v3639_v6 = vpop.f32.mrb[113].mxu1  ;;  %v12540_v45 = vmul.f32 0.35355338, %v9276_v51  ;;  %v12548_v38 = vmul.f32 0.35355338, %v9287_v58 }
 0xbf8   : > { %v12536_v18 = vmul.f32 0.35355338, %v3639_v6  ;;  %v12544_v34 = vmul.f32 0.35355338, %v3738_v22 }
 0xbf9   : > { %v3806_v60 = vsel %vm1226_vm0, %v12540_v45, -inf  ;;  %v3812_v2 = vsel %vm1226_vm0, %v12548_v38, -inf }
 0xbfa   : > { %v9290_v29 = vpop.f32.mrb[132].mxu0  ;;  %3786 = vmax.xlane.f32.xlu0 %v3785_v26  ;;  %v3803_v37 = vsel %vm1226_vm0, %v12536_v18, -inf  ;;  %v3809_v57 = vsel %vm1226_vm0, %v12544_v34, -inf }
 0xbfb   : > { %v3748_v30 = vpop.f32.mrb[133].mxu0  ;;  %3792 = vmax.xlane.f32.xlu1 %v3791_v31  ;;  %v12556_v40 = vmul.f32 0.35355338, %v9290_v29 }
 0xbfc   : > { %v12552_v39 = vmul.f32 0.35355338, %v3748_v30 }
 0xbfd   : > { %v3818_v46 = vsel %vm1226_vm0, %v12556_v40, -inf }
 0xbfe   : > { %3795 = vmax.xlane.f32.xlu0 %v3794_v44  ;;  %v3815_v3 = vsel %vm1226_vm0, %v12552_v39, -inf }
 0xbff   : > { %3804 = vmax.xlane.f32.xlu1 %v3803_v37 }
 0xc02   : > { %3807 = vmax.xlane.f32.xlu0 %v3806_v60 }
 0xc03   : > { %3810 = vmax.xlane.f32.xlu1 %v3809_v57 }
 0xc06   : > { %3813 = vmax.xlane.f32.xlu0 %v3812_v2 }
 0xc07   : > { %3816 = vmax.xlane.f32.xlu1 %v3815_v3 }
 0xc0a   : > { %3819 = vmax.xlane.f32.xlu0 %v3818_v46 }
 0xc18   : > { %10615 = vrot.lane.b32.xlu1 %v12407_v52, %s11119_s23 }
 0xc1e   : > { %v3778_v1 = vpop.xlane.xlu1 %3777 }
 0xc1f   : > { %v3775_v47 = vpop.xlane.xlu0 %3774  ;;  %v3822_v9 = vsub.f32 %v12500_v23, %v3778_v1 }
 0xc20   : > { %10610 = vrot.lane.b32.xlu0 %v12397_v55, %s11119_s23  ;;  %v3821_v10 = vsub.f32 %v12502_v56, %v3775_v47 }
 0xc21   : > { %v3839_v36 = vmul.f32 1.442695, %v3822_v9 }
 0xc22   : > { %v3837_v7 = vmul.f32 1.442695, %v3821_v10 }
 0xc23   : > { %v3781_v48 = vpop.xlane.xlu1 %3780  ;;  %v3784_v49 = vpop.xlane.xlu0 %3783 }
 0xc24   : > { %v3823_v15 = vsub.f32 %v12510_v42, %v3781_v48  ;;  %v3824_v24 = vsub.f32 %v12508_v53, %v3784_v49  ;;  %10739 = vpow2.f32 %v3837_v7 }
 0xc25   : > { %10741 = vpow2.f32 %v3839_v36 }
 0xc26   : > { %v3841_v41 = vmul.f32 1.442695, %v3823_v15  ;;  %v3843_v52 = vmul.f32 1.442695, %v3824_v24 }
 0xc28   : > { %10743 = vpow2.f32 %v3841_v41 }
 0xc29   : > { %10745 = vpow2.f32 %v3843_v52 }
 0xc2e   : > { %v12572_v55 = vpop.eup %10739 }
 0xc2f   : > { %v12574_v35 = vpop.eup %10741  ;;  %v3869_v23 = vsel %vm1226_vm0, %v12572_v55, 0.0 }
 0xc30   : > { %v3872_v61 = vsel %vm1226_vm0, %v12574_v35, 0.0 }
 0xc32   : > { %v12578_v56 = vpop.eup %10743 }
 0xc33   : > { %v12582_v53 = vpop.eup %10745  ;;  %v3875_v42 = vsel %vm1226_vm0, %v12578_v56, 0.0 }
 0xc34   : > { %v3878_v63 = vsel %vm1226_vm0, %v12582_v53, 0.0 }
 0xc3c   : > { %3870 = vadd.xlane.f32.xlu1 %v3869_v23 }
 0xc3f   : > { %3873 = vadd.xlane.f32.xlu0 %v3872_v61 }
 0xc40   : > { %3876 = vadd.xlane.f32.xlu1 %v3875_v42 }
 0xc43   : > { %3879 = vadd.xlane.f32.xlu0 %v3878_v63 }
 0xc77   : > { %v3790_v0 = vpop.xlane.xlu0 %3789 }
 0xc78   : > { %v3826_v50 = vsub.f32 %v12516_v5, %v3790_v0 }
 0xc7a   : > { %v3847_v8 = vmul.f32 1.442695, %v3826_v50 }
 0xc7c   : > { %10747 = vpow2.f32 %v3847_v8 }
 0xc83   : > { %v3802_v11 = vpop.xlane.xlu0 %3801 }
 0xc84   : > { %v3830_v27 = vsub.f32 %v12520_v25, %v3802_v11  ;;  %v3799_v12 = vpop.xlane.xlu1 %3798 }
 0xc85   : > { %v3829_v13 = vsub.f32 %v12522_v43, %v3799_v12 }
 0xc86   : > { %v12591_v14 = vpop.eup %10747  ;;  %v3855_v59 = vmul.f32 1.442695, %v3830_v27 }
 0xc87   : > { %v3787_v58 = vpop.xlane.xlu0 %3786  ;;  %v3884_v51 = vsel %vm1226_vm0, %v12591_v14, 0.0  ;;  %v3853_v5 = vmul.f32 1.442695, %v3829_v13 }
 0xc88   : > { %10749 = vpow2.f32 %v3855_v59  ;;  %v3825_v21 = vsub.f32 %v12524_v17, %v3787_v58  ;;  %v3793_v22 = vpop.xlane.xlu1 %3792  ;;  %3885 = vadd.xlane.f32.xlu0 %v3884_v51 }
 0xc89   : > { %v3827_v26 = vsub.f32 %v12528_v20, %v3793_v22 }
 0xc8a   : > { %v3845_v6 = vmul.f32 1.442695, %v3825_v21 }
 0xc8b   : > { %v3796_v25 = vpop.xlane.xlu0 %3795  ;;  %v3849_v30 = vmul.f32 1.442695, %v3827_v26 }
 0xc8c   : > { %10751 = vpow2.f32 %v3845_v6  ;;  %v3828_v43 = vsub.f32 %v12532_v19, %v3796_v25  ;;  %v3805_v29 = vpop.xlane.xlu1 %3804 }
 0xc8d   : > { %10753 = vpow2.f32 %v3853_v5  ;;  %v3831_v44 = vsub.f32 %v12536_v18, %v3805_v29 }
 0xc8e   : > { %v3851_v31 = vmul.f32 1.442695, %v3828_v43 }
 0xc8f   : > { %v3808_v37 = vpop.xlane.xlu0 %3807  ;;  %v3857_v20 = vmul.f32 1.442695, %v3831_v44 }
 0xc90   : > { %10755 = vpow2.f32 %v3851_v31  ;;  %v3832_v17 = vsub.f32 %v12540_v45, %v3808_v37  ;;  %v3811_v60 = vpop.xlane.xlu1 %3810 }
 0xc91   : > { %10757 = vpow2.f32 %v3849_v30  ;;  %v3833_v3 = vsub.f32 %v12544_v34, %v3811_v60 }
 0xc92   : > { %v12600_v57 = vpop.eup %10749  ;;  %v3859_v2 = vmul.f32 1.442695, %v3832_v17 }
 0xc93   : > { %v3814_v46 = vpop.xlane.xlu0 %3813  ;;  %v3896_v19 = vsel %vm1226_vm0, %v12600_v57, 0.0  ;;  %v3861_v48 = vmul.f32 1.442695, %v3833_v3 }
 0xc94   : > { %10759 = vpow2.f32 %v3859_v2  ;;  %v3834_v1 = vsub.f32 %v12548_v38, %v3814_v46  ;;  %3897 = vadd.xlane.f32.xlu0 %v3896_v19  ;;  %v3817_v18 = vpop.xlane.xlu1 %3816 }
 0xc95   : > { %10761 = vpow2.f32 %v3857_v20  ;;  %v3835_v9 = vsub.f32 %v12552_v39, %v3817_v18 }
 0xc96   : > { %v12606_v47 = vpop.eup %10751  ;;  %v3863_v45 = vmul.f32 1.442695, %v3834_v1 }
 0xc97   : > { %v12608_v10 = vpop.eup %10753  ;;  %v3820_v7 = vpop.xlane.xlu0 %3819  ;;  %v3881_v34 = vsel %vm1226_vm0, %v12606_v47, 0.0  ;;  %v3865_v23 = vmul.f32 1.442695, %v3835_v9 }
 0xc98   : > { %10763 = vpow2.f32 %v3863_v45  ;;  %v3836_v49 = vsub.f32 %v12556_v40, %v3820_v7  ;;  %3882 = vadd.xlane.f32.xlu1 %v3881_v34  ;;  %v10616_v38 = vpop.permute.xlu1 %10615  ;;  %v3893_v52 = vsel %vm1226_vm0, %v12608_v10, 0.0 }
 0xc99   : > { %v10618_v15 = vunpack.i.h.bf16 %v10616_v38  ;;  %v10617_v36 = vunpack.i.l.bf16 %v10616_v38  ;;  %10765 = vpow2.f32 %v3861_v48 }
 0xc9a   : > { %v12614_v24 = vpop.eup %10755  ;;  %v3867_v41 = vmul.f32 1.442695, %v3836_v49 }
 0xc9b   : > { %v10611_v39 = vpop.permute.xlu0 %10610  ;;  %v3890_v61 = vsel %vm1226_vm0, %v12614_v24, 0.0  ;;  %v12620_v42 = vpack.c.bf16 %v10618_v15, %v10617_v36  ;;  %v12622_v0 = vpop.eup %10757 }
 0xc9c   : > { %10767 = vpow2.f32 %v3867_v41  ;;  %v10613_v40 = vunpack.i.h.bf16 %v10611_v39  ;;  %v10612_v63 = vunpack.i.l.bf16 %v10611_v39  ;;  %3891 = vadd.xlane.f32.xlu0 %v3890_v61  ;;  %3894 = vadd.xlane.f32.xlu1 %v3893_v52  ;;  %v3887_v27 = vsel %vm1226_vm0, %v12622_v0, 0.0 }
 0xc9d   : > { %10217 = vmatprep.subr.bf16.mxu0 %v12620_v42  ;;  %10769 = vpow2.f32 %v3865_v23 }
 0xc9e   : > { %v12625_v50 = vpop.eup %10759  ;;  %v10208_v8 = vpack.c.bf16 %v10613_v40, %v10612_v63 }
 0xc9f   : > { %v3902_v11 = vsel %vm1226_vm0, %v12625_v50, 0.0  ;;  %v12631_v12 = vpop.eup %10761 }
 0xca0   : > { %3903 = vadd.xlane.f32.xlu0 %v3902_v11  ;;  %10209 = vmatprep.subr.bf16.mxu1 %v10208_v8  ;;  %v3899_v58 = vsel %vm1226_vm0, %v12631_v12, 0.0 }
 0xca1   : > { %3888 = vadd.xlane.f32.xlu1 %v3887_v27 }
 0xca2   : > { %v12633_v13 = vpop.eup %10763 }
 0xca3   : > { %v3908_v59 = vsel %vm1226_vm0, %v12633_v13, 0.0  ;;  %v12639_v51 = vpop.eup %10765 }
 0xca4   : > { %3909 = vadd.xlane.f32.xlu0 %v3908_v59  ;;  %v3905_v5 = vsel %vm1226_vm0, %v12639_v51, 0.0 }
 0xca5   : > { %3900 = vadd.xlane.f32.xlu1 %v3899_v58 }
 0xca6   : > { %v12641_v21 = vpop.eup %10767 }
 0xca7   : > { %v3914_v22 = vsel %vm1226_vm0, %v12641_v21, 0.0  ;;  %v12647_v6 = vpop.eup %10769 }
 0xca8   : > { %3915 = vadd.xlane.f32.xlu0 %v3914_v22  ;;  %v3911_v26 = vsel %vm1226_vm0, %v12647_v6, 0.0 }
 0xca9   : > { %3906 = vadd.xlane.f32.xlu1 %v3905_v5 }
 0xcad   : > { %3912 = vadd.xlane.f32.xlu1 %v3911_v26 }
 0xcbe   : > { %10625 = vrot.lane.b32.xlu1 %v12427_v62, %s11119_s23  ;;  %10620 = vrot.lane.b32.xlu0 %v12417_v16, %s11119_s23 }
 0xcc9   : > { %v3871_v25 = vpop.xlane.xlu1 %3870 }
 0xcca   : > { %10771 = vrcp.f32 %v3871_v25 }
 0xccc   : > { %v3874_v43 = vpop.xlane.xlu0 %3873 }
 0xccd   : > { %10773 = vrcp.f32 %v3874_v43  ;;  %v3877_v29 = vpop.xlane.xlu1 %3876 }
 0xcce   : > { %10775 = vrcp.f32 %v3877_v29 }
 0xcd0   : > { %v3880_v31 = vpop.xlane.xlu0 %3879 }
 0xcd1   : > { %10777 = vrcp.f32 %v3880_v31 }
 0xcd4   : > { %v10772_v30 = vpop.eup %10771 }
 0xcd5   : > { %v3918_v44 = vmul.f32 %v10772_v30, %v12572_v55 }
 0xcd7   : > { %v10774_v37 = vpop.eup %10773  ;;  %9299 = vmatprep.mubr.msk.f32.mxu1 %vm1226_vm0, %v3918_v44 }
 0xcd8   : > { %v10776_v17 = vpop.eup %10775  ;;  %v3920_v62 = vmul.f32 %v10774_v37, %v12574_v35 }
 0xcd9   : > { %v3922_v60 = vmul.f32 %v10776_v17, %v12578_v56 }
 0xcda   : > { %9300 = vmatmul.mubr.msk.f32.vlgmr.msra.gmra.mrb[114].mxu1 %vm1226_vm0, %v3920_v62  ;;  %v3188_v62 = vld [vmem:[%s13430_s10 + $0x61] sm:$0xff] }
 0xcdb   : > { %v10778_v16 = vpop.eup %10777  ;;  %10211 = vmatpush3.bf16.msra.mxu1 %v10208_v8  ;;  %9302 = vmatprep.mubr.msk.f32.mxu1 %vm1226_vm0, %v3922_v60  ;;  %v3189_v60 = vld [vmem:[%s13430_s10 + $0x69] sm:$0xff] }
 0xcdc   : > { %v3924_v2 = vmul.f32 %v10778_v16, %v12582_v53  ;;  %v10228_v16 = vpack.c.bf16 %v3189_v60, %v3188_v62 }
 0xcde   : > { %9303 = vmatmul.mubr.msk.f32.gmra.mrb[116].mxu1 %vm1226_vm0, %v3924_v2 }
 0xd15   : > { %v3886_v20 = vpop.xlane.xlu0 %3885 }
 0xd16   : > { %10779 = vrcp.f32 %v3886_v20 }
 0xd20   : > { %v10780_v1 = vpop.eup %10779 }
 0xd21   : > { %v3898_v55 = vpop.xlane.xlu0 %3897  ;;  %v3928_v53 = vmul.f32 %v10780_v1, %v12591_v14 }
 0xd25   : > { %v3883_v3 = vpop.xlane.xlu1 %3882 }
 0xd26   : > { %10781 = vrcp.f32 %v3883_v3 }
 0xd29   : > { %v3892_v46 = vpop.xlane.xlu0 %3891  ;;  %v3895_v19 = vpop.xlane.xlu1 %3894 }
 0xd2a   : > { %10783 = vrcp.f32 %v3895_v19 }
 0xd2b   : > { %10785 = vrcp.f32 %v3892_v46 }
 0xd2d   : > { %v3904_v35 = vpop.xlane.xlu0 %3903 }
 0xd2e   : > { %v3889_v56 = vpop.xlane.xlu1 %3888 }
 0xd2f   : > { %10787 = vrcp.f32 %v3889_v56 }
 0xd30   : > { %v10782_v18 = vpop.eup %10781  ;;  %10789 = vrcp.f32 %v3898_v55 }
 0xd31   : > { %v3910_v45 = vpop.xlane.xlu0 %3909  ;;  %v3926_v48 = vmul.f32 %v10782_v18, %v12606_v47 }
 0xd32   : > { %v3901_v9 = vpop.xlane.xlu1 %3900 }
 0xd33   : > { %9313 = vmatprep.mubr.msk.f32.mxu0 %vm1226_vm0, %v3926_v48  ;;  %10791 = vrcp.f32 %v3901_v9 }
 0xd34   : > { %9314 = vmatmul.mubr.msk.f32.vlgmr.msra.gmra.mrb[134].mxu0 %vm1226_vm0, %v3928_v53  ;;  %v10784_v7 = vpop.eup %10783  ;;  %10793 = vrcp.f32 %v3904_v35 }
 0xd35   : > { %10219 = vmatpush3.bf16.msra.mxu0 %v12620_v42  ;;  %v3916_v34 = vpop.xlane.xlu0 %3915  ;;  %v3934_v38 = vmul.f32 %v10784_v7, %v12608_v10  ;;  %v10786_v15 = vpop.eup %10785 }
 0xd36   : > { %v3907_v49 = vpop.xlane.xlu1 %3906  ;;  %v3932_v39 = vmul.f32 %v10786_v15, %v12614_v24 }
 0xd37   : > { %10795 = vrcp.f32 %v3907_v49  ;;  %9327 = vmatprep.mubr.msk.f32.mxu1 %vm1226_vm0, %v3934_v38 }
 0xd38   : > { %10797 = vrcp.f32 %v3910_v45 }
 0xd39   : > { %v10788_v14 = vpop.eup %10787  ;;  %v10621_v47 = vpop.permute.xlu0 %10620 }
 0xd3a   : > { %v10623_v36 = vunpack.i.h.bf16 %v10621_v47  ;;  %v10622_v41 = vunpack.i.l.bf16 %v10621_v47  ;;  %v3913_v52 = vpop.xlane.xlu1 %3912  ;;  %v3930_v23 = vmul.f32 %v10788_v14, %v12622_v0  ;;  %v10790_v10 = vpop.eup %10789 }
 0xd3b   : > { %10799 = vrcp.f32 %v3913_v52  ;;  %v3936_v27 = vmul.f32 %v10790_v10, %v12600_v57 }
 0xd3c   : > { %10801 = vrcp.f32 %v3916_v34  ;;  %9316 = vmatprep.mubr.msk.f32.mxu0 %vm1226_vm0, %v3930_v23  ;;  %v10212_v61 = vpack.c.bf16 %v10623_v36, %v10622_v41 }
 0xd3d   : > { %9317 = vmatmul.mubr.msk.f32.gmra.mrb[136].mxu0 %vm1226_vm0, %v3932_v39  ;;  %v10792_v42 = vpop.eup %10791 }
 0xd3e   : > { %v10626_v40 = vpop.permute.xlu1 %10625  ;;  %10213 = vmatprep.subr.bf16.mxu1 %v10212_v61  ;;  %v10794_v11 = vpop.eup %10793  ;;  %v3938_v24 = vmul.f32 %v10792_v42, %v12631_v12 }
 0xd3f   : > { %v10628_v63 = vunpack.i.h.bf16 %v10626_v40  ;;  %v10627_v8 = vunpack.i.l.bf16 %v10626_v40  ;;  %10215 = vmatpush3.bf16.msra.mxu1 %v10212_v61  ;;  %v3940_v5 = vmul.f32 %v10794_v11, %v12625_v50  ;;  %v7827_v11 = vld [vmem:[%s13430_s10 + $0x71] ss:$0 sm:$0xff] }
 0xd41   : > { %v10796_v0 = vpop.eup %10795  ;;  %v10220_v59 = vpack.c.bf16 %v10628_v63, %v10627_v8 }
 0xd42   : > { %v10798_v58 = vpop.eup %10797  ;;  %9328 = vmatmul.mubr.msk.f32.vlgmr.msra.gmra.mrb[118].mxu1 %vm1226_vm0, %v3936_v27  ;;  %v3942_v22 = vmul.f32 %v10796_v0, %v12639_v51 }
 0xd43   : > { %10221 = vmatprep.subr.bf16.mxu0 %v10220_v59  ;;  %9330 = vmatprep.mubr.msk.f32.mxu1 %vm1226_vm0, %v3938_v24  ;;  %v3944_v57 = vmul.f32 %v10798_v58, %v12633_v13 }
 0xd44   : > { %10223 = vmatpush3.bf16.msra.mxu0 %v10220_v59  ;;  %9341 = vmatprep.mubr.msk.f32.mxu0 %vm1226_vm0, %v3942_v22 }
 0xd45   : > { %v10800_v26 = vpop.eup %10799 }
 0xd46   : > { %v10802_v25 = vpop.eup %10801  ;;  %9331 = vmatmul.mubr.msk.f32.gmra.mrb[120].mxu1 %vm1226_vm0, %v3940_v5  ;;  %v3946_v12 = vmul.f32 %v10800_v26, %v12647_v6  ;;  %v3186_v6 = vld [vmem:[%s13430_s10 + $0x51] sm:$0xff] }
 0xd47   : > { %9342 = vmatmul.mubr.msk.f32.vlgmr.msra.gmra.mrb[138].mxu0 %vm1226_vm0, %v3944_v57  ;;  %v3948_v51 = vmul.f32 %v10802_v25, %v12641_v21  ;;  %v3187_v21 = vld [vmem:[%s13430_s10 + $0x59] sm:$0xff] }
 0xd48   : > { %9344 = vmatprep.mubr.msk.f32.mxu0 %vm1226_vm0, %v3946_v12  ;;  %v10224_v44 = vpack.c.bf16 %v3187_v21, %v3186_v6 }
 0xd4a   : > { %10225 = vmatprep.subr.bf16.mxu1 %v10224_v44 }
 0xd4b   : > { %9345 = vmatmul.mubr.msk.f32.gmra.mrb[140].mxu0 %vm1226_vm0, %v3948_v51  ;;  %10227 = vmatpush3.bf16.msra.mxu1 %v10224_v44 }
 0xd4c   : > { %10229 = vmatprep.subr.bf16.mxu1 %v10228_v16 }
 0xd4f   : > { %10231 = vmatpush3.bf16.msra.mxu1 %v10228_v16 }
 0xdad   : > { %v9301_v43 = vpop.f32.mrb[114].mxu1 }
 0xdae   : > { %v4039_v29 = vpop.f32.mrb[115].mxu1 }
 0xdb1   : > { %v9304_v31 = vpop.f32.mrb[116].mxu1 }
 0xdb2   : > { %v4049_v50 = vpop.f32.mrb[117].mxu1 }
 0xe07   : > { %v9315_v30 = vpop.f32.mrb[134].mxu0 }
 0xe08   : > { %4391 = vrot.lane.b32.xlu1 %v9315_v30, %s11123_s12  ;;  %v4148_v13 = vpop.f32.mrb[135].mxu0 }
 0xe09   : > { %4389 = vrot.lane.b32.xlu0 %v4148_v13, %s11123_s12 }
 0xe10   : > { %v9318_v37 = vpop.f32.mrb[136].mxu0 }
 0xe11   : > { %v4158_v17 = vpop.f32.mrb[137].mxu0 }
 0xe15   : > { %v9329_v2 = vpop.f32.mrb[118].mxu1 }
 0xe16   : > { %4407 = vrot.lane.b32.xlu1 %v9329_v2, %s11124_s11  ;;  %v4257_v20 = vpop.f32.mrb[119].mxu1 }
 0xe17   : > { %4405 = vrot.lane.b32.xlu0 %v4257_v20, %s11124_s11 }
 0xe19   : > { %v9332_v55 = vpop.f32.mrb[120].mxu1 }
 0xe1a   : > { %v9343_v3 = vpop.f32.mrb[138].mxu0  ;;  %4395 = vrot.lane.b32.xlu1 %v9318_v37, %s11123_s12  ;;  %v4267_v46 = vpop.f32.mrb[121].mxu1 }
 0xe1b   : > { %v4366_v19 = vpop.f32.mrb[139].mxu0  ;;  %4393 = vrot.lane.b32.xlu0 %v4158_v17, %s11123_s12 }
 0xe1e   : > { %v9346_v35 = vpop.f32.mrb[140].mxu0  ;;  %4411 = vrot.lane.b32.xlu1 %v9332_v55, %s11124_s11 }
 0xe1f   : > { %v4376_v56 = vpop.f32.mrb[141].mxu0  ;;  %4409 = vrot.lane.b32.xlu0 %v4267_v46, %s11124_s11 }
 0xe22   : > { %4423 = vrot.lane.b32.xlu1 %v9343_v3, %s11125_s17 }
 0xe23   : > { %4421 = vrot.lane.b32.xlu0 %v4366_v19, %s11125_s17 }
 0xe26   : > { %4427 = vrot.lane.b32.xlu1 %v9346_v35, %s11125_s17  ;;  %v4623_v35 = vld [vmem:[%s13430_s10 + $0x74] sm:$0xff] }
 0xe27   : > { %4425 = vrot.lane.b32.xlu0 %v4376_v56, %s11125_s17  ;;  %v4624_v56 = vld [vmem:[%s13430_s10 + $0x7c] sm:$0xff] }
 0xe7a   : > { %v4392_v1 = vpop.permute.xlu1 %4391 }
 0xe7b   : > { %v4390_v18 = vpop.permute.xlu0 %4389  ;;  %v4434_v15 = vsel %vm3328_vm3, %v9301_v43, %v4392_v1  ;;  %v10232_v1 = vpack.c.bf16 %v4624_v56, %v4623_v35 }
 0xe7c   : > { %v4433_v49 = vsel %vm3328_vm3, %v4039_v29, %v4390_v18  ;;  %v4625_v18 = vld [vmem:[%s13430_s10 + $0x84] sm:$0xff] }
 0xe7d   : > { %10233 = vmatprep.subr.bf16.mxu0 %v10232_v1 }
 0xe7e   : > { %10235 = vmatpush3.bf16.msra.mxu0 %v10232_v1 }
 0xe88   : > { %v4408_v45 = vpop.permute.xlu1 %4407 }
 0xe89   : > { %v4406_v48 = vpop.permute.xlu0 %4405  ;;  %v4439_v36 = vsel %vm4437_vm5, %v4434_v15, %v4408_v45  ;;  %v4626_v45 = vld [vmem:[%s13430_s10 + $0x8c] sm:$0xff] }
 0xe8a   : > { %v4438_v14 = vsel %vm4437_vm5, %v4433_v49, %v4406_v48  ;;  %v10236_v48 = vpack.c.bf16 %v4626_v45, %v4625_v18  ;;  %v4629_v49 = vld [vmem:[%s13430_s10 + $0x9d] sm:$0xff]  ;;  %v7846_v45 = vld [vmem:[%s13430_s10 + $0xf8] ss:$0 sm:$0xff] }
 0xe8c   : > { %v4396_v53 = vpop.permute.xlu1 %4395  ;;  %10237 = vmatprep.subr.bf16.mxu0 %v10236_v48 }
 0xe8d   : > { %v4394_v9 = vpop.permute.xlu0 %4393  ;;  %v4436_v61 = vsel %vm3328_vm3, %v9304_v31, %v4396_v53  ;;  %10239 = vmatpush3.bf16.msra.mxu0 %v10236_v48  ;;  %v4919_v53 = vld [vmem:[%s13430_s10 + $0xd8] sm:$0xff] }
 0xe8e   : > { %v4435_v23 = vsel %vm3328_vm3, %v4049_v50, %v4394_v9  ;;  %v4920_v9 = vld [vmem:[%s13430_s10 + $0xe0] sm:$0xff] }
 0xe90   : > { %v4412_v7 = vpop.permute.xlu1 %4411 }
 0xe91   : > { %v4410_v34 = vpop.permute.xlu0 %4409  ;;  %v4441_v40 = vsel %vm4437_vm5, %v4436_v61, %v4412_v7  ;;  %v10256_v7 = vpack.c.bf16 %v4920_v9, %v4919_v53 }
 0xe92   : > { %v4440_v10 = vsel %vm4437_vm5, %v4435_v23, %v4410_v34  ;;  %v4628_v34 = vld [vmem:[%s13430_s10 + $0x95] sm:$0xff] }
 0xe93   : > { %10257 = vmatprep.subr.bf16.mxu0 %v10256_v7  ;;  %v10240_v15 = vpack.c.bf16 %v4629_v49, %v4628_v34 }
 0xe94   : > { %v4424_v38 = vpop.permute.xlu1 %4423 }
 0xe95   : > { %v4422_v47 = vpop.permute.xlu0 %4421  ;;  %v4444_v52 = vsel %vm4442_vm6, %v4439_v36, %v4424_v38  ;;  %v4630_v38 = vld [vmem:[%s13430_s10 + $0xa5] sm:$0xff]  ;;  %v4632_v36 = vld [vmem:[%s13430_s10 + $0xb5] sm:$0xff]  ;;  %10241 = vmatprep.subr.bf16.mxu1 %v10240_v15 }
 0xe96   : > { %v4443_v41 = vsel %vm4442_vm6, %v4438_v14, %v4422_v47  ;;  %v4631_v14 = vld [vmem:[%s13430_s10 + $0xad] sm:$0xff] }
 0xe97   : > { %9355 = vmatprep.mubr.msk.f32.mxu1 %vm1226_vm0, %v4443_v41  ;;  %v10244_v47 = vpack.c.bf16 %v4631_v14, %v4630_v38  ;;  %v4633_v41 = vld [vmem:[%s13430_s10 + $0xbd] sm:$0xff] }
 0xe98   : > { %9356 = vmatmul.mubr.msk.f32.vlgmr.msra.gmra.mrb[122].mxu1 %vm1226_vm0, %v4444_v52  ;;  %v4428_v39 = vpop.permute.xlu1 %4427  ;;  %v10248_v52 = vpack.c.bf16 %v4633_v41, %v4632_v36 }
 0xe99   : > { %v4426_v42 = vpop.permute.xlu0 %4425  ;;  %v4446_v8 = vsel %vm4442_vm6, %v4441_v40, %v4428_v39  ;;  %10243 = vmatpush3.bf16.msra.mxu1 %v10240_v15 }
 0xe9a   : > { %v4445_v63 = vsel %vm4442_vm6, %v4440_v10, %v4426_v42  ;;  %10245 = vmatprep.subr.bf16.mxu1 %v10244_v47 }
 0xe9b   : > { %9358 = vmatprep.mubr.msk.f32.mxu1 %vm1226_vm0, %v4445_v63 }
 0xe9c   : > { %9359 = vmatmul.mubr.msk.f32.gmra.mrb[124].mxu1 %vm1226_vm0, %v4446_v8 }
 0xe9d   : > { %10247 = vmatpush3.bf16.msra.mxu1 %v10244_v47 }
 0xe9e   : > { %10249 = vmatprep.subr.bf16.mxu1 %v10248_v52 }
 0xea1   : > { %10251 = vmatpush3.bf16.msra.mxu1 %v10248_v52 }
 0xf6b   : > { %v9357_v27 = vpop.f32.mrb[122].mxu1 }
 0xf6c   : > { %v4535_v0 = vadd.f32 %v9357_v27, %v7827_v11  ;;  %v4529_v59 = vpop.f32.mrb[123].mxu1 }
 0xf6d   : > { %v4530_v24 = vadd.f32 %v7827_v11, %v4529_v59 }
 0xf6e   : > { %v4549_v58 = vadd.f32 %v4535_v0, %v12322_v28 }
 0xf6f   : > { %v4548_v22 = vadd.f32 %v4530_v24, %v12324_v32  ;;  %v9360_v5 = vpop.f32.mrb[124].mxu1 }
 0xf70   : > { %v4539_v26 = vpop.f32.mrb[125].mxu1  ;;  %v4557_v57 = vsel %vm1226_vm0, %v4549_v58, 0.0  ;;  %v4545_v25 = vadd.f32 %v9360_v5, %v7827_v11 }
 0xf71   : > { %v4540_v12 = vadd.f32 %v7827_v11, %v4539_v26  ;;  %4558 = vadd.xlane.f32.xlu1 %v4557_v57  ;;  %v4554_v51 = vsel %vm1226_vm0, %v4548_v22, 0.0  ;;  %v7833_v57 = vld [vmem:[%s13430_s10 + $0x73] ss:$0 sm:$0xff] }
 0xf72   : > { %4555 = vadd.xlane.f32.xlu0 %v4554_v51  ;;  %v4551_v29 = vadd.f32 %v4545_v25, %v12340_v33  ;;  %v4921_v51 = vld [vmem:[%s13430_s10 + $0xe8] sm:$0xff] }
 0xf73   : > { %v4550_v43 = vadd.f32 %v4540_v12, %v12338_v54 }
 0xf74   : > { %v4563_v28 = vsel %vm1226_vm0, %v4551_v29, 0.0 }
 0xf75   : > { %v4560_v31 = vsel %vm1226_vm0, %v4550_v43, 0.0 }
 0xf76   : > { %4561 = vadd.xlane.f32.xlu0 %v4560_v31 }
 0xf7a   : > { %4564 = vadd.xlane.f32.xlu0 %v4563_v28 }
 0xffe   : > { %v4559_v32 = vpop.xlane.xlu1 %4558 }
 0xfff   : > { %v4568_v50 = vmul.f32 0.03125, %v4559_v32  ;;  %v4556_v30 = vpop.xlane.xlu0 %4555 }
0x1000   : > { %v4567_v13 = vmul.f32 0.03125, %v4556_v30 }
0x1001   : > { %v12739_v6 = vsub.f32 %v4549_v58, %v4568_v50  ;;  %v7832_v58 = vld [vmem:[%s13430_s10 + $0x72] ss:$0 sm:$0xff] }
0x1002   : > { %v12741_v21 = vsub.f32 %v4548_v22, %v4567_v13 }
0x1003   : > { %v4562_v44 = vpop.xlane.xlu0 %4561  ;;  %v4576_v54 = vmul.f32 %v12739_v6, %v12739_v6 }
0x1004   : > { %v4569_v37 = vmul.f32 0.03125, %v4562_v44  ;;  %v4575_v33 = vmul.f32 %v12741_v21, %v12741_v21 }
0x1005   : > { %v4582_v17 = vsel %vm1226_vm0, %v4576_v54, 0.0 }
0x1006   : > { %v12748_v62 = vsub.f32 %v4550_v43, %v4569_v37  ;;  %4583 = vadd.xlane.f32.xlu0 %v4582_v17  ;;  %v4579_v60 = vsel %vm1226_vm0, %v4575_v33, 0.0  ;;  %v4922_v43 = vld [vmem:[%s13430_s10 + $0xf0] sm:$0xff]  ;;  %v12828_v37 = vld [vmem:[%s13430_s10 + $0x20] sm:$0xff]  ;;  %v12837_v33 = vld [vmem:[%s13430_s10 + $0x28] sm:$0xff] }
0x1007   : > { %4580 = vadd.xlane.f32.xlu1 %v4579_v60  ;;  %v4565_v16 = vpop.xlane.xlu0 %4564  ;;  %v10260_v50 = vpack.c.bf16 %v4922_v43, %v4921_v51  ;;  %v4634_v17 = vld [vmem:[%s13430_s10 + $0xc5] sm:$0xff] }
0x1008   : > { %v4570_v2 = vmul.f32 0.03125, %v4565_v16  ;;  %v4577_v20 = vmul.f32 %v12748_v62, %v12748_v62  ;;  %v7834_v16 = vld [vmem:[%s13430_s10 + $0x94] ss:$0 sm:$0xff] }
0x100a   : > { %v12753_v55 = vsub.f32 %v4551_v29, %v4570_v2  ;;  %v4585_v3 = vsel %vm1226_vm0, %v4577_v20, 0.0 }
0x100b   : > { %4586 = vadd.xlane.f32.xlu1 %v4585_v3 }
0x100c   : > { %v4578_v46 = vmul.f32 %v12753_v55, %v12753_v55 }
0x100e   : > { %v4588_v19 = vsel %vm1226_vm0, %v4578_v46, 0.0 }
0x100f   : > { %4589 = vadd.xlane.f32.xlu0 %v4588_v19 }
0x1093   : > { %v4584_v23 = vpop.xlane.xlu0 %4583 }
0x1094   : > { %v4592_v39 = vmul.f32 0.03125, %v4584_v23  ;;  %v4581_v61 = vpop.xlane.xlu1 %4580 }
0x1095   : > { %v4591_v10 = vmul.f32 0.03125, %v4581_v61 }
0x1096   : > { %v4596_v42 = vadd.f32 1e-05, %v4592_v39 }
0x1097   : > { %v4595_v40 = vadd.f32 1e-05, %v4591_v10 }
0x1098   : > { %10803 = vrsqrt.f32 %v4596_v42  ;;  %v4587_v63 = vpop.xlane.xlu1 %4586 }
0x1099   : > { %10805 = vrsqrt.f32 %v4595_v40  ;;  %v4593_v8 = vmul.f32 0.03125, %v4587_v63 }
0x109b   : > { %v4597_v11 = vadd.f32 1e-05, %v4593_v8 }
0x109c   : > { %v4590_v27 = vpop.xlane.xlu0 %4589 }
0x109d   : > { %10807 = vrsqrt.f32 %v4597_v11  ;;  %v4594_v0 = vmul.f32 0.03125, %v4590_v27 }
0x109f   : > { %v4598_v59 = vadd.f32 1e-05, %v4594_v0 }
0x10a1   : > { %10809 = vrsqrt.f32 %v4598_v59 }
0x10a2   : > { %v10804_v24 = vpop.eup %10803 }
0x10a3   : > { %v10806_v22 = vpop.eup %10805  ;;  %v4604_v5 = vmul.f32 %v10804_v24, %v12739_v6 }
0x10a4   : > { %v4603_v26 = vmul.f32 %v10806_v22, %v12741_v21 }
0x10a5   : > { %v4612_v25 = vmul.f32 %v7832_v58, %v4604_v5 }
0x10a6   : > { %v4611_v12 = vmul.f32 %v7832_v58, %v4603_v26 }
0x10a7   : > { %v10808_v29 = vpop.eup %10807  ;;  %v12812_v32 = vadd.f32 %v7833_v57, %v4612_v25 }
0x10a8   : > { %v12809_v31 = vadd.f32 %v7833_v57, %v4611_v12  ;;  %v4605_v28 = vmul.f32 %v10808_v29, %v12748_v62  ;;  %v4635_v62 = vld [vmem:[%s13430_s10 + $0xcd] sm:$0xff] }
0x10a9   : > { %v10252_v60 = vpack.c.bf16 %v4635_v62, %v4634_v17 }
0x10aa   : > { %9369 = vmatprep.mubr.msk.f32.mxu0 %vm1226_vm0, %v12809_v31  ;;  %v4613_v30 = vmul.f32 %v7832_v58, %v4605_v28 }
0x10ab   : > { %v10810_v13 = vpop.eup %10809  ;;  %9370 = vmatmul.mubr.msk.f32.vlgmr.msra.gmra.mrb[142].mxu0 %vm1226_vm0, %v12812_v32  ;;  %10253 = vmatprep.subr.bf16.mxu1 %v10252_v60 }
0x10ac   : > { %v12818_v6 = vadd.f32 %v7833_v57, %v4613_v30  ;;  %10259 = vmatpush3.bf16.msra.mxu0 %v10256_v7  ;;  %v4606_v21 = vmul.f32 %v10810_v13, %v12753_v55  ;;  %10255 = vmatpush3.bf16.msra.mxu1 %v10252_v60 }
0x10ad   : > { %10261 = vmatprep.subr.bf16.mxu0 %v10260_v50 }
0x10ae   : > { %9372 = vmatprep.mubr.msk.f32.mxu0 %vm1226_vm0, %v12818_v6  ;;  %v4614_v44 = vmul.f32 %v7832_v58, %v4606_v21 }
0x10b0   : > { %v12823_v54 = vadd.f32 %v7833_v57, %v4614_v44  ;;  %10263 = vmatpush3.bf16.msra.mxu0 %v10260_v50 }
0x10b2   : > { %9373 = vmatmul.mubr.msk.f32.gmra.mrb[144].mxu0 %vm1226_vm0, %v12823_v54 }
0x10b3   : > { %9405 = vmatprep.mubr.msk.f32.mxu0 %vm1226_vm0, %v12828_v37 }
0x10b6   : > { %9406 = vmatmul.mubr.msk.f32.vlgmr.msra.gmra.mrb[146].mxu0 %vm1226_vm0, %v12837_v33 }
0x117e   : > { %v9371_v2 = vpop.f32.mrb[142].mxu0 }
0x117f   : > { %v4725_v20 = vadd.f32 %v9371_v2, %v7834_v16  ;;  %v4719_v55 = vpop.f32.mrb[143].mxu0 }
0x1180   : > { %v4720_v3 = vadd.f32 %v7834_v16, %v4719_v55 }
0x1181   : > { %v4739_v19 = vmax.f32 %v4725_v20, 0.0 }
0x1182   : > { %v4738_v46 = vmax.f32 %v4720_v3, 0.0 }
0x1184   : > { %9391 = vmatprep.mubr.msk.f32.mxu1 %vm1168_vm1, %v4738_v46 }
0x1185   : > { %v9374_v35 = vpop.f32.mrb[144].mxu0  ;;  %9392 = vmatmul.mubr.msk.f32.vlgmr.msra.gmra.mrb[126].mxu1 %vm1168_vm1, %v4739_v19 }
0x1186   : > { %v4729_v56 = vpop.f32.mrb[145].mxu0  ;;  %v4735_v1 = vadd.f32 %v9374_v35, %v7834_v16 }
0x1187   : > { %v4730_v18 = vadd.f32 %v7834_v16, %v4729_v56 }
0x1188   : > { %v4741_v34 = vmax.f32 %v4735_v1, 0.0 }
0x1189   : > { %v4740_v48 = vmax.f32 %v4730_v18, 0.0  ;;  %v9407_v53 = vpop.f32.mrb[146].mxu0 }
0x118a   : > { %v5011_v9 = vadd.f32 %v9407_v53, %v7846_v45  ;;  %v5005_v7 = vpop.f32.mrb[147].mxu0 }
0x118b   : > { %9394 = vmatprep.mubr.msk.f32.mxu1 %vm1168_vm1, %v4740_v48  ;;  %v5006_v49 = vadd.f32 %v7846_v45, %v5005_v7 }
0x118c   : > { %5022 = vrot.lane.b32.xlu1 %v5011_v9, %s11121_s16  ;;  %5018 = vrot.lane.b32.xlu0 %v5011_v9, %s11120_s14 }
0x118d   : > { %9395 = vmatmul.mubr.msk.f32.gmra.mrb[128].mxu1 %vm1168_vm1, %v4741_v34  ;;  %9412 = vmatprep.mubr.msk.f32.mxu0 %vm3328_vm3, %v5006_v49  ;;  %v12862_v38 = vpack.i.bf16 %v5011_v9, %v5006_v49 }
0x1190   : > { %5024 = vrot.lane.b32.xlu0 %v5006_v49, %s11122_s19  ;;  %5016 = vrot.lane.b32.xlu1 %v5006_v49, %s11120_s14 }
0x1194   : > { %10630 = vrot.lane.b32.xlu0 %v12862_v38, %s11118_s22  ;;  %5020 = vrot.lane.b32.xlu1 %v5006_v49, %s11121_s16 }
0x1198   : > { %5026 = vrot.lane.b32.xlu1 %v5011_v9, %s11122_s19 }
0x11fe   : > { %v5023_v15 = vpop.permute.xlu1 %5022  ;;  %v5019_v14 = vpop.permute.xlu0 %5018 }
0x1202   : > { %v5025_v47 = vpop.permute.xlu0 %5024  ;;  %v5017_v36 = vpop.permute.xlu1 %5016 }
0x1203   : > { %v12868_v41 = vpack.i.bf16 %v5019_v14, %v5017_v36  ;;  %9419 = vmatprep.mubr.msk.f32.mxu1 %vm3328_vm3, %v5017_v36 }
0x1205   : > { %10635 = vrot.lane.b32.xlu1 %v12868_v41, %s11118_s22 }
0x1206   : > { %v10631_v52 = vpop.permute.xlu0 %10630  ;;  %v5021_v23 = vpop.permute.xlu1 %5020 }
0x1207   : > { %v10633_v39 = vunpack.i.h.bf16 %v10631_v52  ;;  %v10632_v61 = vunpack.i.l.bf16 %v10631_v52  ;;  %v12873_v10 = vpack.i.bf16 %v5023_v15, %v5021_v23 }
0x1209   : > { %v10264_v42 = vpack.c.bf16 %v10633_v39, %v10632_v61  ;;  %10640 = vrot.lane.b32.xlu0 %v12873_v10, %s11118_s22 }
0x120a   : > { %v5027_v40 = vpop.permute.xlu1 %5026 }
0x120b   : > { %v12877_v63 = vpack.i.bf16 %v5027_v40, %v5025_v47  ;;  %10266 = vmatprep.subr.msk.bf16.mxu0 %vm12434_vm4, %v10264_v42 }
0x120c   : > { %10269 = vmatpush3.bf16.xpose.msk.msra.mxu0 %vm12434_vm4, %v10264_v42 }
0x120d   : > { %10645 = vrot.lane.b32.xlu1 %v12877_v63, %s11118_s22 }
0x1213   : > { %9413 = vmatmul.mubr.msk.f32.vlgmr.msra.gmra.mrb[148].mxu0 %vm3328_vm3, %v5011_v9 }
0x1214   : > { %9426 = vmatprep.mubr.msk.f32.mxu0 %vm3328_vm3, %v5021_v23 }
0x1258   : > { %v12887_v8 = vpop.f32.mrb[126].mxu1 }
0x1259   : > { %v12889_v11 = vpop.f32.mrb[127].mxu1 }
0x1260   : > { %v12891_v27 = vpop.f32.mrb[128].mxu1 }
0x1261   : > { %v12893_v0 = vpop.f32.mrb[129].mxu1 }
0x1277   : > { %v10636_v59 = vpop.permute.xlu1 %10635 }
0x1278   : > { %v10638_v24 = vunpack.i.h.bf16 %v10636_v59  ;;  %v10637_v58 = vunpack.i.l.bf16 %v10636_v59 }
0x127a   : > { %v10270_v22 = vpack.c.bf16 %v10638_v24, %v10637_v58 }
0x127b   : > { %v10641_v5 = vpop.permute.xlu0 %10640 }
0x127c   : > { %v10643_v26 = vunpack.i.h.bf16 %v10641_v5  ;;  %v10642_v57 = vunpack.i.l.bf16 %v10641_v5  ;;  %10272 = vmatprep.subr.msk.bf16.mxu1 %vm12434_vm4, %v10270_v22 }
0x127d   : > { %10275 = vmatpush3.bf16.xpose.msk.msra.mxu1 %vm12434_vm4, %v10270_v22 }
0x127e   : > { %v10276_v25 = vpack.c.bf16 %v10643_v26, %v10642_v57 }
0x127f   : > { %v10646_v12 = vpop.permute.xlu1 %10645 }
0x1280   : > { %v10648_v51 = vunpack.i.h.bf16 %v10646_v12  ;;  %v10647_v43 = vunpack.i.l.bf16 %v10646_v12  ;;  %10278 = vmatprep.subr.msk.bf16.mxu0 %vm12434_vm4, %v10276_v25 }
0x1281   : > { %10281 = vmatpush3.bf16.xpose.msk.msra.mxu0 %vm12434_vm4, %v10276_v25 }
0x1282   : > { %v10282_v29 = vpack.c.bf16 %v10648_v51, %v10647_v43 }
0x1284   : > { %9420 = vmatmul.mubr.msk.f32.vlgmr.msra.gmra.mrb[130].mxu1 %vm3328_vm3, %v5019_v14  ;;  %10284 = vmatprep.subr.msk.bf16.mxu1 %vm12434_vm4, %v10282_v29 }
0x1285   : > { %10287 = vmatpush3.bf16.xpose.msk.msra.mxu1 %vm12434_vm4, %v10282_v29  ;;  %9433 = vmatprep.mubr.msk.f32.mxu1 %vm3328_vm3, %v5025_v47 }
0x1288   : > { %9427 = vmatmul.mubr.msk.f32.vlgmr.msra.gmra.mrb[150].mxu0 %vm3328_vm3, %v5023_v15 }
0x128c   : > { %9434 = vmatmul.mubr.msk.f32.vlgmr.msra.gmra.mrb[132].mxu1 %vm3328_vm3, %v5027_v40 }
0x12e6   : > { %v9414_v28 = vpop.f32.mrb[148].mxu0 }
0x12e7   : > { %v5377_v50 = vmul.f32 0.35355338, %v9414_v28  ;;  %v5106_v30 = vpop.f32.mrb[149].mxu0 }
0x12e8   : > { %v5376_v13 = vmul.f32 0.35355338, %v5106_v30 }
0x12e9   : > { %v5387_v21 = vsel %vm4437_vm5, %v5377_v50, -inf }
0x12ea   : > { %5388 = vmax.xlane.f32.xlu1 %v5387_v21  ;;  %v5384_v44 = vsel %vm4437_vm5, %v5376_v13, -inf }
0x12eb   : > { %5385 = vmax.xlane.f32.xlu0 %v5384_v44 }
0x1357   : > { %v9421_v17 = vpop.f32.mrb[130].mxu1 }
0x1358   : > { %v5379_v62 = vmul.f32 0.35355338, %v9421_v17  ;;  %v5193_v60 = vpop.f32.mrb[131].mxu1 }
0x1359   : > { %v5378_v16 = vmul.f32 0.35355338, %v5193_v60 }
0x135a   : > { %v5393_v2 = vsel %vm4437_vm5, %v5379_v62, -inf }
0x135b   : > { %v9428_v20 = vpop.f32.mrb[150].mxu0  ;;  %5394 = vmax.xlane.f32.xlu0 %v5393_v2  ;;  %v5390_v19 = vsel %vm4437_vm5, %v5378_v16, -inf }
0x135c   : > { %v5280_v55 = vpop.f32.mrb[151].mxu0  ;;  %v5381_v46 = vmul.f32 0.35355338, %v9428_v20 }
0x135d   : > { %v5380_v3 = vmul.f32 0.35355338, %v5280_v55 }
0x135e   : > { %v5399_v48 = vsel %vm4437_vm5, %v5381_v46, -inf }
0x135f   : > { %5391 = vmax.xlane.f32.xlu0 %v5390_v19  ;;  %v9435_v35 = vpop.f32.mrb[132].mxu1  ;;  %v5396_v56 = vsel %vm4437_vm5, %v5380_v3, -inf }
0x1360   : > { %5397 = vmax.xlane.f32.xlu1 %v5396_v56  ;;  %v5367_v1 = vpop.f32.mrb[133].mxu1  ;;  %v5383_v45 = vmul.f32 0.35355338, %v9435_v35 }
0x1361   : > { %v12916_v18 = vmul.f32 0.35355338, %v5367_v1 }
0x1362   : > { %v5405_v9 = vsel %vm4437_vm5, %v5383_v45, -inf }
0x1363   : > { %5400 = vmax.xlane.f32.xlu0 %v5399_v48  ;;  %v5402_v53 = vsel %vm4437_vm5, %v12916_v18, -inf }
0x1364   : > { %5403 = vmax.xlane.f32.xlu1 %v5402_v53 }
0x1367   : > { %5406 = vmax.xlane.f32.xlu0 %v5405_v9 }
0x1375   : > { %10650 = vrot.lane.b32.xlu1 %v12862_v38, %s11119_s23 }
0x1377   : > { %v5389_v7 = vpop.xlane.xlu1 %5388 }
0x1378   : > { %v5409_v34 = vsub.f32 %v5377_v50, %v5389_v7  ;;  %v5386_v15 = vpop.xlane.xlu0 %5385 }
0x1379   : > { %v5408_v14 = vsub.f32 %v5376_v13, %v5386_v15 }
0x137a   : > { %v5418_v49 = vmul.f32 1.442695, %v5409_v34 }
0x137b   : > { %v5416_v36 = vmul.f32 1.442695, %v5408_v14 }
0x137c   : > { %10811 = vpow2.f32 %v5418_v49 }
0x137d   : > { %10813 = vpow2.f32 %v5416_v36 }
0x1386   : > { %v12924_v47 = vpop.eup %10811 }
0x1387   : > { %v5435_v52 = vsel %vm4437_vm5, %v12924_v47, 0.0  ;;  %v10814_v23 = vpop.eup %10813 }
0x1388   : > { %5436 = vadd.xlane.f32.xlu0 %v5435_v52  ;;  %v5432_v39 = vsel %vm4437_vm5, %v10814_v23, 0.0 }
0x1399   : > { %5433 = vadd.xlane.f32.xlu1 %v5432_v39 }
0x13e8   : > { %v5395_v61 = vpop.xlane.xlu0 %5394 }
0x13e9   : > { %v5411_v38 = vsub.f32 %v5379_v62, %v5395_v61 }
0x13eb   : > { %v5422_v42 = vmul.f32 1.442695, %v5411_v38 }
0x13ec   : > { %v5392_v40 = vpop.xlane.xlu0 %5391 }
0x13ed   : > { %10815 = vpow2.f32 %v5422_v42  ;;  %v5410_v59 = vsub.f32 %v5378_v16, %v5392_v40  ;;  %v5398_v24 = vpop.xlane.xlu1 %5397 }
0x13ee   : > { %v5412_v58 = vsub.f32 %v5380_v3, %v5398_v24 }
0x13ef   : > { %v5420_v22 = vmul.f32 1.442695, %v5410_v59 }
0x13f0   : > { %v5424_v5 = vmul.f32 1.442695, %v5412_v58  ;;  %v5401_v26 = vpop.xlane.xlu0 %5400 }
0x13f1   : > { %10817 = vpow2.f32 %v5420_v22  ;;  %v5413_v57 = vsub.f32 %v5381_v46, %v5401_v26  ;;  %v5404_v25 = vpop.xlane.xlu1 %5403 }
0x13f2   : > { %10819 = vpow2.f32 %v5424_v5  ;;  %v5414_v46 = vsub.f32 %v12916_v18, %v5404_v25 }
0x13f3   : > { %v5426_v12 = vmul.f32 1.442695, %v5413_v57 }
0x13f4   : > { %v5407_v51 = vpop.xlane.xlu0 %5406  ;;  %v5428_v35 = vmul.f32 1.442695, %v5414_v46 }
0x13f5   : > { %10821 = vpow2.f32 %v5426_v12  ;;  %v5415_v43 = vsub.f32 %v5383_v45, %v5407_v51  ;;  %v10651_v29 = vpop.permute.xlu1 %10650 }
0x13f6   : > { %v10653_v28 = vunpack.i.h.bf16 %v10651_v29  ;;  %v10652_v50 = vunpack.i.l.bf16 %v10651_v29 }
0x13f7   : > { %v12929_v30 = vpop.eup %10815  ;;  %v5430_v13 = vmul.f32 1.442695, %v5415_v43 }
0x13f8   : > { %v10288_v21 = vpack.c.bf16 %v10653_v28, %v10652_v50  ;;  %v5441_v44 = vsel %vm4437_vm5, %v12929_v30, 0.0 }
0x13f9   : > { %10823 = vpow2.f32 %v5430_v13  ;;  %5442 = vadd.xlane.f32.xlu0 %v5441_v44  ;;  %v4924_v13 = vld [vmem:[%s13430_s10 + $0xf9] sm:$0xff]  ;;  %v4926_v44 = vld [vmem:[%s13430_s10 + $0x109] sm:$0xff] }
0x13fa   : > { %10289 = vmatprep.subr.bf16.mxu0 %v10288_v21 }
0x13fb   : > { %v10818_v17 = vpop.eup %10817  ;;  %10291 = vmatpush3.bf16.msra.mxu0 %v10288_v21  ;;  %v4925_v21 = vld [vmem:[%s13430_s10 + $0x101] sm:$0xff] }
0x13fc   : > { %v5438_v62 = vsel %vm4437_vm5, %v10818_v17, 0.0  ;;  %v10820_v60 = vpop.eup %10819 }
0x13fd   : > { %5439 = vadd.xlane.f32.xlu1 %v5438_v62  ;;  %v5444_v20 = vsel %vm4437_vm5, %v10820_v60, 0.0  ;;  %v4927_v62 = vld [vmem:[%s13430_s10 + $0x111] sm:$0xff] }
0x13ff   : > { %v10822_v16 = vpop.eup %10821 }
0x1400   : > { %v5447_v2 = vsel %vm4437_vm5, %v10822_v16, 0.0 }
0x1401   : > { %5448 = vadd.xlane.f32.xlu0 %v5447_v2  ;;  %5445 = vadd.xlane.f32.xlu1 %v5444_v20 }
0x1403   : > { %v12936_v55 = vpop.eup %10823 }
0x1404   : > { %v5453_v3 = vsel %vm4437_vm5, %v12936_v55, 0.0 }
0x1405   : > { %5454 = vadd.xlane.f32.xlu0 %v5453_v3 }
0x1412   : > { %10660 = vrot.lane.b32.xlu1 %v12873_v10, %s11119_s23 }
0x1415   : > { %v5437_v19 = vpop.xlane.xlu0 %5436 }
0x1416   : > { %10825 = vrcp.f32 %v5437_v19  ;;  %v7839_v19 = vld [vmem:[%s13430_s10 + $0xd5] ss:$0 sm:$0xff] }
0x141b   : > { %10655 = vrot.lane.b32.xlu0 %v12868_v41, %s11119_s23 }
0x1420   : > { %v10826_v1 = vpop.eup %10825 }
0x1421   : > { %v5459_v9 = vmul.f32 %v10826_v1, %v12924_v47 }
0x1426   : > { %v5434_v56 = vpop.xlane.xlu1 %5433 }
0x1427   : > { %10827 = vrcp.f32 %v5434_v56  ;;  %v4830_v56 = vadd.f32 %v12887_v8, %v7839_v19 }
0x1428   : > { %10829 = vpow2.f32 %v5428_v35  ;;  %v4825_v35 = vadd.f32 %v7839_v19, %v12889_v11 }
0x142a   : > { %v4843_v1 = vadd.f32 %v4825_v35, %v12809_v31 }
0x1431   : > { %v10828_v45 = vpop.eup %10827 }
0x1432   : > { %v10830_v48 = vpop.eup %10829  ;;  %v5457_v53 = vmul.f32 %v10828_v45, %v10814_v23  ;;  %v4835_v45 = vadd.f32 %v7839_v19, %v12893_v0 }
0x1433   : > { %v5450_v41 = vsel %vm4437_vm5, %v10830_v48, 0.0 }
0x1434   : > { %9440 = vmatprep.mubr.msk.f32.mxu0 %vm4437_vm5, %v5457_v53  ;;  %v4840_v53 = vadd.f32 %v12891_v27, %v7839_v19 }
0x1435   : > { %9441 = vmatmul.mubr.msk.f32.vlgmr.msra.gmra.mrb[152].mxu0 %vm4437_vm5, %v5459_v9  ;;  %v4845_v9 = vadd.f32 %v4835_v45, %v12818_v6 }
0x1436   : > { %5451 = vadd.xlane.f32.xlu1 %v5450_v41  ;;  %v4849_v41 = vsel %vm1226_vm0, %v4843_v1, 0.0 }
0x1437   : > { %v4855_v11 = vsel %vm1226_vm0, %v4845_v9, 0.0 }
0x1447   : > { %10665 = vrot.lane.b32.xlu1 %v12877_v63, %s11119_s23 }
0x1486   : > { %v5443_v10 = vpop.xlane.xlu0 %5442 }
0x148a   : > { %v5440_v18 = vpop.xlane.xlu1 %5439 }
0x148b   : > { %10831 = vrcp.f32 %v5440_v18 }
0x148c   : > { %10833 = vrcp.f32 %v5443_v10  ;;  %v4846_v10 = vadd.f32 %v4840_v53, %v12823_v54 }
0x148e   : > { %v5449_v7 = vpop.xlane.xlu0 %5448  ;;  %v5446_v34 = vpop.xlane.xlu1 %5445  ;;  %v4858_v31 = vsel %vm1226_vm0, %v4846_v10, 0.0 }
0x148f   : > { %10835 = vrcp.f32 %v5449_v7 }
0x1490   : > { %10837 = vrcp.f32 %v5446_v34 }
0x1492   : > { %v5455_v49 = vpop.xlane.xlu0 %5454  ;;  %v10661_v15 = vpop.permute.xlu1 %10660 }
0x1493   : > { %v10663_v14 = vunpack.i.h.bf16 %v10661_v15  ;;  %v10662_v47 = vunpack.i.l.bf16 %v10661_v15  ;;  %10839 = vrcp.f32 %v5455_v49 }
0x1495   : > { %v10832_v36 = vpop.eup %10831  ;;  %v10296_v52 = vpack.c.bf16 %v10663_v14, %v10662_v47 }
0x1496   : > { %v10656_v23 = vpop.permute.xlu0 %10655  ;;  %v5461_v39 = vmul.f32 %v10832_v36, %v10818_v17  ;;  %v10834_v63 = vpop.eup %10833  ;;  %v10304_v17 = vpack.c.bf16 %v4925_v21, %v4924_v13 }
0x1497   : > { %v10658_v61 = vunpack.i.h.bf16 %v10656_v23  ;;  %v10657_v38 = vunpack.i.l.bf16 %v10656_v23  ;;  %10297 = vmatprep.subr.bf16.mxu0 %v10296_v52  ;;  %v5463_v22 = vmul.f32 %v10834_v63, %v12929_v30  ;;  %v7873_v63 = vld [vmem:[%s13430_s10 + $0x119] ss:$0 sm:$0xff] }
0x1498   : > { %9447 = vmatprep.mubr.msk.f32.mxu1 %vm4437_vm5, %v5461_v39  ;;  %10299 = vmatpush3.bf16.msra.mxu0 %v10296_v52 }
0x1499   : > { %v10836_v42 = vpop.eup %10835  ;;  %v10292_v40 = vpack.c.bf16 %v10658_v61, %v10657_v38  ;;  %10305 = vmatprep.subr.bf16.mxu0 %v10304_v17 }
0x149a   : > { %v10838_v59 = vpop.eup %10837  ;;  %v5467_v24 = vmul.f32 %v10836_v42, %v10822_v16 }
0x149b   : > { %10293 = vmatprep.subr.bf16.mxu1 %v10292_v40  ;;  %v5465_v58 = vmul.f32 %v10838_v59, %v10820_v60  ;;  %v10308_v60 = vpack.c.bf16 %v4927_v62, %v4926_v44  ;;  %v6068_v62 = vld [vmem:[%s13430_s10 + $0x145] sm:$0xff] }
0x149c   : > { %10295 = vmatpush3.bf16.msra.mxu1 %v10292_v40 }
0x149d   : > { %9454 = vmatprep.mubr.msk.f32.mxu0 %vm4437_vm5, %v5465_v58  ;;  %v10840_v51 = vpop.eup %10839 }
0x149e   : > { %9455 = vmatmul.mubr.msk.f32.vlgmr.msra.gmra.mrb[154].mxu0 %vm4437_vm5, %v5467_v24  ;;  %v5471_v28 = vmul.f32 %v10840_v51, %v12936_v55 }
0x149f   : > { %9448 = vmatmul.mubr.msk.f32.vlgmr.msra.gmra.mrb[134].mxu1 %vm4437_vm5, %v5463_v22  ;;  %10307 = vmatpush3.bf16.msra.mxu0 %v10304_v17  ;;  %v6067_v17 = vld [vmem:[%s13430_s10 + $0x13d] sm:$0xff] }
0x14a0   : > { %10309 = vmatprep.subr.bf16.mxu0 %v10308_v60 }
0x14a3   : > { %10311 = vmatpush3.bf16.msra.mxu0 %v10308_v60  ;;  %v10320_v60 = vpack.c.bf16 %v6068_v62, %v6067_v17  ;;  %v7877_v17 = vld [vmem:[%s13430_s10 + $0x11b] ss:$0 sm:$0xff] }
0x14a5   : > { %10321 = vmatprep.subr.bf16.mxu0 %v10320_v60 }
0x14c3   : > { %v5452_v5 = vpop.xlane.xlu1 %5451 }
0x14c4   : > { %10841 = vrcp.f32 %v5452_v5 }
0x14c7   : > { %v10666_v26 = vpop.permute.xlu1 %10665 }
0x14c8   : > { %v10668_v57 = vunpack.i.h.bf16 %v10666_v26  ;;  %v10667_v25 = vunpack.i.l.bf16 %v10666_v26 }
0x14ca   : > { %v10300_v12 = vpack.c.bf16 %v10668_v57, %v10667_v25 }
0x14cc   : > { %10301 = vmatprep.subr.bf16.mxu1 %v10300_v12 }
0x14cd   : > { %10303 = vmatpush3.bf16.msra.mxu1 %v10300_v12 }
0x14ce   : > { %v10842_v43 = vpop.eup %10841 }
0x14cf   : > { %v5469_v29 = vmul.f32 %v10842_v43, %v10830_v48  ;;  %v4844_v48 = vadd.f32 %v4830_v56, %v12812_v32 }
0x14d1   : > { %9461 = vmatprep.mubr.msk.f32.mxu1 %vm4437_vm5, %v5469_v29  ;;  %v4852_v18 = vsel %vm1226_vm0, %v4844_v48, 0.0 }
0x14d2   : > { %9462 = vmatmul.mubr.msk.f32.vlgmr.msra.gmra.mrb[136].mxu1 %vm4437_vm5, %v5471_v28 }
0x1508   : > { %v9442_v50 = vpop.f32.mrb[152].mxu0 }
0x1509   : > { %v5550_v30 = vpop.f32.mrb[153].mxu0 }
0x1571   : > { %v9456_v16 = vpop.f32.mrb[154].mxu0 }
0x1572   : > { %v5724_v2 = vpop.f32.mrb[155].mxu0  ;;  %v9449_v20 = vpop.f32.mrb[134].mxu1 }
0x1573   : > { %5824 = vrot.lane.b32.xlu1 %v9449_v20, %s11123_s12  ;;  %v5637_v55 = vpop.f32.mrb[135].mxu1 }
0x1574   : > { %5822 = vrot.lane.b32.xlu0 %v5637_v55, %s11123_s12 }
0x1577   : > { %5832 = vrot.lane.b32.xlu1 %v9456_v16, %s11124_s11  ;;  %v6069_v16 = vld [vmem:[%s13430_s10 + $0x14d] sm:$0xff] }
0x1578   : > { %5830 = vrot.lane.b32.xlu0 %v5724_v2, %s11124_s11  ;;  %v6070_v2 = vld [vmem:[%s13430_s10 + $0x155] sm:$0xff] }
0x1579   : > { %v10324_v20 = vpack.c.bf16 %v6070_v2, %v6069_v16 }
0x15a5   : > { %v9463_v3 = vpop.f32.mrb[136].mxu1 }
0x15a6   : > { %v5811_v46 = vpop.f32.mrb[137].mxu1  ;;  %5840 = vrot.lane.b32.xlu1 %v9463_v3, %s11125_s17 }
0x15a7   : > { %5838 = vrot.lane.b32.xlu0 %v5811_v46, %s11125_s17 }
0x15c6   : > { %4850 = vadd.xlane.f32.xlu0 %v4849_v41 }
0x15ca   : > { %4853 = vadd.xlane.f32.xlu1 %v4852_v18  ;;  %4856 = vadd.xlane.f32.xlu0 %v4855_v11 }
0x15ce   : > { %4859 = vadd.xlane.f32.xlu0 %v4858_v31 }
0x15e5   : > { %v5825_v8 = vpop.permute.xlu1 %5824 }
0x15e6   : > { %v5823_v32 = vpop.permute.xlu0 %5822  ;;  %v5845_v34 = vsel %vm3328_vm3, %v9442_v50, %v5825_v8 }
0x15e7   : > { %v5844_v6 = vsel %vm3328_vm3, %v5550_v30, %v5823_v32 }
0x15e9   : > { %v5833_v0 = vpop.permute.xlu1 %5832 }
0x15ea   : > { %v5831_v27 = vpop.permute.xlu0 %5830  ;;  %v5847_v15 = vsel %vm4437_vm5, %v5845_v34, %v5833_v0 }
0x15eb   : > { %v5846_v54 = vsel %vm4437_vm5, %v5844_v6, %v5831_v27 }
0x1618   : > { %v5841_v7 = vpop.permute.xlu1 %5840 }
0x1619   : > { %v5839_v49 = vpop.permute.xlu0 %5838  ;;  %v5849_v47 = vsel %vm4442_vm6, %v5847_v15, %v5841_v7 }
0x161a   : > { %v5848_v14 = vsel %vm4442_vm6, %v5846_v54, %v5839_v49  ;;  %v7844_v54 = vld [vmem:[%s13430_s10 + $0xd6] ss:$0 sm:$0xff] }
0x161b   : > { %9472 = vmatprep.mubr.msk.f32.mxu0 %vm1226_vm0, %v5848_v14 }
0x161c   : > { %9473 = vmatmul.mubr.msk.f32.vlgmr.msra.gmra.mrb[156].mxu0 %vm1226_vm0, %v5849_v47  ;;  %v7845_v47 = vld [vmem:[%s13430_s10 + $0xd7] ss:$0 sm:$0xff] }
0x161d   : > { %10323 = vmatpush3.bf16.msra.mxu0 %v10320_v60 }
0x161e   : > { %10325 = vmatprep.subr.bf16.mxu0 %v10324_v20 }
0x1621   : > { %10327 = vmatpush3.bf16.msra.mxu0 %v10324_v20  ;;  %v7881_v20 = vld [vmem:[%s13430_s10 + $0x15d] ss:$0 sm:$0xff] }
0x1653   : > { %v4851_v36 = vpop.xlane.xlu0 %4850 }
0x1654   : > { %v4861_v61 = vmul.f32 0.03125, %v4851_v36 }
0x1656   : > { %v13005_v22 = vsub.f32 %v4843_v1, %v4861_v61 }
0x1657   : > { %v4857_v52 = vpop.xlane.xlu0 %4856  ;;  %v4854_v23 = vpop.xlane.xlu1 %4853 }
0x1658   : > { %v4862_v39 = vmul.f32 0.03125, %v4854_v23  ;;  %v4863_v5 = vmul.f32 0.03125, %v4857_v52  ;;  %v4869_v50 = vmul.f32 %v13005_v22, %v13005_v22 }
0x165a   : > { %v13003_v40 = vsub.f32 %v4844_v48, %v4862_v39  ;;  %v13014_v29 = vsub.f32 %v4845_v9, %v4863_v5  ;;  %v4873_v30 = vsel %vm1226_vm0, %v4869_v50, 0.0  ;;  %v5978_v5 = vld [vmem:[%s13430_s10 + $0x124] sm:$0xff] }
0x165b   : > { %v4860_v38 = vpop.xlane.xlu0 %4859 }
0x165c   : > { %v4864_v59 = vmul.f32 0.03125, %v4860_v38  ;;  %v4870_v43 = vmul.f32 %v13003_v40, %v13003_v40  ;;  %v4871_v13 = vmul.f32 %v13014_v29, %v13014_v29 }
0x165e   : > { %v13009_v12 = vsub.f32 %v4846_v10, %v4864_v59  ;;  %v4879_v44 = vsel %vm1226_vm0, %v4871_v13, 0.0 }
0x16ef   : > { %v9474_v42 = vpop.f32.mrb[156].mxu0 }
0x16f0   : > { %v5932_v24 = vadd.f32 %v9474_v42, %v7873_v63  ;;  %v5926_v58 = vpop.f32.mrb[157].mxu0 }
0x16f1   : > { %v5927_v26 = vadd.f32 %v7873_v63, %v5926_v58 }
0x16f2   : > { %v5936_v57 = vadd.f32 %v5932_v24, %v12837_v33  ;;  %v4876_v33 = vsel %vm1226_vm0, %v4870_v43, 0.0 }
0x16f3   : > { %v5935_v25 = vadd.f32 %v5927_v26, %v12828_v37  ;;  %v4872_v37 = vmul.f32 %v13009_v12, %v13009_v12 }
0x16f4   : > { %v5942_v51 = vsel %vm1226_vm0, %v5936_v57, 0.0 }
0x16f5   : > { %5943 = vadd.xlane.f32.xlu0 %v5942_v51  ;;  %v5939_v28 = vsel %vm1226_vm0, %v5935_v25, 0.0  ;;  %v4882_v21 = vsel %vm1226_vm0, %v4872_v37, 0.0 }
0x16f6   : > { %5940 = vadd.xlane.f32.xlu1 %v5939_v28 }
0x16f9   : > { %4877 = vadd.xlane.f32.xlu0 %v4876_v33 }
0x16fa   : > { %4874 = vadd.xlane.f32.xlu1 %v4873_v30  ;;  %v7876_v30 = vld [vmem:[%s13430_s10 + $0x11a] ss:$0 sm:$0xff] }
0x16fd   : > { %4883 = vadd.xlane.f32.xlu0 %v4882_v21 }
0x16fe   : > { %4880 = vadd.xlane.f32.xlu1 %v4879_v44 }
0x1782   : > { %v5944_v55 = vpop.xlane.xlu0 %5943 }
0x1783   : > { %v5946_v3 = vmul.f32 0.03125, %v5944_v55  ;;  %v5941_v46 = vpop.xlane.xlu1 %5940 }
0x1784   : > { %v5945_v19 = vmul.f32 0.03125, %v5941_v46 }
0x1785   : > { %v13039_v35 = vsub.f32 %v5936_v57, %v5946_v3  ;;  %v5979_v57 = vld [vmem:[%s13430_s10 + $0x12c] sm:$0xff] }
0x1786   : > { %v13041_v56 = vsub.f32 %v5935_v25, %v5945_v19  ;;  %v4878_v1 = vpop.xlane.xlu0 %4877  ;;  %v5980_v25 = vld [vmem:[%s13430_s10 + $0x134] sm:$0xff] }
0x1787   : > { %v4886_v45 = vmul.f32 0.03125, %v4878_v1  ;;  %v4875_v48 = vpop.xlane.xlu1 %4874  ;;  %v5950_v53 = vmul.f32 %v13039_v35, %v13039_v35 }
0x1788   : > { %v4885_v9 = vmul.f32 0.03125, %v4875_v48  ;;  %v5949_v41 = vmul.f32 %v13041_v56, %v13041_v56 }
0x1789   : > { %v4890_v10 = vadd.f32 1e-05, %v4886_v45  ;;  %v5954_v18 = vsel %vm1226_vm0, %v5950_v53, 0.0 }
0x178a   : > { %v4889_v11 = vadd.f32 1e-05, %v4885_v9  ;;  %5955 = vadd.xlane.f32.xlu0 %v5954_v18  ;;  %v4884_v31 = vpop.xlane.xlu0 %4883  ;;  %v5951_v8 = vsel %vm1226_vm0, %v5949_v41, 0.0 }
0x178b   : > { %10843 = vrsqrt.f32 %v4890_v10  ;;  %v4888_v32 = vmul.f32 0.03125, %v4884_v31  ;;  %5952 = vadd.xlane.f32.xlu1 %v5951_v8  ;;  %v4881_v0 = vpop.xlane.xlu1 %4880 }
0x178c   : > { %10845 = vrsqrt.f32 %v4889_v11  ;;  %v4887_v27 = vmul.f32 0.03125, %v4881_v0 }
0x178d   : > { %v4892_v6 = vadd.f32 1e-05, %v4888_v32 }
0x178e   : > { %v4891_v7 = vadd.f32 1e-05, %v4887_v27 }
0x178f   : > { %10847 = vrsqrt.f32 %v4892_v6 }
0x1790   : > { %10849 = vrsqrt.f32 %v4891_v7 }
0x1795   : > { %v10844_v34 = vpop.eup %10843 }
0x1796   : > { %v10846_v49 = vpop.eup %10845  ;;  %v4898_v15 = vmul.f32 %v10844_v34, %v13003_v40 }
0x1797   : > { %v4897_v14 = vmul.f32 %v10846_v49, %v13005_v22  ;;  %v5977_v22 = vld [vmem:[%s13430_s10 + $0x11c] sm:$0xff] }
0x1798   : > { %v4906_v36 = vmul.f32 %v7844_v54, %v4898_v15  ;;  %v10312_v26 = vpack.c.bf16 %v5978_v5, %v5977_v22 }
0x1799   : > { %v10848_v52 = vpop.eup %10847  ;;  %v4905_v23 = vmul.f32 %v7844_v54, %v4897_v14 }
0x179a   : > { %v10850_v39 = vpop.eup %10849  ;;  %v4900_v61 = vmul.f32 %v10848_v52, %v13009_v12  ;;  %v4914_v42 = vadd.f32 %v7845_v47, %v4906_v36  ;;  %10313 = vmatprep.subr.bf16.mxu1 %v10312_v26  ;;  %v10316_v12 = vpack.c.bf16 %v5980_v25, %v5979_v57  ;;  %v7878_v36 = vld [vmem:[%s13430_s10 + $0x13c] ss:$0 sm:$0xff] }
0x179b   : > { %v4913_v38 = vadd.f32 %v7845_v47, %v4905_v23  ;;  %v4899_v63 = vmul.f32 %v10850_v39, %v13014_v29  ;;  %10315 = vmatpush3.bf16.msra.mxu1 %v10312_v26 }
0x179c   : > { %v4908_v59 = vmul.f32 %v7844_v54, %v4900_v61  ;;  %10317 = vmatprep.subr.bf16.mxu1 %v10316_v12 }
0x179d   : > { %9494 = vmatprep.mubr.msk.f32.mxu0 %vm1226_vm0, %v4913_v38  ;;  %v4907_v40 = vmul.f32 %v7844_v54, %v4899_v63 }
0x179e   : > { %9495 = vmatmul.mubr.msk.f32.vlgmr.msra.gmra.mrb[158].mxu0 %vm1226_vm0, %v4914_v42  ;;  %v4916_v58 = vadd.f32 %v7845_v47, %v4908_v59 }
0x179f   : > { %v4915_v24 = vadd.f32 %v7845_v47, %v4907_v40  ;;  %10319 = vmatpush3.bf16.msra.mxu1 %v10316_v12 }
0x17a1   : > { %9497 = vmatprep.mubr.msk.f32.mxu0 %vm1226_vm0, %v4915_v24 }
0x17a2   : > { %9498 = vmatmul.mubr.msk.f32.gmra.mrb[160].mxu0 %vm1226_vm0, %v4916_v58 }
0x1817   : > { %v5956_v51 = vpop.xlane.xlu0 %5955 }
0x1818   : > { %v5958_v43 = vmul.f32 0.03125, %v5956_v51  ;;  %v5953_v29 = vpop.xlane.xlu1 %5952 }
0x1819   : > { %v5957_v28 = vmul.f32 0.03125, %v5953_v29 }
0x181a   : > { %v5960_v50 = vadd.f32 1e-05, %v5958_v43 }
0x181b   : > { %v5959_v33 = vadd.f32 1e-05, %v5957_v28 }
0x181c   : > { %10851 = vrsqrt.f32 %v5960_v50 }
0x181d   : > { %10853 = vrsqrt.f32 %v5959_v33 }
0x1826   : > { %v10852_v37 = vpop.eup %10851 }
0x1827   : > { %v10854_v13 = vpop.eup %10853  ;;  %v5964_v21 = vmul.f32 %v10852_v37, %v13039_v35 }
0x1828   : > { %v5963_v44 = vmul.f32 %v10854_v13, %v13041_v56 }
0x1829   : > { %v5970_v62 = vmul.f32 %v7876_v30, %v5964_v21 }
0x182a   : > { %v5969_v60 = vmul.f32 %v7876_v30, %v5963_v44 }
0x182b   : > { %v13085_v2 = vadd.f32 %v7877_v17, %v5970_v62 }
0x182c   : > { %v13083_v16 = vadd.f32 %v7877_v17, %v5969_v60 }
0x182e   : > { %9483 = vmatprep.mubr.msk.f32.mxu1 %vm1226_vm0, %v13083_v16 }
0x182f   : > { %9484 = vmatmul.mubr.msk.f32.vlgmr.msra.gmra.mrb[138].mxu1 %vm1226_vm0, %v13085_v2 }
0x1871   : > { %v9496_v55 = vpop.f32.mrb[158].mxu0 }
0x1872   : > { %v6160_v3 = vadd.f32 %v9496_v55, %v7881_v20  ;;  %v6154_v46 = vpop.f32.mrb[159].mxu0 }
0x1873   : > { %v6155_v19 = vadd.f32 %v7881_v20, %v6154_v46 }
0x1875   : > { %v9499_v35 = vpop.f32.mrb[160].mxu0  ;;  %v13094_v56 = vpack.i.bf16 %v6160_v3, %v6155_v19  ;;  %v10328_v1 = vpack.c.bf16 %v6160_v3, %v6155_v19 }
0x1876   : > { %v6170_v45 = vadd.f32 %v9499_v35, %v7881_v20  ;;  %v6164_v48 = vpop.f32.mrb[161].mxu0 }
0x1877   : > { %v6165_v53 = vadd.f32 %v7881_v20, %v6164_v48  ;;  %10670 = vrot.lane.b32.xlu1 %v13094_v56, %s11120_s14  ;;  %10330 = vmatprep.subr.msk.bf16.mxu1 %vm12434_vm4, %v10328_v1 }
0x1878   : > { %10333 = vmatpush3.bf16.xpose.msk.msra.mxu1 %vm12434_vm4, %v10328_v1 }
0x1879   : > { %v13102_v9 = vpack.i.bf16 %v6170_v45, %v6165_v53  ;;  %v10334_v41 = vpack.c.bf16 %v6170_v45, %v6165_v53 }
0x187b   : > { %10680 = vrot.lane.b32.xlu1 %v13094_v56, %s11121_s16  ;;  %10675 = vrot.lane.b32.xlu0 %v13102_v9, %s11120_s14 }
0x187c   : > { %10336 = vmatprep.subr.msk.bf16.mxu1 %vm12434_vm4, %v10334_v41 }
0x187f   : > { %10685 = vrot.lane.b32.xlu1 %v13094_v56, %s11122_s19 }
0x1880   : > { %10339 = vmatpush3.bf16.xpose.msk.msra.mxu1 %vm12434_vm4, %v10334_v41 }
0x18e9   : > { %v13114_v10 = vpop.permute.xlu1 %10670 }
0x18ea   : > { %v10673_v18 = vunpack.i.h.bf16 %v13114_v10  ;;  %v10672_v11 = vunpack.i.l.bf16 %v13114_v10 }
0x18ec   : > { %v10340_v31 = vpack.c.bf16 %v10673_v18, %v10672_v11 }
0x18ed   : > { %v13118_v8 = vpop.permute.xlu1 %10680  ;;  %v13120_v32 = vpop.permute.xlu0 %10675 }
0x18ee   : > { %v10683_v0 = vunpack.i.h.bf16 %v13118_v8  ;;  %v10682_v27 = vunpack.i.l.bf16 %v13118_v8  ;;  %v10678_v6 = vunpack.i.h.bf16 %v13120_v32  ;;  %v10677_v7 = vunpack.i.l.bf16 %v13120_v32  ;;  %10342 = vmatprep.subr.msk.bf16.mxu0 %vm12434_vm4, %v10340_v31 }
0x18ef   : > { %10345 = vmatpush3.bf16.xpose.msk.msra.mxu0 %vm12434_vm4, %v10340_v31 }
0x18f0   : > { %v10352_v34 = vpack.c.bf16 %v10683_v0, %v10682_v27  ;;  %v10346_v54 = vpack.c.bf16 %v10678_v6, %v10677_v7 }
0x18f1   : > { %v13130_v49 = vpop.permute.xlu1 %10685 }
0x18f2   : > { %v10688_v15 = vunpack.i.h.bf16 %v13130_v49  ;;  %v10687_v14 = vunpack.i.l.bf16 %v13130_v49  ;;  %10348 = vmatprep.subr.msk.bf16.mxu0 %vm12434_vm4, %v10346_v54  ;;  %10354 = vmatprep.subr.msk.bf16.mxu1 %vm12434_vm4, %v10352_v34 }
0x18f4   : > { %v10364_v47 = vpack.c.bf16 %v10688_v15, %v10687_v14 }
0x18f7   : > { %10351 = vmatpush3.bf16.xpose.msk.msra.mxu0 %vm12434_vm4, %v10346_v54 }
0x18f8   : > { %10366 = vmatprep.subr.msk.bf16.mxu0 %vm12434_vm4, %v10364_v47 }
0x1902   : > { %v9485_v52 = vpop.f32.mrb[138].mxu1 }
0x1903   : > { %v6064_v23 = vadd.f32 %v9485_v52, %v7878_v36  ;;  %v6058_v39 = vpop.f32.mrb[139].mxu1 }
0x1904   : > { %v6059_v61 = vadd.f32 %v7878_v36, %v6058_v39 }
0x1905   : > { %6182 = vrot.lane.b32.xlu1 %v6064_v23, %s11120_s14 }
0x1906   : > { %6180 = vrot.lane.b32.xlu0 %v6059_v61, %s11120_s14  ;;  %9508 = vmatprep.mubr.msk.f32.mxu1 %vm3328_vm3, %v6059_v61 }
0x1907   : > { %9509 = vmatmul.mubr.msk.f32.vlgmr.msra.gmra.mrb[140].mxu1 %vm3328_vm3, %v6064_v23 }
0x1908   : > { %10357 = vmatpush3.bf16.xpose.msk.msra.mxu1 %vm12434_vm4, %v10352_v34 }
0x1909   : > { %10695 = vrot.lane.b32.xlu1 %v13102_v9, %s11122_s19 }
0x190a   : > { %10690 = vrot.lane.b32.xlu0 %v13102_v9, %s11121_s16 }
0x190d   : > { %6186 = vrot.lane.b32.xlu1 %v6064_v23, %s11121_s16 }
0x190e   : > { %6184 = vrot.lane.b32.xlu0 %v6059_v61, %s11121_s16 }
0x1911   : > { %6190 = vrot.lane.b32.xlu1 %v6064_v23, %s11122_s19 }
0x1912   : > { %6188 = vrot.lane.b32.xlu0 %v6059_v61, %s11122_s19  ;;  %s450_s19 = sand.u32 1, %s11101_s18  }
0x1913   : > { %s7653_s15 = sshll.u32 %s450_s19, 4  ;;  %s13378_s4 = scalar_lea.sflag [#allocation4], %s450_s19 }
0x1914   : > { %s452_s13 = scalar_lea.vmem [#allocation11], %s7653_s15 }
0x1977   : > { %v6183_v38 = vpop.permute.xlu1 %6182 }
0x1978   : > { %v6181_v63 = vpop.permute.xlu0 %6180 }
0x1979   : > { %9519 = vmatprep.mubr.msk.f32.mxu0 %vm3328_vm3, %v6181_v63 }
0x197a   : > { %9520 = vmatmul.mubr.msk.f32.vlgmr.msra.gmra.mrb[162].mxu0 %vm3328_vm3, %v6183_v38 }
0x197b   : > { %10369 = vmatpush3.bf16.xpose.msk.msra.mxu0 %vm12434_vm4, %v10364_v47  ;;  %v13163_v42 = vpop.permute.xlu1 %10695 }
0x197c   : > { %v10698_v59 = vunpack.i.h.bf16 %v13163_v42  ;;  %v10697_v40 = vunpack.i.l.bf16 %v13163_v42  ;;  %v13167_v24 = vpop.permute.xlu0 %10690 }
0x197d   : > { %v10693_v58 = vunpack.i.h.bf16 %v13167_v24  ;;  %v10692_v22 = vunpack.i.l.bf16 %v13167_v24 }
0x197e   : > { %v10370_v5 = vpack.c.bf16 %v10698_v59, %v10697_v40 }
0x197f   : > { %v10358_v26 = vpack.c.bf16 %v10693_v58, %v10692_v22  ;;  %v6187_v25 = vpop.permute.xlu1 %6186 }
0x1980   : > { %v6185_v57 = vpop.permute.xlu0 %6184  ;;  %10372 = vmatprep.subr.msk.bf16.mxu0 %vm12434_vm4, %v10370_v5 }
0x1981   : > { %10360 = vmatprep.subr.msk.bf16.mxu1 %vm12434_vm4, %v10358_v26  ;;  %9530 = vmatprep.mubr.msk.f32.mxu1 %vm3328_vm3, %v6185_v57 }
0x1982   : > { %10363 = vmatpush3.bf16.xpose.msk.msra.mxu1 %vm12434_vm4, %v10358_v26 }
0x1983   : > { %10375 = vmatpush3.bf16.xpose.msk.msra.mxu0 %vm12434_vm4, %v10370_v5  ;;  %v6191_v51 = vpop.permute.xlu1 %6190 }
0x1984   : > { %v6189_v12 = vpop.permute.xlu0 %6188 }
0x1985   : > { %9541 = vmatprep.mubr.msk.f32.mxu0 %vm3328_vm3, %v6189_v12 }
0x1989   : > { %9531 = vmatmul.mubr.msk.f32.vlgmr.msra.gmra.mrb[142].mxu1 %vm3328_vm3, %v6187_v25 }
0x198a   : > { %9542 = vmatmul.mubr.msk.f32.vlgmr.msra.gmra.mrb[164].mxu0 %vm3328_vm3, %v6191_v51 }
0x19da   : > { %v9510_v43 = vpop.f32.mrb[140].mxu1 }
0x19db   : > { %v6569_v29 = vmul.f32 0.35355338, %v9510_v43  ;;  %v6298_v28 = vpop.f32.mrb[141].mxu1 }
0x19dc   : > { %v6568_v50 = vmul.f32 0.35355338, %v6298_v28 }
0x19dd   : > { %v6579_v33 = vsel %vm1226_vm0, %v6569_v29, -inf }
0x19de   : > { %6580 = vmax.xlane.f32.xlu1 %v6579_v33  ;;  %v6576_v37 = vsel %vm1226_vm0, %v6568_v50, -inf }
0x19df   : > { %6577 = vmax.xlane.f32.xlu0 %v6576_v37 }
0x1a4d   : > { %v9521_v4 = vpop.f32.mrb[162].mxu0 }
0x1a4e   : > { %v6571_v30 = vmul.f32 0.35355338, %v9521_v4  ;;  %v6385_v13 = vpop.f32.mrb[163].mxu0 }
0x1a4f   : > { %v6570_v21 = vmul.f32 0.35355338, %v6385_v13 }
0x1a50   : > { %v6585_v44 = vsel %vm1226_vm0, %v6571_v30, -inf }
0x1a51   : > { %6586 = vmax.xlane.f32.xlu0 %v6585_v44  ;;  %v6582_v17 = vsel %vm1226_vm0, %v6570_v21, -inf }
0x1a55   : > { %6583 = vmax.xlane.f32.xlu0 %v6582_v17 }
0x1a5c   : > { %v9532_v62 = vpop.f32.mrb[142].mxu1 }
0x1a5d   : > { %v6573_v60 = vmul.f32 0.35355338, %v9532_v62  ;;  %v9543_v20 = vpop.f32.mrb[164].mxu0  ;;  %v6472_v55 = vpop.f32.mrb[143].mxu1 }
0x1a5e   : > { %v6572_v3 = vmul.f32 0.35355338, %v6472_v55  ;;  %v6559_v46 = vpop.f32.mrb[165].mxu0  ;;  %v6575_v19 = vmul.f32 0.35355338, %v9543_v20 }
0x1a5f   : > { %v6591_v35 = vsel %vm1226_vm0, %v6573_v60, -inf  ;;  %v6574_v1 = vmul.f32 0.35355338, %v6559_v46 }
0x1a60   : > { %6592 = vmax.xlane.f32.xlu0 %v6591_v35  ;;  %v6588_v45 = vsel %vm1226_vm0, %v6572_v3, -inf  ;;  %v6597_v48 = vsel %vm1226_vm0, %v6575_v19, -inf }
0x1a61   : > { %6589 = vmax.xlane.f32.xlu1 %v6588_v45  ;;  %v6594_v53 = vsel %vm1226_vm0, %v6574_v1, -inf }
0x1a64   : > { %6598 = vmax.xlane.f32.xlu0 %v6597_v48 }
0x1a65   : > { %6595 = vmax.xlane.f32.xlu1 %v6594_v53 }
0x1a6b   : > { %v6581_v41 = vpop.xlane.xlu1 %6580 }
0x1a6c   : > { %v6601_v18 = vsub.f32 %v6569_v29, %v6581_v41  ;;  %v6578_v31 = vpop.xlane.xlu0 %6577 }
0x1a6e   : > { %v6610_v11 = vmul.f32 1.442695, %v6601_v18 }
0x1a70   : > { %10855 = vpow2.f32 %v6610_v11 }
0x1a76   : > { %10700 = vrot.lane.b32.xlu1 %v13094_v56, %s11118_s22  ;;  %v6600_v56 = vsub.f32 %v6568_v50, %v6578_v31 }
0x1a78   : > { %v6608_v0 = vmul.f32 1.442695, %v6600_v56 }
0x1a7a   : > { %10705 = vrot.lane.b32.xlu0 %v13114_v10, %s11118_s22  ;;  %10710 = vrot.lane.b32.xlu1 %v13102_v9, %s11118_s22  ;;  %10857 = vpow2.f32 %v6608_v0  ;;  %v13203_v10 = vpop.eup %10855 }
0x1a7b   : > { %v6627_v9 = vsel %vm1226_vm0, %v13203_v10, 0.0 }
0x1a7e   : > { %10720 = vrot.lane.b32.xlu0 %v13118_v8, %s11118_s22  ;;  %10715 = vrot.lane.b32.xlu1 %v13120_v32, %s11118_s22 }
0x1a82   : > { %10725 = vrot.lane.b32.xlu1 %v13130_v49, %s11118_s22 }
0x1a84   : > { %v13207_v8 = vpop.eup %10857 }
0x1a85   : > { %v6624_v32 = vsel %vm1226_vm0, %v13207_v8, 0.0 }
0x1a9d   : > { %6628 = vadd.xlane.f32.xlu0 %v6627_v9 }
0x1aa6   : > { %6625 = vadd.xlane.f32.xlu1 %v6624_v32 }
0x1ade   : > { %v6587_v27 = vpop.xlane.xlu0 %6586 }
0x1adf   : > { %v6603_v6 = vsub.f32 %v6571_v30, %v6587_v27 }
0x1ae1   : > { %v6614_v7 = vmul.f32 1.442695, %v6603_v6 }
0x1ae2   : > { %v6584_v34 = vpop.xlane.xlu0 %6583 }
0x1ae3   : > { %10859 = vpow2.f32 %v6614_v7  ;;  %v6602_v54 = vsub.f32 %v6570_v21, %v6584_v34 }
0x1ae5   : > { %v6612_v49 = vmul.f32 1.442695, %v6602_v54 }
0x1ae7   : > { %10861 = vpow2.f32 %v6612_v49 }
0x1aed   : > { %v13211_v15 = vpop.eup %10859  ;;  %v6593_v14 = vpop.xlane.xlu0 %6592 }
0x1aee   : > { %v6605_v47 = vsub.f32 %v6573_v60, %v6593_v14  ;;  %v6590_v36 = vpop.xlane.xlu1 %6589  ;;  %v6633_v52 = vsel %vm1226_vm0, %v13211_v15, 0.0 }
0x1aef   : > { %v6604_v23 = vsub.f32 %v6572_v3, %v6590_v36  ;;  %6634 = vadd.xlane.f32.xlu0 %v6633_v52 }
0x1af0   : > { %v6618_v39 = vmul.f32 1.442695, %v6605_v47 }
0x1af1   : > { %v13215_v61 = vpop.eup %10861  ;;  %v6616_v38 = vmul.f32 1.442695, %v6604_v23  ;;  %v6599_v63 = vpop.xlane.xlu0 %6598 }
0x1af2   : > { %10863 = vpow2.f32 %v6618_v39  ;;  %v6607_v59 = vsub.f32 %v6575_v19, %v6599_v63  ;;  %v6596_v40 = vpop.xlane.xlu1 %6595  ;;  %v6630_v58 = vsel %vm1226_vm0, %v13215_v61, 0.0 }
0x1af3   : > { %10865 = vpow2.f32 %v6616_v38  ;;  %v6606_v22 = vsub.f32 %v6574_v1, %v6596_v40  ;;  %6631 = vadd.xlane.f32.xlu1 %v6630_v58 }
0x1af4   : > { %v6622_v5 = vmul.f32 1.442695, %v6607_v59 }
0x1af5   : > { %v6620_v26 = vmul.f32 1.442695, %v6606_v22  ;;  %v10706_v57 = vpop.permute.xlu0 %10705 }
0x1af6   : > { %10867 = vpow2.f32 %v6622_v5  ;;  %v10708_v25 = vunpack.i.h.bf16 %v10706_v57  ;;  %v10707_v12 = vunpack.i.l.bf16 %v10706_v57  ;;  %v10701_v51 = vpop.permute.xlu1 %10700 }
0x1af7   : > { %10869 = vpow2.f32 %v6620_v26  ;;  %v10703_v43 = vunpack.i.h.bf16 %v10701_v51  ;;  %v10702_v29 = vunpack.i.l.bf16 %v10701_v51 }
0x1af8   : > { %v10384_v28 = vpack.c.bf16 %v10708_v25, %v10707_v12 }
0x1af9   : > { %v10376_v50 = vpack.c.bf16 %v10703_v43, %v10702_v29  ;;  %v10721_v33 = vpop.permute.xlu0 %10720  ;;  %v6173_v43 = vld [vmem:[%s13430_s10 + $0x15e] sm:$0xff]  ;;  %v6174_v29 = vld [vmem:[%s13430_s10 + $0x166] sm:$0xff] }
0x1afa   : > { %10385 = vmatprep.subr.bf16.mxu0 %v10384_v28  ;;  %v10711_v37 = vpop.permute.xlu1 %10710  ;;  %v10723_v4 = vunpack.i.h.bf16 %v10721_v33  ;;  %v10722_v30 = vunpack.i.l.bf16 %v10721_v33 }
0x1afb   : > { %v10713_v13 = vunpack.i.h.bf16 %v10711_v37  ;;  %v10712_v21 = vunpack.i.l.bf16 %v10711_v37  ;;  %10377 = vmatprep.subr.bf16.mxu1 %v10376_v50  ;;  %10387 = vmatpush3.bf16.msra.mxu0 %v10384_v28  ;;  %v10408_v28 = vpack.c.bf16 %v6174_v29, %v6173_v43  ;;  %v6175_v37 = vld [vmem:[%s13430_s10 + $0x16e] sm:$0xff]  ;;  %v7921_v29 = vld [vmem:[%s13430_s10 + $0x17f] ss:$0 sm:$0xff] }
0x1afc   : > { %v13219_v44 = vpop.eup %10863  ;;  %10379 = vmatpush3.bf16.msra.mxu1 %v10376_v50  ;;  %v10392_v3 = vpack.c.bf16 %v10723_v4, %v10722_v30  ;;  %v6176_v4 = vld [vmem:[%s13430_s10 + $0x176] sm:$0xff] }
0x1afd   : > { %v13221_v17 = vpop.eup %10865  ;;  %v10380_v62 = vpack.c.bf16 %v10713_v13, %v10712_v21  ;;  %v6639_v60 = vsel %vm1226_vm0, %v13219_v44, 0.0  ;;  %v10412_v30 = vpack.c.bf16 %v6176_v4, %v6175_v37 }
0x1afe   : > { %6640 = vadd.xlane.f32.xlu0 %v6639_v60  ;;  %v10716_v20 = vpop.permute.xlu1 %10715  ;;  %v6636_v55 = vsel %vm1226_vm0, %v13221_v17, 0.0 }
0x1aff   : > { %v10718_v46 = vunpack.i.h.bf16 %v10716_v20  ;;  %v10717_v19 = vunpack.i.l.bf16 %v10716_v20  ;;  %10381 = vmatprep.subr.bf16.mxu1 %v10380_v62  ;;  %6637 = vadd.xlane.f32.xlu1 %v6636_v55 }
0x1b00   : > { %v13227_v35 = vpop.eup %10867  ;;  %10383 = vmatpush3.bf16.msra.mxu1 %v10380_v62 }
0x1b01   : > { %v13229_v1 = vpop.eup %10869  ;;  %v10388_v45 = vpack.c.bf16 %v10718_v46, %v10717_v19  ;;  %10393 = vmatprep.subr.bf16.mxu1 %v10392_v3  ;;  %v6645_v48 = vsel %vm1226_vm0, %v13227_v35, 0.0 }
0x1b02   : > { %6646 = vadd.xlane.f32.xlu0 %v6645_v48  ;;  %v10726_v53 = vpop.permute.xlu1 %10725  ;;  %v6642_v41 = vsel %vm1226_vm0, %v13229_v1, 0.0 }
0x1b03   : > { %v10728_v18 = vunpack.i.h.bf16 %v10726_v53  ;;  %v10727_v11 = vunpack.i.l.bf16 %v10726_v53  ;;  %6643 = vadd.xlane.f32.xlu1 %v6642_v41  ;;  %10389 = vmatprep.subr.bf16.mxu0 %v10388_v45  ;;  %v7918_v41 = vld [vmem:[%s13430_s10 + $0x17e] ss:$0 sm:$0xff] }
0x1b04   : > { %10391 = vmatpush3.bf16.msra.mxu0 %v10388_v45 }
0x1b05   : > { %v10400_v31 = vpack.c.bf16 %v10728_v18, %v10727_v11 }
0x1b07   : > { %10401 = vmatprep.subr.bf16.mxu0 %v10400_v31 }
0x1b14   : > { %10735 = vrot.lane.b32.xlu1 %v13163_v42, %s11118_s22 }
0x1b18   : > { %10730 = vrot.lane.b32.xlu0 %v13167_v24, %s11118_s22 }
0x1b2a   : > { %v6629_v56 = vpop.xlane.xlu0 %6628 }
0x1b2b   : > { %10871 = vrcp.f32 %v6629_v56 }
0x1b33   : > { %v6626_v0 = vpop.xlane.xlu1 %6625 }
0x1b34   : > { %10873 = vrcp.f32 %v6626_v0 }
0x1b35   : > { %v10872_v9 = vpop.eup %10871 }
0x1b36   : > { %v6651_v6 = vmul.f32 %v10872_v9, %v13203_v10 }
0x1b3e   : > { %v10874_v32 = vpop.eup %10873 }
0x1b3f   : > { %v6649_v27 = vmul.f32 %v10874_v32, %v13207_v8 }
0x1b41   : > { %9552 = vmatprep.mubr.msk.f32.mxu1 %vm1226_vm0, %v6649_v27 }
0x1b42   : > { %9553 = vmatmul.mubr.msk.f32.vlgmr.msra.gmra.mrb[144].mxu1 %vm1226_vm0, %v6651_v6 }
0x1b43   : > { %10395 = vmatpush3.bf16.msra.mxu1 %v10392_v3 }
0x1b7c   : > { %v6635_v7 = vpop.xlane.xlu0 %6634 }
0x1b7d   : > { %10875 = vrcp.f32 %v6635_v7 }
0x1b80   : > { %v6632_v42 = vpop.xlane.xlu1 %6631 }
0x1b81   : > { %10877 = vrcp.f32 %v6632_v42 }
0x1b87   : > { %v10876_v24 = vpop.eup %10875 }
0x1b88   : > { %v6655_v8 = vmul.f32 %v10876_v24, %v13211_v15 }
0x1b8b   : > { %v10878_v34 = vpop.eup %10877  ;;  %v6641_v54 = vpop.xlane.xlu0 %6640 }
0x1b8c   : > { %10879 = vrcp.f32 %v6641_v54  ;;  %v6638_v49 = vpop.xlane.xlu1 %6637  ;;  %v6653_v14 = vmul.f32 %v10878_v34, %v13215_v61 }
0x1b8d   : > { %10881 = vrcp.f32 %v6638_v49 }
0x1b8e   : > { %9563 = vmatprep.mubr.msk.f32.mxu0 %vm1226_vm0, %v6653_v14 }
0x1b8f   : > { %v6647_v10 = vpop.xlane.xlu0 %6646  ;;  %9564 = vmatmul.mubr.msk.f32.vlgmr.msra.gmra.mrb[166].mxu0 %vm1226_vm0, %v6655_v8 }
0x1b90   : > { %10883 = vrcp.f32 %v6647_v10  ;;  %10403 = vmatpush3.bf16.msra.mxu0 %v10400_v31  ;;  %v6644_v47 = vpop.xlane.xlu1 %6643  ;;  %v7194_v10 = vld [vmem:[%s13430_s10 + $0x189] sm:$0xff] }
0x1b91   : > { %10885 = vrcp.f32 %v6644_v47 }
0x1b93   : > { %v10731_v36 = vpop.permute.xlu0 %10730 }
0x1b94   : > { %v10733_v52 = vunpack.i.h.bf16 %v10731_v36  ;;  %v10732_v23 = vunpack.i.l.bf16 %v10731_v36  ;;  %v10736_v39 = vpop.permute.xlu1 %10735  ;;  %v7195_v36 = vld [vmem:[%s13430_s10 + $0x191] sm:$0xff] }
0x1b95   : > { %v10738_v38 = vunpack.i.h.bf16 %v10736_v39  ;;  %v10737_v63 = vunpack.i.l.bf16 %v10736_v39  ;;  %v7198_v39 = vld [vmem:[%s13430_s10 + $0x1a2] sm:$0xff] }
0x1b96   : > { %v10880_v59 = vpop.eup %10879  ;;  %v10396_v61 = vpack.c.bf16 %v10733_v52, %v10732_v23  ;;  %v7196_v52 = vld [vmem:[%s13430_s10 + $0x199] sm:$0xff] }
0x1b97   : > { %v10882_v40 = vpop.eup %10881  ;;  %v10404_v15 = vpack.c.bf16 %v10738_v38, %v10737_v63  ;;  %v6659_v5 = vmul.f32 %v10880_v59, %v13219_v44  ;;  %v10420_v23 = vpack.c.bf16 %v7196_v52, %v7195_v36  ;;  %v7199_v38 = vld [vmem:[%s13430_s10 + $0x1aa] sm:$0xff]  ;;  %v7200_v63 = vld [vmem:[%s13430_s10 + $0x1b2] sm:$0xff] }
0x1b98   : > { %10397 = vmatprep.subr.bf16.mxu1 %v10396_v61  ;;  %v6657_v58 = vmul.f32 %v10882_v40, %v13221_v17  ;;  %v10424_v59 = vpack.c.bf16 %v7199_v38, %v7198_v39 }
0x1b99   : > { %10399 = vmatpush3.bf16.msra.mxu1 %v10396_v61  ;;  %10405 = vmatprep.subr.bf16.mxu0 %v10404_v15  ;;  %v7201_v61 = vld [vmem:[%s13430_s10 + $0x1ba] sm:$0xff] }
0x1b9a   : > { %v10884_v22 = vpop.eup %10883  ;;  %9574 = vmatprep.mubr.msk.f32.mxu1 %vm1226_vm0, %v6657_v58  ;;  %10407 = vmatpush3.bf16.msra.mxu0 %v10404_v15  ;;  %v10428_v40 = vpack.c.bf16 %v7201_v61, %v7200_v63  ;;  %v7202_v15 = vld [vmem:[%s13430_s10 + $0x1c2] sm:$0xff]  ;;  %v7203_v58 = vld [vmem:[%s13430_s10 + $0x1ca] sm:$0xff] }
0x1b9b   : > { %v10886_v26 = vpop.eup %10885  ;;  %v6663_v25 = vmul.f32 %v10884_v22, %v13227_v35  ;;  %10409 = vmatprep.subr.bf16.mxu1 %v10408_v28  ;;  %v10432_v22 = vpack.c.bf16 %v7203_v58, %v7202_v15  ;;  %v7930_v58 = vld [vmem:[%s13430_s10 + $0x1e4] ss:$0 sm:$0xff] }
0x1b9c   : > { %9575 = vmatmul.mubr.msk.f32.vlgmr.msra.gmra.mrb[146].mxu1 %vm1226_vm0, %v6659_v5  ;;  %v6661_v57 = vmul.f32 %v10886_v26, %v13229_v1 }
0x1b9d   : > { %10411 = vmatpush3.bf16.msra.mxu1 %v10408_v28 }
0x1b9e   : > { %9585 = vmatprep.mubr.msk.f32.mxu0 %vm1226_vm0, %v6661_v57  ;;  %10413 = vmatprep.subr.bf16.mxu1 %v10412_v30 }
0x1b9f   : > { %9586 = vmatmul.mubr.msk.f32.vlgmr.msra.gmra.mrb[168].mxu0 %vm1226_vm0, %v6663_v25 }
0x1ba1   : > { %10415 = vmatpush3.bf16.msra.mxu1 %v10412_v30 }
0x1ba2   : > { %10425 = vmatprep.subr.bf16.mxu1 %v10424_v59 }
0x1c15   : > { %v9554_v12 = vpop.f32.mrb[144].mxu1 }
0x1c16   : > { %v6748_v51 = vpop.f32.mrb[145].mxu1 }
0x1c62   : > { %v9565_v50 = vpop.f32.mrb[166].mxu0 }
0x1c63   : > { %7040 = vrot.lane.b32.xlu1 %v9565_v50, %s11123_s12  ;;  %v6841_v33 = vpop.f32.mrb[167].mxu0  ;;  %v7922_v50 = vld [vmem:[%s13430_s10 + $0x180] ss:$0 sm:$0xff] }
0x1c64   : > { %7038 = vrot.lane.b32.xlu0 %v6841_v33, %s11123_s12 }
0x1c6f   : > { %v9576_v13 = vpop.f32.mrb[146].mxu1 }
0x1c70   : > { %v6934_v21 = vpop.f32.mrb[147].mxu1  ;;  %7048 = vrot.lane.b32.xlu1 %v9576_v13, %s11124_s11 }
0x1c71   : > { %7046 = vrot.lane.b32.xlu0 %v6934_v21, %s11124_s11  ;;  %s7527_s11 = sshll.u32 %s452_s13, 4  ;;  %s13371_s11 = int_to_ptr.vmem [resolvable:$true] %s7527_s11 }
0x1c72   : > { %v9587_v44 = vpop.f32.mrb[168].mxu0  ;;  %s11035_s28 = scalar_lea.vmem %s13371_s11, 256 }
0x1c73   : > { %v7027_v17 = vpop.f32.mrb[169].mxu0  ;;  %p11036_p8 = scmp.ne.s32.totalorder %s13371_s11, %s11035_s28 }
0x1c74   : > { %7056 = vrot.lane.b32.xlu1 %v9587_v44, %s11125_s17  ;;  %v7204_v44 = vld [vmem:[%s13430_s10 + $0x1d2] sm:$0xff] }
0x1c75   : > { %7054 = vrot.lane.b32.xlu0 %v7027_v17, %s11125_s17  ;;  %v7205_v17 = vld [vmem:[%s13430_s10 + $0x1da] sm:$0xff]  ;;  %s7940_s17 = sshll.u32 %s11209_s21, 8  ;;  %p11037_p13 = pnand %p11036_p8, %p13466_p11 }
0x1c76   : > { %s13376_s25 = scalar_lea.hbm %s13465_s26, %s7940_s17  ;;  %s11126_s21 = smov [#allocation11]  }
0x1c77   : > { %p11038_p1 = pneg %p11037_p13  ;;  %s11039_s30 = sshll.u32 %s11126_s21, 4  ;;  %s11040_s30 = int_to_ptr.vmem [resolvable:$false] %s11039_s30 }
0x1c78   : > { %s11041_s22 = scalar_lea.vmem %s11040_s30, 512  ;;  %p11042_p6 = scmp.lt.s32.totalorder %s13371_s11, %s11040_s30 }
0x1c79   : > { %p11043_p9 = scmp.lt.s32.totalorder %s11041_s22, %s11035_s28 }
0x1c7b   : > { %p11044_p5 = por %p11043_p9, %p11042_p6 }
0x1c7d   : > { %p11045_p0 = pnand %p11044_p5, %p11038_p1 }
0x1cd5   : > { %v7041_v62 = vpop.permute.xlu1 %7040 }
0x1cd6   : > { %v7039_v60 = vpop.permute.xlu0 %7038  ;;  %v7061_v19 = vsel %vm3328_vm3, %v9554_v12, %v7041_v62  ;;  %v10436_v62 = vpack.c.bf16 %v7205_v17, %v7204_v44 }
0x1cd7   : > { %v7060_v3 = vsel %vm3328_vm3, %v6748_v51, %v7039_v60  ;;  %v7923_v60 = vld [vmem:[%s13430_s10 + $0x1a1] ss:$0 sm:$0xff] }
0x1ce2   : > { %v7049_v20 = vpop.permute.xlu1 %7048 }
0x1ce3   : > { %v7047_v55 = vpop.permute.xlu0 %7046  ;;  %v7063_v45 = vsel %vm4437_vm5, %v7061_v19, %v7049_v20 }
0x1ce4   : > { %v7062_v35 = vsel %vm4437_vm5, %v7060_v3, %v7047_v55 }
0x1ce6   : > { %v7057_v46 = vpop.permute.xlu1 %7056 }
0x1ce7   : > { %v7055_v1 = vpop.permute.xlu0 %7054  ;;  %v7065_v53 = vsel %vm4442_vm6, %v7063_v45, %v7057_v46 }
0x1ce8   : > { %v7064_v48 = vsel %vm4442_vm6, %v7062_v35, %v7055_v1  ;;  %v7926_v1 = vld [vmem:[%s13430_s10 + $0x1e2] ss:$0 sm:$0xff] }
0x1ce9   : > { %9596 = vmatprep.mubr.msk.f32.mxu1 %vm1226_vm0, %v7064_v48 }
0x1cea   : > { %9597 = vmatmul.mubr.msk.f32.vlgmr.msra.gmra.mrb[148].mxu1 %vm1226_vm0, %v7065_v53 }
0x1ceb   : > { %10427 = vmatpush3.bf16.msra.mxu1 %v10424_v59  ;;  %v7929_v59 = vld [vmem:[%s13430_s10 + $0x1e3] ss:$0 sm:$0xff] }
0x1cec   : > { %10429 = vmatprep.subr.bf16.mxu1 %v10428_v40 }
0x1cef   : > { %10431 = vmatpush3.bf16.msra.mxu1 %v10428_v40 }
0x1cf0   : > { %10433 = vmatprep.subr.bf16.mxu1 %v10432_v22 }
0x1cf3   : > { %10435 = vmatpush3.bf16.msra.mxu1 %v10432_v22 }
0x1cf4   : > { %10437 = vmatprep.subr.bf16.mxu1 %v10436_v62 }
0x1cf7   : > { %10439 = vmatpush3.bf16.msra.mxu1 %v10436_v62 }
0x1dbd   : > { %v9598_v18 = vpop.f32.mrb[148].mxu1 }
0x1dbe   : > { %v7148_v11 = vadd.f32 %v9598_v18, %v7918_v41  ;;  %v7142_v31 = vpop.f32.mrb[149].mxu1 }
0x1dbf   : > { %v7143_v56 = vadd.f32 %v7918_v41, %v7142_v31 }
0x1dc0   : > { %v7152_v0 = vadd.f32 %v7148_v11, %v13085_v2 }
0x1dc1   : > { %v7151_v9 = vadd.f32 %v7143_v56, %v13083_v16  ;;  %v7193_v16 = vld [vmem:[%s13430_s10 + $0x181] sm:$0xff] }
0x1dc2   : > { %v7158_v32 = vsel %vm1226_vm0, %v7152_v0, 0.0  ;;  %v10416_v47 = vpack.c.bf16 %v7194_v10, %v7193_v16  ;;  %v7424_v16 = vld [vmem:[%s13430_s10 + $0x1fd] sm:$0xff] }
0x1dc3   : > { %7159 = vadd.xlane.f32.xlu1 %v7158_v32  ;;  %v7155_v27 = vsel %vm1226_vm0, %v7151_v9, 0.0 }
0x1dc4   : > { %7156 = vadd.xlane.f32.xlu0 %v7155_v27  ;;  %10417 = vmatprep.subr.bf16.mxu0 %v10416_v47 }
0x1dc5   : > { %10419 = vmatpush3.bf16.msra.mxu0 %v10416_v47 }
0x1dc6   : > { %10421 = vmatprep.subr.bf16.mxu0 %v10420_v23 }
0x1dc9   : > { %10423 = vmatpush3.bf16.msra.mxu0 %v10420_v23 }
0x1e50   : > { %v7160_v6 = vpop.xlane.xlu1 %7159 }
0x1e51   : > { %v7162_v7 = vmul.f32 0.03125, %v7160_v6  ;;  %v7157_v42 = vpop.xlane.xlu0 %7156 }
0x1e52   : > { %v7161_v24 = vmul.f32 0.03125, %v7157_v42 }
0x1e53   : > { %v7164_v34 = vsub.f32 %v7152_v0, %v7162_v7 }
0x1e54   : > { %v7163_v54 = vsub.f32 %v7151_v9, %v7161_v24 }
0x1e55   : > { %v7166_v8 = vmul.f32 %v7164_v34, %v7164_v34 }
0x1e56   : > { %v7165_v49 = vmul.f32 %v7163_v54, %v7163_v54 }
0x1e57   : > { %v7170_v2 = vsel %vm1226_vm0, %v7166_v8, 0.0 }
0x1e58   : > { %v7167_v14 = vsel %vm1226_vm0, %v7165_v49, 0.0  ;;  %v7421_v49 = vld [vmem:[%s13430_s10 + $0x1e5] sm:$0xff] }
0x1e59   : > { %7168 = vadd.xlane.f32.xlu0 %v7167_v14  ;;  %v7422_v14 = vld [vmem:[%s13430_s10 + $0x1ed] sm:$0xff] }
0x1e5a   : > { %v10440_v8 = vpack.c.bf16 %v7422_v14, %v7421_v49 }
0x1e5c   : > { %10441 = vmatprep.subr.bf16.mxu0 %v10440_v8 }
0x1e5d   : > { %7171 = vadd.xlane.f32.xlu0 %v7170_v2  ;;  %v7423_v2 = vld [vmem:[%s13430_s10 + $0x1f5] sm:$0xff] }
0x1e5e   : > { %v10444_v10 = vpack.c.bf16 %v7424_v16, %v7423_v2 }
0x1ee6   : > { %v7169_v5 = vpop.xlane.xlu0 %7168 }
0x1ee7   : > { %v7173_v26 = vmul.f32 0.03125, %v7169_v5 }
0x1ee9   : > { %v7175_v57 = vadd.f32 1e-05, %v7173_v26 }
0x1eea   : > { %v7172_v25 = vpop.xlane.xlu0 %7171 }
0x1eeb   : > { %10887 = vrsqrt.f32 %v7175_v57  ;;  %v7174_v12 = vmul.f32 0.03125, %v7172_v25  ;;  %v7931_v25 = vld [vmem:[%s13430_s10 + $0x205] ss:$0 sm:$0xff] }
0x1eed   : > { %v7176_v51 = vadd.f32 1e-05, %v7174_v12 }
0x1eef   : > { %10889 = vrsqrt.f32 %v7176_v51 }
0x1ef5   : > { %v10888_v43 = vpop.eup %10887 }
0x1ef6   : > { %v7179_v28 = vmul.f32 %v10888_v43, %v7163_v54 }
0x1ef8   : > { %v7185_v33 = vmul.f32 %v7921_v29, %v7179_v28 }
0x1ef9   : > { %v10890_v37 = vpop.eup %10889 }
0x1efa   : > { %v7180_v4 = vmul.f32 %v10890_v37, %v7164_v34  ;;  %v7191_v30 = vadd.f32 %v7922_v50, %v7185_v33 }
0x1efc   : > { %v7186_v13 = vmul.f32 %v7921_v29, %v7180_v4  ;;  %9607 = vmatprep.mubr.msk.f32.mxu0 %vm1226_vm0, %v7191_v30 }
0x1efe   : > { %v7192_v21 = vadd.f32 %v7922_v50, %v7186_v13 }
0x1f00   : > { %9608 = vmatmul.mubr.msk.f32.vlgmr.msra.gmra.mrb[170].mxu0 %vm1226_vm0, %v7192_v21 }
0x1f01   : > { %10443 = vmatpush3.bf16.msra.mxu0 %v10440_v8 }
0x1f02   : > { %10445 = vmatprep.subr.bf16.mxu0 %v10444_v10 }
0x1f05   : > { %10447 = vmatpush3.bf16.msra.mxu0 %v10444_v10 }
0x1fd3   : > { %v9609_v20 = vpop.f32.mrb[170].mxu0 }
0x1fd4   : > { %v7289_v55 = vadd.f32 %v9609_v20, %v7923_v60  ;;  %v7283_v3 = vpop.f32.mrb[171].mxu0 }
0x1fd5   : > { %v7284_v46 = vadd.f32 %v7923_v60, %v7283_v3 }
0x1fd6   : > { %v7293_v35 = vmax.f32 %v7289_v55, 0.0 }
0x1fd7   : > { %v7292_v19 = vmax.f32 %v7284_v46, 0.0 }
0x1fd9   : > { %9626 = vmatprep.mubr.msk.f32.mxu1 %vm1168_vm1, %v7292_v19 }
0x1fda   : > { %9627 = vmatmul.mubr.msk.f32.vlgmr.msra.gmra.mrb[150].mxu1 %vm1168_vm1, %v7293_v35 }
0x20ad   : > { %v9628_v45 = vpop.f32.mrb[150].mxu1 }
0x20ae   : > { %v7376_v48 = vadd.f32 %v9628_v45, %v7926_v1  ;;  %v7370_v53 = vpop.f32.mrb[151].mxu1 }
0x20af   : > { %v7371_v41 = vadd.f32 %v7926_v1, %v7370_v53 }
0x20b0   : > { %v7380_v18 = vadd.f32 %v7376_v48, %v7192_v21 }
0x20b1   : > { %v7379_v11 = vadd.f32 %v7371_v41, %v7191_v30 }
0x20b2   : > { %v7386_v31 = vsel %vm1226_vm0, %v7380_v18, 0.0 }
0x20b3   : > { %7387 = vadd.xlane.f32.xlu0 %v7386_v31  ;;  %v7383_v56 = vsel %vm1226_vm0, %v7379_v11, 0.0 }
0x20b4   : > { %7384 = vadd.xlane.f32.xlu1 %v7383_v56 }
0x2140   : > { %v7388_v0 = vpop.xlane.xlu0 %7387 }
0x2141   : > { %v7390_v9 = vmul.f32 0.03125, %v7388_v0  ;;  %v7385_v32 = vpop.xlane.xlu1 %7384 }
0x2142   : > { %v7389_v27 = vmul.f32 0.03125, %v7385_v32 }
0x2143   : > { %v7392_v6 = vsub.f32 %v7380_v18, %v7390_v9 }
0x2144   : > { %v7391_v7 = vsub.f32 %v7379_v11, %v7389_v27 }
0x2145   : > { %v7394_v42 = vmul.f32 %v7392_v6, %v7392_v6 }
0x2146   : > { %v7393_v24 = vmul.f32 %v7391_v7, %v7391_v7 }
0x2147   : > { %v7398_v34 = vsel %vm1226_vm0, %v7394_v42, 0.0 }
0x2148   : > { %7399 = vadd.xlane.f32.xlu0 %v7398_v34  ;;  %v7395_v54 = vsel %vm1226_vm0, %v7393_v24, 0.0 }
0x2149   : > { %7396 = vadd.xlane.f32.xlu1 %v7395_v54 }
0x21d5   : > { %v7400_v47 = vpop.xlane.xlu0 %7399 }
0x21d6   : > { %v7402_v36 = vmul.f32 0.03125, %v7400_v47  ;;  %v7397_v52 = vpop.xlane.xlu1 %7396 }
0x21d7   : > { %v7401_v23 = vmul.f32 0.03125, %v7397_v52 }
0x21d8   : > { %v7404_v39 = vadd.f32 1e-05, %v7402_v36 }
0x21d9   : > { %v7403_v38 = vadd.f32 1e-05, %v7401_v23 }
0x21da   : > { %10891 = vrsqrt.f32 %v7404_v39 }
0x21db   : > { %10893 = vrsqrt.f32 %v7403_v38 }
0x21e4   : > { %v10892_v63 = vpop.eup %10891 }
0x21e5   : > { %v10894_v61 = vpop.eup %10893  ;;  %v7408_v40 = vmul.f32 %v10892_v63, %v7392_v6 }
0x21e6   : > { %v7407_v15 = vmul.f32 %v10894_v61, %v7391_v7 }
0x21e7   : > { %v7414_v22 = vmul.f32 %v7929_v59, %v7408_v40 }
0x21e8   : > { %v7413_v5 = vmul.f32 %v7929_v59, %v7407_v15 }
0x21e9   : > { %v7420_v57 = vadd.f32 %v7930_v58, %v7414_v22 }
0x21ea   : > { %v7419_v26 = vadd.f32 %v7930_v58, %v7413_v5 }
0x21ec   : > { %9637 = vmatprep.mubr.msk.f32.mxu0 %vm1226_vm0, %v7419_v26 }
0x21ed   : > { %9638 = vmatmul.mubr.msk.f32.vlgmr.msra.gmra.mrb[172].mxu0 %vm1226_vm0, %v7420_v57 }
0x22c0   : > { %v9639_v12 = vpop.f32.mrb[172].mxu0 }
0x22c1   : > { %v7508_v51 = vadd.f32 %v9639_v12, %v7931_v25  ;;  %v7502_v43 = vpop.f32.mrb[173].mxu0 }
0x22c2   : > { %v7503_v29 = vadd.f32 %v7931_v25, %v7502_v43 }
0x22c3   : > { %7512 = vst [vmem:[%s452_s13 + $0x8] sm:$0xff] %v7508_v51 }
0x22c4   : > { %7511 = vst [vmem:[%s452_s13] sm:$0xff] %v7503_v29 }
0x22c5   : > { %11048 = shalt.err (!%p11045_p0)
}
0x22c6   : > { %s11049_s14 = scalar_lea.hbm %s13376_s25, 256  ;;  %s11053_s15 = scalar_lea.hbm %s13465_s26, 512 }
0x22c7   : > { %p11050_p10 = scmp.ne.s32.totalorder %s13376_s25, %s11049_s14  ;;  %p11054_p4 = scmp.lt.u32.totalorder %s13376_s25, %s13465_s26 }
0x22c8   : > { %p11055_p12 = scmp.lt.u32.totalorder %s11053_s15, %s11049_s14  ;;  %p11057_p8 = scmp.lt.u32.totalorder %s11049_s14, %s13376_s25 }
0x22c9   : > { %p11051_p2 = pnand %p11050_p10, %p13466_p11 }
0x22ca   : > { %p11056_p7 = por %p11055_p12, %p11054_p4 }
0x22cb   : > { %p11052_p3 = pneg %p11051_p2 }
0x22cc   : > { %p11058_p13 = por %p11057_p8, %p11056_p7 }
0x22ce   : > { %p11059_p1 = pnand %p11058_p13, %p11052_p3 }
0x22d0   : > { %11062 = shalt.err (!%p11059_p1)
}
0x22d1   : > { %s11127_s13 = smov 128  }
0x22d2   : > { %10468 = dma.vmem_to_hbm [thread:$0]  (%p13466_p11), %s13371_s11, 256, %s13376_s25, %s13378_s4, %s11127_s13, %s11127_s13, %s11123_s12  }
0x22d3 PF: > { %s13467_s17 = sld [smem:[#allocation18_spill]]  ;;  %s13468_s23 = sld [smem:[#allocation16_spill]] }
0x22d4   : > { %s13469_s24 = sld [smem:[#allocation21_spill]] }
0x22d9   : > { %p10500_p6 = scmp.ge.s32.totalorder %s13467_s17, 2  ;;  %s7542_s28 = sand.u32 1, %s13468_s23  }
0x22da   : > { %p13470_p9 = scmp.ne.s32.totalorder %s13469_s24, 0  ;;  %s7543_s21 = scalar_lea.sflag [#allocation4], %s7542_s28 }
0x22dc   : > { %p10487_p5 = pnand %p10500_p6, %p13470_p9 }
0x22de   : > { %11092 = dma.done.wait (!%p10487_p5), %s7543_s21, 256  }
0x22df   : > { %11094 = vsyncadd (!%p10487_p5), %s7543_s21, 4294967040  ;;  %s13471_s20 = sld [smem:[#allocation19_spill]]  ;;  %s13472_s30 = sld [smem:[#allocation17_spill]] }
0x22e0   : > { %s13473_s19 = sld [smem:[#allocation20_spill]]  ;;  %s13474_s17 = smov %s11101_s18 }
0x22e5   : > { %p24_p0 = scmp.ge.s32.totalorder %s13471_s20, 4   ;;  %s13475_s18 = smov %s13472_s30 }
0x22e7   :  { %26 = sbr.rel (!%p24_p0) target bundleno = 9 (0x9), region = 128 }
0x22ee   :  { %7548 = vsyncpa [#allocation3], 1 }
0x22ef   :  { %7550 = vsyncpa [#allocation3 + $0x1], 1 }
0x22f0   :  { %7551 = vsyncpa [#allocation6], 1 }
0x22f1   :  { %7552 = vsyncpa [#allocation9], 1 }
0x22f2   :  { %7553 = vsyncpa [#allocation4], 1 }
0x22f3   :  { %7555 = vsyncpa [#allocation4 + $0x1], 1 }

</bundles_post_ra>
